<compile_context>
chip_gen: v7x
topology: tpu7x:2x2x1
jax: 0.10.0
libtpu: 0.0.40
codegen_flags: <defaults>
</compile_context>

<pallas_src>
import numpy as np

import jax
import jax.numpy as jnp
from jax.experimental import pallas as pl
from jax.experimental.pallas import tpu as pltpu

# Small synthetic model dimensions (stand-in for open_llama_3b).
B, S, H = 2, 8, 128          # batch, seq, hidden
BS = B * S                   # batch folded into sublanes: activations (16, 128)
NH, HD = 4, 32               # heads, head dim (NH * HD == H)
F = 256                      # MLP intermediate
V = 256                      # vocab size
L = 2                        # decoder layers
EPS = 1e-6
BF = jnp.bfloat16

# Block-diagonal causal additive bias (0 where attending is allowed, -1e30
# otherwise), built once on the host and passed in as a (BS, BS) input.
_r = np.arange(BS)
_causal = _r[:, None] >= _r[None, :]
_same_b = (_r[:, None] // S) == (_r[None, :] // S)
ATTN_BIAS = jnp.asarray(np.where(_causal & _same_b, 0.0, -1e30), dtype=jnp.float32)


def _rmsnorm(x, g):
    var = jnp.mean(x * x, axis=-1, keepdims=True)
    return x * jax.lax.rsqrt(var + EPS) * g


# ---------------------------------------------------------------------------
# Fused forward kernel: L decoder layers + final RMSNorm + LM head, one call.
# ---------------------------------------------------------------------------
def fused_forward_kernel(x_ref, bias_ref, *refs):
    w_refs = refs[:9 * L]
    g_final_ref, w_lm_ref, hid_ref, logits_ref = refs[9 * L:]

    x = x_ref[...]                      # (BS, H) f32
    bias = bias_ref[...]                # (BS, BS) f32, loop-invariant
    hid_ref[0] = x

    for li in range(L):                 # static loop over layers
        (wq_ref, wk_ref, wv_ref, wo_ref, wg_ref, wu_ref, wd_ref,
         g_attn_ref, g_mlp_ref) = w_refs[9 * li: 9 * (li + 1)]

        # --- causal self-attention (1/sqrt(HD) already folded into wq) ------
        # TODO(synk): no RoPE / position embedding in this synthetic model.
        h = _rmsnorm(x, g_attn_ref[...])
        hb = h.astype(BF)
        q = jnp.dot(hb, wq_ref[...], preferred_element_type=jnp.float32).astype(BF)
        k = jnp.dot(hb, wk_ref[...], preferred_element_type=jnp.float32).astype(BF)
        v = jnp.dot(hb, wv_ref[...], preferred_element_type=jnp.float32).astype(BF)
        wo = wo_ref[...]                # (H, H) bf16, sublane-sliced per head

        attn_out = None
        for n in range(NH):             # static loop over heads
            sl = slice(n * HD, (n + 1) * HD)
            # q_h @ k_h^T as dot_general (no materialized transpose).
            s = jax.lax.dot_general(q[:, sl], k[:, sl],
                                    (((1,), (1,)), ((), ())),
                                    preferred_element_type=jnp.float32)
            s = s + bias
            m = jnp.max(s, axis=-1, keepdims=True)
            p = jnp.exp(s - m)
            p = p * pl.reciprocal(jnp.sum(p, axis=-1, keepdims=True), approx=True)
            head = jnp.dot(p.astype(BF), v[:, sl],
                           preferred_element_type=jnp.float32)        # (BS, HD)
            # Fold the output projection into the head loop: sublane slice of
            # wo + full-lane-width MXU accumulate (no lane-axis concat).
            contrib = jnp.dot(head.astype(BF), wo[sl, :],
                              preferred_element_type=jnp.float32)     # (BS, H)
            attn_out = contrib if attn_out is None else attn_out + contrib
        x = x + attn_out

        # --- SwiGLU MLP ------------------------------------------------------
        h = _rmsnorm(x, g_mlp_ref[...])
        hb = h.astype(BF)
        gate = jnp.dot(hb, wg_ref[...], preferred_element_type=jnp.float32)
        up = jnp.dot(hb, wu_ref[...], preferred_element_type=jnp.float32)
        act = jax.nn.silu(gate) * up
        x = x + jnp.dot(act.astype(BF), wd_ref[...],
                        preferred_element_type=jnp.float32)

        hid_ref[li + 1] = x

    # --- final RMSNorm + LM head ---------------------------------------------
    h = _rmsnorm(x, g_final_ref[...])
    logits_ref[...] = jnp.dot(h.astype(BF), w_lm_ref[...],
                              preferred_element_type=jnp.float32)


# ---------------------------------------------------------------------------
# pallas_call wrapper
# ---------------------------------------------------------------------------
def _spec(shape):
    zeros = (0,) * len(shape)
    return pl.BlockSpec(shape, lambda i, _z=zeros: _z)


def fused_forward(params, x0):
    """Single fused call. Returns (hidden_states (L+1, B*S, H), logits (B*S, V))."""
    flat_w = []
    for lp in params["layers"]:
        flat_w.extend(lp)

    in_specs = [_spec((BS, H)), _spec((BS, BS))]
    in_specs += [_spec(w.shape) for w in flat_w]
    in_specs += [_spec((1, H)), _spec((H, V))]

    hid, logits = pl.pallas_call(
        fused_forward_kernel,
        out_shape=(jax.ShapeDtypeStruct((L + 1, BS, H), jnp.float32),
                   jax.ShapeDtypeStruct((BS, V), jnp.float32)),
        grid=(1,),
        in_specs=in_specs,
        out_specs=(_spec((L + 1, BS, H)), _spec((BS, V))),
        compiler_params=pltpu.CompilerParams(
            dimension_semantics=("arbitrary",),
            vmem_limit_bytes=16 * 1024 * 1024),
    )(x0, ATTN_BIAS, *flat_w, params["final_norm"], params["lm_head"])
    return hid, logits


# ---------------------------------------------------------------------------
# Synthetic causal LM forward (analogue of `self.model(..., output_hidden_states=True)`)
# ---------------------------------------------------------------------------
def model_forward(params, inputs_embeds):
    """inputs_embeds: (B, S, H). Returns (hidden_states list, logits (B, S, V))."""
    x0 = inputs_embeds.reshape(BS, H).astype(jnp.float32)
    hid, logits = fused_forward(params, x0)
    hidden_states = list(hid.reshape(L + 1, B, S, H))
    return hidden_states, logits.reshape(B, S, V)


# ---------------------------------------------------------------------------
# CausalMetricsModel.forward
# ---------------------------------------------------------------------------
def causal_metrics_forward(params, input_ids, noise=False, intervention=None,
                           noise_key=None):
    # First pass: model(input_ids, output_hidden_states=True)
    inputs_embeds = jnp.take(params["embed"], input_ids, axis=0)   # (B, S, H)
    hidden_states, logits0 = model_forward(params, inputs_embeds)

    if noise:
        hidden_states[0] = hidden_states[0] + jax.random.normal(
            noise_key, hidden_states[0].shape, hidden_states[0].dtype)

    if intervention is not None:
        # Faithful to the PyTorch reference: `outputs.hidden_states[layer]` and
        # `hidden_states[layer]` alias the same tensor there, so this patch
        # writes back identical values (functional no-op).
        layer, token = intervention
        clean = hidden_states[layer][:, token]
        modified = list(hidden_states)
        modified[layer] = modified[layer].at[:, token].set(clean)
        hidden_states = modified

    # TODO(synk): HF `past_key_values = hidden_states[1:]` (reuse of raw hidden
    # states as a KV cache) has no clean Pallas/JAX equivalent; the second pass
    # recomputes the full forward from inputs_embeds=hidden_states[0].
    if noise:
        _, logits = model_forward(params, hidden_states[0])
    else:
        # hidden_states[0] is unchanged (intervention is a no-op, as in the
        # reference), so the second pass would recompute identical logits.
        logits = logits0
    return logits


# ---------------------------------------------------------------------------
# Deterministic parameter init (weights bf16, norm gains f32)
# ---------------------------------------------------------------------------
def init_params(key):
    def wmat(k, shape, scale=0.05):
        return (scale * jax.random.normal(k, shape, jnp.float32)).astype(BF)

    keys = jax.random.split(key, 2 + L)
    params = {
        "embed": 0.05 * jax.random.normal(keys[0], (V, H), jnp.float32),
        "lm_head": wmat(keys[1], (H, V)),
        "final_norm": jnp.ones((1, H), jnp.float32),
    }
    attn_scale = 1.0 / (HD ** 0.5)
    layers = []
    for i in range(L):
        lk = jax.random.split(keys[2 + i], 7)
        wq = (attn_scale * 0.05 *
              jax.random.normal(lk[0], (H, H), jnp.float32)).astype(BF)  # scale folded
        layers.append((
            wq,
            wmat(lk[1], (H, H)), wmat(lk[2], (H, H)), wmat(lk[3], (H, H)),
            wmat(lk[4], (H, F)), wmat(lk[5], (H, F)), wmat(lk[6], (F, H)),
            jnp.ones((1, H), jnp.float32), jnp.ones((1, H), jnp.float32),
        ))
    params["layers"] = layers
    return params


if __name__ == "__main__":
    key = jax.random.PRNGKey(0)
    pkey, ikey, nkey = jax.random.split(key, 3)

    params = init_params(pkey)
    input_ids = jax.random.randint(ikey, (B, S), 0, V, dtype=jnp.int32)

    logits = causal_metrics_forward(params, input_ids,
                                    noise=True, intervention=(1, 3),
                                    noise_key=nkey)
    logits = jax.block_until_ready(logits)
    assert logits.shape == (B, S, V) and logits.dtype == jnp.float32
    assert bool(jnp.all(jnp.isfinite(logits)))
    print("KERNEL_OK")
</pallas_src>

<mosaic_0001>
module attributes {stable_mosaic.version = 11 : i64} {
  func.func @fused_forward_kernel(%arg0: i32, %arg1: memref<16x128xf32, #tpu.memory_space<vmem>>, %arg2: memref<16x16xf32, #tpu.memory_space<vmem>>, %arg3: memref<128x128xbf16, #tpu.memory_space<vmem>>, %arg4: memref<128x128xbf16, #tpu.memory_space<vmem>>, %arg5: memref<128x128xbf16, #tpu.memory_space<vmem>>, %arg6: memref<128x128xbf16, #tpu.memory_space<vmem>>, %arg7: memref<128x256xbf16, #tpu.memory_space<vmem>>, %arg8: memref<128x256xbf16, #tpu.memory_space<vmem>>, %arg9: memref<256x128xbf16, #tpu.memory_space<vmem>>, %arg10: memref<1x128xf32, #tpu.memory_space<vmem>>, %arg11: memref<1x128xf32, #tpu.memory_space<vmem>>, %arg12: memref<128x128xbf16, #tpu.memory_space<vmem>>, %arg13: memref<128x128xbf16, #tpu.memory_space<vmem>>, %arg14: memref<128x128xbf16, #tpu.memory_space<vmem>>, %arg15: memref<128x128xbf16, #tpu.memory_space<vmem>>, %arg16: memref<128x256xbf16, #tpu.memory_space<vmem>>, %arg17: memref<128x256xbf16, #tpu.memory_space<vmem>>, %arg18: memref<256x128xbf16, #tpu.memory_space<vmem>>, %arg19: memref<1x128xf32, #tpu.memory_space<vmem>>, %arg20: memref<1x128xf32, #tpu.memory_space<vmem>>, %arg21: memref<1x128xf32, #tpu.memory_space<vmem>>, %arg22: memref<128x256xbf16, #tpu.memory_space<vmem>>, %arg23: memref<3x16x128xf32, #tpu.memory_space<vmem>>, %arg24: memref<16x256xf32, #tpu.memory_space<vmem>>) attributes {dimension_semantics = [#tpu.dimension_semantics<arbitrary>], iteration_bounds = array<i64: 1>, scalar_prefetch = 0 : i64, scratch_operands = 0 : i64, tpu.core_type = #tpu.core_type<tc>, window_params = [{pipeline_mode = #tpu.pipeline_mode<synchronous>, transform_indices = @transform_0, window_bounds = array<i64: 16, 128>}, {pipeline_mode = #tpu.pipeline_mode<synchronous>, transform_indices = @transform_1, window_bounds = array<i64: 16, 16>}, {pipeline_mode = #tpu.pipeline_mode<synchronous>, transform_indices = @transform_2, window_bounds = array<i64: 128, 128>}, {pipeline_mode = #tpu.pipeline_mode<synchronous>, transform_indices = @transform_3, window_bounds = array<i64: 128, 128>}, {pipeline_mode = #tpu.pipeline_mode<synchronous>, transform_indices = @transform_4, window_bounds = array<i64: 128, 128>}, {pipeline_mode = #tpu.pipeline_mode<synchronous>, transform_indices = @transform_5, window_bounds = array<i64: 128, 128>}, {pipeline_mode = #tpu.pipeline_mode<synchronous>, transform_indices = @transform_6, window_bounds = array<i64: 128, 256>}, {pipeline_mode = #tpu.pipeline_mode<synchronous>, transform_indices = @transform_7, window_bounds = array<i64: 128, 256>}, {pipeline_mode = #tpu.pipeline_mode<synchronous>, transform_indices = @transform_8, window_bounds = array<i64: 256, 128>}, {pipeline_mode = #tpu.pipeline_mode<synchronous>, transform_indices = @transform_9, window_bounds = array<i64: 1, 128>}, {pipeline_mode = #tpu.pipeline_mode<synchronous>, transform_indices = @transform_10, window_bounds = array<i64: 1, 128>}, {pipeline_mode = #tpu.pipeline_mode<synchronous>, transform_indices = @transform_11, window_bounds = array<i64: 128, 128>}, {pipeline_mode = #tpu.pipeline_mode<synchronous>, transform_indices = @transform_12, window_bounds = array<i64: 128, 128>}, {pipeline_mode = #tpu.pipeline_mode<synchronous>, transform_indices = @transform_13, window_bounds = array<i64: 128, 128>}, {pipeline_mode = #tpu.pipeline_mode<synchronous>, transform_indices = @transform_14, window_bounds = array<i64: 128, 128>}, {pipeline_mode = #tpu.pipeline_mode<synchronous>, transform_indices = @transform_15, window_bounds = array<i64: 128, 256>}, {pipeline_mode = #tpu.pipeline_mode<synchronous>, transform_indices = @transform_16, window_bounds = array<i64: 128, 256>}, {pipeline_mode = #tpu.pipeline_mode<synchronous>, transform_indices = @transform_17, window_bounds = array<i64: 256, 128>}, {pipeline_mode = #tpu.pipeline_mode<synchronous>, transform_indices = @transform_18, window_bounds = array<i64: 1, 128>}, {pipeline_mode = #tpu.pipeline_mode<synchronous>, transform_indices = @transform_19, window_bounds = array<i64: 1, 128>}, {pipeline_mode = #tpu.pipeline_mode<synchronous>, transform_indices = @transform_20, window_bounds = array<i64: 1, 128>}, {pipeline_mode = #tpu.pipeline_mode<synchronous>, transform_indices = @transform_21, window_bounds = array<i64: 128, 256>}, {pipeline_mode = #tpu.pipeline_mode<synchronous>, transform_indices = @transform_22, window_bounds = array<i64: 3, 16, 128>}, {pipeline_mode = #tpu.pipeline_mode<synchronous>, transform_indices = @transform_23, window_bounds = array<i64: 16, 256>}]} {
    %c0 = arith.constant 0 : index
    %c0_0 = arith.constant 0 : index
    %0 = vector.load %arg1[%c0, %c0_0] : memref<16x128xf32, #tpu.memory_space<vmem>>, vector<16x128xf32>
    %c0_1 = arith.constant 0 : index
    %c0_2 = arith.constant 0 : index
    %1 = vector.load %arg2[%c0_1, %c0_2] : memref<16x16xf32, #tpu.memory_space<vmem>>, vector<16x16xf32>
    %c0_3 = arith.constant 0 : index
    %c0_4 = arith.constant 0 : index
    %c0_5 = arith.constant 0 : index
    %2 = vector.load %arg23[%c0_3, %c0_4, %c0_5] : memref<3x16x128xf32, #tpu.memory_space<vmem>>, vector<1x16x128xf32>
    %3 = vector.shape_cast %2 : vector<1x16x128xf32> to vector<16x128xf32>
    %4 = vector.shape_cast %0 : vector<16x128xf32> to vector<1x16x128xf32>
    tpu.vector_store %arg23[%c0_3, %c0_4, %c0_5], %4 {strides = array<i32>} : memref<3x16x128xf32, #tpu.memory_space<vmem>>, vector<1x16x128xf32>,
    %c0_6 = arith.constant 0 : index
    %c0_7 = arith.constant 0 : index
    %5 = vector.load %arg10[%c0_6, %c0_7] : memref<1x128xf32, #tpu.memory_space<vmem>>, vector<1x128xf32>
    %6 = arith.mulf %0, %0 : vector<16x128xf32>
    %cst = arith.constant dense<0.000000e+00> : vector<16xf32>
    %7 = vector.multi_reduction <add>, %6, %cst [1] : vector<16x128xf32> to vector<16xf32>
    %8 = vector.shape_cast %7 : vector<16xf32> to vector<16x1xf32>
    %cst_8 = arith.constant 1.280000e+02 : f32
    %9 = vector.broadcast %cst_8 : f32 to vector<16x1xf32>
    %10 = arith.divf %8, %9 : vector<16x1xf32>
    %cst_9 = arith.constant 9.99999997E-7 : f32
    %11 = vector.broadcast %cst_9 : f32 to vector<16x1xf32>
    %12 = arith.addf %10, %11 : vector<16x1xf32>
    %13 = math.rsqrt %12 : vector<16x1xf32>
    %14 = vector.broadcast %13 : vector<16x1xf32> to vector<16x128xf32>
    %15 = arith.mulf %0, %14 : vector<16x128xf32>
    %16 = vector.broadcast %5 : vector<1x128xf32> to vector<16x128xf32>
    %17 = arith.mulf %15, %16 : vector<16x128xf32>
    %18 = arith.truncf %17 : vector<16x128xf32> to vector<16x128xbf16>
    %c0_10 = arith.constant 0 : index
    %c0_11 = arith.constant 0 : index
    %19 = vector.load %arg3[%c0_10, %c0_11] : memref<128x128xbf16, #tpu.memory_space<vmem>>, vector<128x128xbf16>
    %cst_12 = arith.constant dense<0.000000e+00> : vector<16x128xf32>
    %20 = tpu.matmul %18, %19, %cst_12 {dimension_numbers = #tpu.dot_dimension_numbers<[1], [0], [0], [1], [0, 0, 1, 1], [], []>} : vector<16x128xbf16>, vector<128x128xbf16>, vector<16x128xf32> -> vector<16x128xf32>
    %21 = arith.truncf %20 : vector<16x128xf32> to vector<16x128xbf16>
    %c0_13 = arith.constant 0 : index
    %c0_14 = arith.constant 0 : index
    %22 = vector.load %arg4[%c0_13, %c0_14] : memref<128x128xbf16, #tpu.memory_space<vmem>>, vector<128x128xbf16>
    %cst_15 = arith.constant dense<0.000000e+00> : vector<16x128xf32>
    %23 = tpu.matmul %18, %22, %cst_15 {dimension_numbers = #tpu.dot_dimension_numbers<[1], [0], [0], [1], [0, 0, 1, 1], [], []>} : vector<16x128xbf16>, vector<128x128xbf16>, vector<16x128xf32> -> vector<16x128xf32>
    %24 = arith.truncf %23 : vector<16x128xf32> to vector<16x128xbf16>
    %c0_16 = arith.constant 0 : index
    %c0_17 = arith.constant 0 : index
    %25 = vector.load %arg5[%c0_16, %c0_17] : memref<128x128xbf16, #tpu.memory_space<vmem>>, vector<128x128xbf16>
    %cst_18 = arith.constant dense<0.000000e+00> : vector<16x128xf32>
    %26 = tpu.matmul %18, %25, %cst_18 {dimension_numbers = #tpu.dot_dimension_numbers<[1], [0], [0], [1], [0, 0, 1, 1], [], []>} : vector<16x128xbf16>, vector<128x128xbf16>, vector<16x128xf32> -> vector<16x128xf32>
    %27 = arith.truncf %26 : vector<16x128xf32> to vector<16x128xbf16>
    %c0_19 = arith.constant 0 : index
    %c0_20 = arith.constant 0 : index
    %28 = vector.load %arg6[%c0_19, %c0_20] : memref<128x128xbf16, #tpu.memory_space<vmem>>, vector<128x128xbf16>
    %29 = vector.extract_strided_slice %21 {offsets = [0, 0], sizes = [16, 32], strides = [1, 1]} : vector<16x128xbf16> to vector<16x32xbf16>
    %30 = vector.extract_strided_slice %24 {offsets = [0, 0], sizes = [16, 32], strides = [1, 1]} : vector<16x128xbf16> to vector<16x32xbf16>
    %cst_21 = arith.constant dense<0.000000e+00> : vector<16x16xf32>
    %31 = tpu.matmul %29, %30, %cst_21 {dimension_numbers = #tpu.dot_dimension_numbers<[1], [1], [0], [0], [0, 0, 1, 0], [], []>} : vector<16x32xbf16>, vector<16x32xbf16>, vector<16x16xf32> -> vector<16x16xf32>
    %32 = arith.addf %31, %1 : vector<16x16xf32>
    %cst_22 = arith.constant dense<0xFF800000> : vector<16xf32>
    %33 = vector.multi_reduction <maximumf>, %32, %cst_22 [1] : vector<16x16xf32> to vector<16xf32>
    %34 = vector.shape_cast %33 : vector<16xf32> to vector<16x1xf32>
    %35 = vector.broadcast %34 : vector<16x1xf32> to vector<16x16xf32>
    %36 = arith.subf %32, %35 : vector<16x16xf32>
    %37 = math.exp %36 : vector<16x16xf32>
    %cst_23 = arith.constant dense<0.000000e+00> : vector<16xf32>
    %38 = vector.multi_reduction <add>, %37, %cst_23 [1] : vector<16x16xf32> to vector<16xf32>
    %39 = vector.shape_cast %38 : vector<16xf32> to vector<16x1xf32>
    %40 = tpu.reciprocal %39 {approx = true} : vector<16x1xf32> -> vector<16x1xf32>
    %41 = vector.broadcast %40 : vector<16x1xf32> to vector<16x16xf32>
    %42 = arith.mulf %37, %41 : vector<16x16xf32>
    %43 = arith.truncf %42 : vector<16x16xf32> to vector<16x16xbf16>
    %44 = vector.extract_strided_slice %27 {offsets = [0, 0], sizes = [16, 32], strides = [1, 1]} : vector<16x128xbf16> to vector<16x32xbf16>
    %cst_24 = arith.constant dense<0.000000e+00> : vector<16x32xf32>
    %45 = tpu.matmul %43, %44, %cst_24 {dimension_numbers = #tpu.dot_dimension_numbers<[1], [0], [0], [1], [0, 0, 1, 1], [], []>} : vector<16x16xbf16>, vector<16x32xbf16>, vector<16x32xf32> -> vector<16x32xf32>
    %46 = arith.truncf %45 : vector<16x32xf32> to vector<16x32xbf16>
    %47 = vector.extract_strided_slice %28 {offsets = [0, 0], sizes = [32, 128], strides = [1, 1]} : vector<128x128xbf16> to vector<32x128xbf16>
    %cst_25 = arith.constant dense<0.000000e+00> : vector<16x128xf32>
    %48 = tpu.matmul %46, %47, %cst_25 {dimension_numbers = #tpu.dot_dimension_numbers<[1], [0], [0], [1], [0, 0, 1, 1], [], []>} : vector<16x32xbf16>, vector<32x128xbf16>, vector<16x128xf32> -> vector<16x128xf32>
    %49 = vector.extract_strided_slice %21 {offsets = [0, 32], sizes = [16, 32], strides = [1, 1]} : vector<16x128xbf16> to vector<16x32xbf16>
    %50 = vector.extract_strided_slice %24 {offsets = [0, 32], sizes = [16, 32], strides = [1, 1]} : vector<16x128xbf16> to vector<16x32xbf16>
    %cst_26 = arith.constant dense<0.000000e+00> : vector<16x16xf32>
    %51 = tpu.matmul %49, %50, %cst_26 {dimension_numbers = #tpu.dot_dimension_numbers<[1], [1], [0], [0], [0, 0, 1, 0], [], []>} : vector<16x32xbf16>, vector<16x32xbf16>, vector<16x16xf32> -> vector<16x16xf32>
    %52 = arith.addf %51, %1 : vector<16x16xf32>
    %cst_27 = arith.constant dense<0xFF800000> : vector<16xf32>
    %53 = vector.multi_reduction <maximumf>, %52, %cst_27 [1] : vector<16x16xf32> to vector<16xf32>
    %54 = vector.shape_cast %53 : vector<16xf32> to vector<16x1xf32>
    %55 = vector.broadcast %54 : vector<16x1xf32> to vector<16x16xf32>
    %56 = arith.subf %52, %55 : vector<16x16xf32>
    %57 = math.exp %56 : vector<16x16xf32>
    %cst_28 = arith.constant dense<0.000000e+00> : vector<16xf32>
    %58 = vector.multi_reduction <add>, %57, %cst_28 [1] : vector<16x16xf32> to vector<16xf32>
    %59 = vector.shape_cast %58 : vector<16xf32> to vector<16x1xf32>
    %60 = tpu.reciprocal %59 {approx = true} : vector<16x1xf32> -> vector<16x1xf32>
    %61 = vector.broadcast %60 : vector<16x1xf32> to vector<16x16xf32>
    %62 = arith.mulf %57, %61 : vector<16x16xf32>
    %63 = arith.truncf %62 : vector<16x16xf32> to vector<16x16xbf16>
    %64 = vector.extract_strided_slice %27 {offsets = [0, 32], sizes = [16, 32], strides = [1, 1]} : vector<16x128xbf16> to vector<16x32xbf16>
    %cst_29 = arith.constant dense<0.000000e+00> : vector<16x32xf32>
    %65 = tpu.matmul %63, %64, %cst_29 {dimension_numbers = #tpu.dot_dimension_numbers<[1], [0], [0], [1], [0, 0, 1, 1], [], []>} : vector<16x16xbf16>, vector<16x32xbf16>, vector<16x32xf32> -> vector<16x32xf32>
    %66 = arith.truncf %65 : vector<16x32xf32> to vector<16x32xbf16>
    %67 = vector.extract_strided_slice %28 {offsets = [32, 0], sizes = [32, 128], strides = [1, 1]} : vector<128x128xbf16> to vector<32x128xbf16>
    %cst_30 = arith.constant dense<0.000000e+00> : vector<16x128xf32>
    %68 = tpu.matmul %66, %67, %cst_30 {dimension_numbers = #tpu.dot_dimension_numbers<[1], [0], [0], [1], [0, 0, 1, 1], [], []>} : vector<16x32xbf16>, vector<32x128xbf16>, vector<16x128xf32> -> vector<16x128xf32>
    %69 = arith.addf %48, %68 : vector<16x128xf32>
    %70 = vector.extract_strided_slice %21 {offsets = [0, 64], sizes = [16, 32], strides = [1, 1]} : vector<16x128xbf16> to vector<16x32xbf16>
    %71 = vector.extract_strided_slice %24 {offsets = [0, 64], sizes = [16, 32], strides = [1, 1]} : vector<16x128xbf16> to vector<16x32xbf16>
    %cst_31 = arith.constant dense<0.000000e+00> : vector<16x16xf32>
    %72 = tpu.matmul %70, %71, %cst_31 {dimension_numbers = #tpu.dot_dimension_numbers<[1], [1], [0], [0], [0, 0, 1, 0], [], []>} : vector<16x32xbf16>, vector<16x32xbf16>, vector<16x16xf32> -> vector<16x16xf32>
    %73 = arith.addf %72, %1 : vector<16x16xf32>
    %cst_32 = arith.constant dense<0xFF800000> : vector<16xf32>
    %74 = vector.multi_reduction <maximumf>, %73, %cst_32 [1] : vector<16x16xf32> to vector<16xf32>
    %75 = vector.shape_cast %74 : vector<16xf32> to vector<16x1xf32>
    %76 = vector.broadcast %75 : vector<16x1xf32> to vector<16x16xf32>
    %77 = arith.subf %73, %76 : vector<16x16xf32>
    %78 = math.exp %77 : vector<16x16xf32>
    %cst_33 = arith.constant dense<0.000000e+00> : vector<16xf32>
    %79 = vector.multi_reduction <add>, %78, %cst_33 [1] : vector<16x16xf32> to vector<16xf32>
    %80 = vector.shape_cast %79 : vector<16xf32> to vector<16x1xf32>
    %81 = tpu.reciprocal %80 {approx = true} : vector<16x1xf32> -> vector<16x1xf32>
    %82 = vector.broadcast %81 : vector<16x1xf32> to vector<16x16xf32>
    %83 = arith.mulf %78, %82 : vector<16x16xf32>
    %84 = arith.truncf %83 : vector<16x16xf32> to vector<16x16xbf16>
    %85 = vector.extract_strided_slice %27 {offsets = [0, 64], sizes = [16, 32], strides = [1, 1]} : vector<16x128xbf16> to vector<16x32xbf16>
    %cst_34 = arith.constant dense<0.000000e+00> : vector<16x32xf32>
    %86 = tpu.matmul %84, %85, %cst_34 {dimension_numbers = #tpu.dot_dimension_numbers<[1], [0], [0], [1], [0, 0, 1, 1], [], []>} : vector<16x16xbf16>, vector<16x32xbf16>, vector<16x32xf32> -> vector<16x32xf32>
    %87 = arith.truncf %86 : vector<16x32xf32> to vector<16x32xbf16>
    %88 = vector.extract_strided_slice %28 {offsets = [64, 0], sizes = [32, 128], strides = [1, 1]} : vector<128x128xbf16> to vector<32x128xbf16>
    %cst_35 = arith.constant dense<0.000000e+00> : vector<16x128xf32>
    %89 = tpu.matmul %87, %88, %cst_35 {dimension_numbers = #tpu.dot_dimension_numbers<[1], [0], [0], [1], [0, 0, 1, 1], [], []>} : vector<16x32xbf16>, vector<32x128xbf16>, vector<16x128xf32> -> vector<16x128xf32>
    %90 = arith.addf %69, %89 : vector<16x128xf32>
    %91 = vector.extract_strided_slice %21 {offsets = [0, 96], sizes = [16, 32], strides = [1, 1]} : vector<16x128xbf16> to vector<16x32xbf16>
    %92 = vector.extract_strided_slice %24 {offsets = [0, 96], sizes = [16, 32], strides = [1, 1]} : vector<16x128xbf16> to vector<16x32xbf16>
    %cst_36 = arith.constant dense<0.000000e+00> : vector<16x16xf32>
    %93 = tpu.matmul %91, %92, %cst_36 {dimension_numbers = #tpu.dot_dimension_numbers<[1], [1], [0], [0], [0, 0, 1, 0], [], []>} : vector<16x32xbf16>, vector<16x32xbf16>, vector<16x16xf32> -> vector<16x16xf32>
    %94 = arith.addf %93, %1 : vector<16x16xf32>
    %cst_37 = arith.constant dense<0xFF800000> : vector<16xf32>
    %95 = vector.multi_reduction <maximumf>, %94, %cst_37 [1] : vector<16x16xf32> to vector<16xf32>
    %96 = vector.shape_cast %95 : vector<16xf32> to vector<16x1xf32>
    %97 = vector.broadcast %96 : vector<16x1xf32> to vector<16x16xf32>
    %98 = arith.subf %94, %97 : vector<16x16xf32>
    %99 = math.exp %98 : vector<16x16xf32>
    %cst_38 = arith.constant dense<0.000000e+00> : vector<16xf32>
    %100 = vector.multi_reduction <add>, %99, %cst_38 [1] : vector<16x16xf32> to vector<16xf32>
    %101 = vector.shape_cast %100 : vector<16xf32> to vector<16x1xf32>
    %102 = tpu.reciprocal %101 {approx = true} : vector<16x1xf32> -> vector<16x1xf32>
    %103 = vector.broadcast %102 : vector<16x1xf32> to vector<16x16xf32>
    %104 = arith.mulf %99, %103 : vector<16x16xf32>
    %105 = arith.truncf %104 : vector<16x16xf32> to vector<16x16xbf16>
    %106 = vector.extract_strided_slice %27 {offsets = [0, 96], sizes = [16, 32], strides = [1, 1]} : vector<16x128xbf16> to vector<16x32xbf16>
    %cst_39 = arith.constant dense<0.000000e+00> : vector<16x32xf32>
    %107 = tpu.matmul %105, %106, %cst_39 {dimension_numbers = #tpu.dot_dimension_numbers<[1], [0], [0], [1], [0, 0, 1, 1], [], []>} : vector<16x16xbf16>, vector<16x32xbf16>, vector<16x32xf32> -> vector<16x32xf32>
    %108 = arith.truncf %107 : vector<16x32xf32> to vector<16x32xbf16>
    %109 = vector.extract_strided_slice %28 {offsets = [96, 0], sizes = [32, 128], strides = [1, 1]} : vector<128x128xbf16> to vector<32x128xbf16>
    %cst_40 = arith.constant dense<0.000000e+00> : vector<16x128xf32>
    %110 = tpu.matmul %108, %109, %cst_40 {dimension_numbers = #tpu.dot_dimension_numbers<[1], [0], [0], [1], [0, 0, 1, 1], [], []>} : vector<16x32xbf16>, vector<32x128xbf16>, vector<16x128xf32> -> vector<16x128xf32>
    %111 = arith.addf %90, %110 : vector<16x128xf32>
    %112 = arith.addf %0, %111 : vector<16x128xf32>
    %c0_41 = arith.constant 0 : index
    %c0_42 = arith.constant 0 : index
    %113 = vector.load %arg11[%c0_41, %c0_42] : memref<1x128xf32, #tpu.memory_space<vmem>>, vector<1x128xf32>
    %114 = arith.mulf %112, %112 : vector<16x128xf32>
    %cst_43 = arith.constant dense<0.000000e+00> : vector<16xf32>
    %115 = vector.multi_reduction <add>, %114, %cst_43 [1] : vector<16x128xf32> to vector<16xf32>
    %116 = vector.shape_cast %115 : vector<16xf32> to vector<16x1xf32>
    %cst_44 = arith.constant 1.280000e+02 : f32
    %117 = vector.broadcast %cst_44 : f32 to vector<16x1xf32>
    %118 = arith.divf %116, %117 : vector<16x1xf32>
    %cst_45 = arith.constant 9.99999997E-7 : f32
    %119 = vector.broadcast %cst_45 : f32 to vector<16x1xf32>
    %120 = arith.addf %118, %119 : vector<16x1xf32>
    %121 = math.rsqrt %120 : vector<16x1xf32>
    %122 = vector.broadcast %121 : vector<16x1xf32> to vector<16x128xf32>
    %123 = arith.mulf %112, %122 : vector<16x128xf32>
    %124 = vector.broadcast %113 : vector<1x128xf32> to vector<16x128xf32>
    %125 = arith.mulf %123, %124 : vector<16x128xf32>
    %126 = arith.truncf %125 : vector<16x128xf32> to vector<16x128xbf16>
    %c0_46 = arith.constant 0 : index
    %c0_47 = arith.constant 0 : index
    %127 = vector.load %arg7[%c0_46, %c0_47] : memref<128x256xbf16, #tpu.memory_space<vmem>>, vector<128x256xbf16>
    %cst_48 = arith.constant dense<0.000000e+00> : vector<16x256xf32>
    %128 = tpu.matmul %126, %127, %cst_48 {dimension_numbers = #tpu.dot_dimension_numbers<[1], [0], [0], [1], [0, 0, 1, 1], [], []>} : vector<16x128xbf16>, vector<128x256xbf16>, vector<16x256xf32> -> vector<16x256xf32>
    %c0_49 = arith.constant 0 : index
    %c0_50 = arith.constant 0 : index
    %129 = vector.load %arg8[%c0_49, %c0_50] : memref<128x256xbf16, #tpu.memory_space<vmem>>, vector<128x256xbf16>
    %cst_51 = arith.constant dense<0.000000e+00> : vector<16x256xf32>
    %130 = tpu.matmul %126, %129, %cst_51 {dimension_numbers = #tpu.dot_dimension_numbers<[1], [0], [0], [1], [0, 0, 1, 1], [], []>} : vector<16x128xbf16>, vector<128x256xbf16>, vector<16x256xf32> -> vector<16x256xf32>
    %131 = arith.negf %128 : vector<16x256xf32>
    %132 = math.exp %131 : vector<16x256xf32>
    %cst_52 = arith.constant 1.000000e+00 : f32
    %133 = vector.broadcast %cst_52 : f32 to vector<16x256xf32>
    %134 = arith.addf %133, %132 : vector<16x256xf32>
    %135 = arith.divf %133, %134 : vector<16x256xf32>
    %136 = arith.mulf %128, %135 : vector<16x256xf32>
    %137 = arith.mulf %136, %130 : vector<16x256xf32>
    %138 = arith.truncf %137 : vector<16x256xf32> to vector<16x256xbf16>
    %c0_53 = arith.constant 0 : index
    %c0_54 = arith.constant 0 : index
    %139 = vector.load %arg9[%c0_53, %c0_54] : memref<256x128xbf16, #tpu.memory_space<vmem>>, vector<256x128xbf16>
    %cst_55 = arith.constant dense<0.000000e+00> : vector<16x128xf32>
    %140 = tpu.matmul %138, %139, %cst_55 {dimension_numbers = #tpu.dot_dimension_numbers<[1], [0], [0], [1], [0, 0, 1, 1], [], []>} : vector<16x256xbf16>, vector<256x128xbf16>, vector<16x128xf32> -> vector<16x128xf32>
    %141 = arith.addf %112, %140 : vector<16x128xf32>
    %c1 = arith.constant 1 : index
    %c0_56 = arith.constant 0 : index
    %c0_57 = arith.constant 0 : index
    %142 = vector.load %arg23[%c1, %c0_56, %c0_57] : memref<3x16x128xf32, #tpu.memory_space<vmem>>, vector<1x16x128xf32>
    %143 = vector.shape_cast %142 : vector<1x16x128xf32> to vector<16x128xf32>
    %144 = vector.shape_cast %141 : vector<16x128xf32> to vector<1x16x128xf32>
    tpu.vector_store %arg23[%c1, %c0_56, %c0_57], %144 {strides = array<i32>} : memref<3x16x128xf32, #tpu.memory_space<vmem>>, vector<1x16x128xf32>,
    %c0_58 = arith.constant 0 : index
    %c0_59 = arith.constant 0 : index
    %145 = vector.load %arg19[%c0_58, %c0_59] : memref<1x128xf32, #tpu.memory_space<vmem>>, vector<1x128xf32>
    %146 = arith.mulf %141, %141 : vector<16x128xf32>
    %cst_60 = arith.constant dense<0.000000e+00> : vector<16xf32>
    %147 = vector.multi_reduction <add>, %146, %cst_60 [1] : vector<16x128xf32> to vector<16xf32>
    %148 = vector.shape_cast %147 : vector<16xf32> to vector<16x1xf32>
    %cst_61 = arith.constant 1.280000e+02 : f32
    %149 = vector.broadcast %cst_61 : f32 to vector<16x1xf32>
    %150 = arith.divf %148, %149 : vector<16x1xf32>
    %cst_62 = arith.constant 9.99999997E-7 : f32
    %151 = vector.broadcast %cst_62 : f32 to vector<16x1xf32>
    %152 = arith.addf %150, %151 : vector<16x1xf32>
    %153 = math.rsqrt %152 : vector<16x1xf32>
    %154 = vector.broadcast %153 : vector<16x1xf32> to vector<16x128xf32>
    %155 = arith.mulf %141, %154 : vector<16x128xf32>
    %156 = vector.broadcast %145 : vector<1x128xf32> to vector<16x128xf32>
    %157 = arith.mulf %155, %156 : vector<16x128xf32>
    %158 = arith.truncf %157 : vector<16x128xf32> to vector<16x128xbf16>
    %c0_63 = arith.constant 0 : index
    %c0_64 = arith.constant 0 : index
    %159 = vector.load %arg12[%c0_63, %c0_64] : memref<128x128xbf16, #tpu.memory_space<vmem>>, vector<128x128xbf16>
    %cst_65 = arith.constant dense<0.000000e+00> : vector<16x128xf32>
    %160 = tpu.matmul %158, %159, %cst_65 {dimension_numbers = #tpu.dot_dimension_numbers<[1], [0], [0], [1], [0, 0, 1, 1], [], []>} : vector<16x128xbf16>, vector<128x128xbf16>, vector<16x128xf32> -> vector<16x128xf32>
    %161 = arith.truncf %160 : vector<16x128xf32> to vector<16x128xbf16>
    %c0_66 = arith.constant 0 : index
    %c0_67 = arith.constant 0 : index
    %162 = vector.load %arg13[%c0_66, %c0_67] : memref<128x128xbf16, #tpu.memory_space<vmem>>, vector<128x128xbf16>
    %cst_68 = arith.constant dense<0.000000e+00> : vector<16x128xf32>
    %163 = tpu.matmul %158, %162, %cst_68 {dimension_numbers = #tpu.dot_dimension_numbers<[1], [0], [0], [1], [0, 0, 1, 1], [], []>} : vector<16x128xbf16>, vector<128x128xbf16>, vector<16x128xf32> -> vector<16x128xf32>
    %164 = arith.truncf %163 : vector<16x128xf32> to vector<16x128xbf16>
    %c0_69 = arith.constant 0 : index
    %c0_70 = arith.constant 0 : index
    %165 = vector.load %arg14[%c0_69, %c0_70] : memref<128x128xbf16, #tpu.memory_space<vmem>>, vector<128x128xbf16>
    %cst_71 = arith.constant dense<0.000000e+00> : vector<16x128xf32>
    %166 = tpu.matmul %158, %165, %cst_71 {dimension_numbers = #tpu.dot_dimension_numbers<[1], [0], [0], [1], [0, 0, 1, 1], [], []>} : vector<16x128xbf16>, vector<128x128xbf16>, vector<16x128xf32> -> vector<16x128xf32>
    %167 = arith.truncf %166 : vector<16x128xf32> to vector<16x128xbf16>
    %c0_72 = arith.constant 0 : index
    %c0_73 = arith.constant 0 : index
    %168 = vector.load %arg15[%c0_72, %c0_73] : memref<128x128xbf16, #tpu.memory_space<vmem>>, vector<128x128xbf16>
    %169 = vector.extract_strided_slice %161 {offsets = [0, 0], sizes = [16, 32], strides = [1, 1]} : vector<16x128xbf16> to vector<16x32xbf16>
    %170 = vector.extract_strided_slice %164 {offsets = [0, 0], sizes = [16, 32], strides = [1, 1]} : vector<16x128xbf16> to vector<16x32xbf16>
    %cst_74 = arith.constant dense<0.000000e+00> : vector<16x16xf32>
    %171 = tpu.matmul %169, %170, %cst_74 {dimension_numbers = #tpu.dot_dimension_numbers<[1], [1], [0], [0], [0, 0, 1, 0], [], []>} : vector<16x32xbf16>, vector<16x32xbf16>, vector<16x16xf32> -> vector<16x16xf32>
    %172 = arith.addf %171, %1 : vector<16x16xf32>
    %cst_75 = arith.constant dense<0xFF800000> : vector<16xf32>
    %173 = vector.multi_reduction <maximumf>, %172, %cst_75 [1] : vector<16x16xf32> to vector<16xf32>
    %174 = vector.shape_cast %173 : vector<16xf32> to vector<16x1xf32>
    %175 = vector.broadcast %174 : vector<16x1xf32> to vector<16x16xf32>
    %176 = arith.subf %172, %175 : vector<16x16xf32>
    %177 = math.exp %176 : vector<16x16xf32>
    %cst_76 = arith.constant dense<0.000000e+00> : vector<16xf32>
    %178 = vector.multi_reduction <add>, %177, %cst_76 [1] : vector<16x16xf32> to vector<16xf32>
    %179 = vector.shape_cast %178 : vector<16xf32> to vector<16x1xf32>
    %180 = tpu.reciprocal %179 {approx = true} : vector<16x1xf32> -> vector<16x1xf32>
    %181 = vector.broadcast %180 : vector<16x1xf32> to vector<16x16xf32>
    %182 = arith.mulf %177, %181 : vector<16x16xf32>
    %183 = arith.truncf %182 : vector<16x16xf32> to vector<16x16xbf16>
    %184 = vector.extract_strided_slice %167 {offsets = [0, 0], sizes = [16, 32], strides = [1, 1]} : vector<16x128xbf16> to vector<16x32xbf16>
    %cst_77 = arith.constant dense<0.000000e+00> : vector<16x32xf32>
    %185 = tpu.matmul %183, %184, %cst_77 {dimension_numbers = #tpu.dot_dimension_numbers<[1], [0], [0], [1], [0, 0, 1, 1], [], []>} : vector<16x16xbf16>, vector<16x32xbf16>, vector<16x32xf32> -> vector<16x32xf32>
    %186 = arith.truncf %185 : vector<16x32xf32> to vector<16x32xbf16>
    %187 = vector.extract_strided_slice %168 {offsets = [0, 0], sizes = [32, 128], strides = [1, 1]} : vector<128x128xbf16> to vector<32x128xbf16>
    %cst_78 = arith.constant dense<0.000000e+00> : vector<16x128xf32>
    %188 = tpu.matmul %186, %187, %cst_78 {dimension_numbers = #tpu.dot_dimension_numbers<[1], [0], [0], [1], [0, 0, 1, 1], [], []>} : vector<16x32xbf16>, vector<32x128xbf16>, vector<16x128xf32> -> vector<16x128xf32>
    %189 = vector.extract_strided_slice %161 {offsets = [0, 32], sizes = [16, 32], strides = [1, 1]} : vector<16x128xbf16> to vector<16x32xbf16>
    %190 = vector.extract_strided_slice %164 {offsets = [0, 32], sizes = [16, 32], strides = [1, 1]} : vector<16x128xbf16> to vector<16x32xbf16>
    %cst_79 = arith.constant dense<0.000000e+00> : vector<16x16xf32>
    %191 = tpu.matmul %189, %190, %cst_79 {dimension_numbers = #tpu.dot_dimension_numbers<[1], [1], [0], [0], [0, 0, 1, 0], [], []>} : vector<16x32xbf16>, vector<16x32xbf16>, vector<16x16xf32> -> vector<16x16xf32>
    %192 = arith.addf %191, %1 : vector<16x16xf32>
    %cst_80 = arith.constant dense<0xFF800000> : vector<16xf32>
    %193 = vector.multi_reduction <maximumf>, %192, %cst_80 [1] : vector<16x16xf32> to vector<16xf32>
    %194 = vector.shape_cast %193 : vector<16xf32> to vector<16x1xf32>
    %195 = vector.broadcast %194 : vector<16x1xf32> to vector<16x16xf32>
    %196 = arith.subf %192, %195 : vector<16x16xf32>
    %197 = math.exp %196 : vector<16x16xf32>
    %cst_81 = arith.constant dense<0.000000e+00> : vector<16xf32>
    %198 = vector.multi_reduction <add>, %197, %cst_81 [1] : vector<16x16xf32> to vector<16xf32>
    %199 = vector.shape_cast %198 : vector<16xf32> to vector<16x1xf32>
    %200 = tpu.reciprocal %199 {approx = true} : vector<16x1xf32> -> vector<16x1xf32>
    %201 = vector.broadcast %200 : vector<16x1xf32> to vector<16x16xf32>
    %202 = arith.mulf %197, %201 : vector<16x16xf32>
    %203 = arith.truncf %202 : vector<16x16xf32> to vector<16x16xbf16>
    %204 = vector.extract_strided_slice %167 {offsets = [0, 32], sizes = [16, 32], strides = [1, 1]} : vector<16x128xbf16> to vector<16x32xbf16>
    %cst_82 = arith.constant dense<0.000000e+00> : vector<16x32xf32>
    %205 = tpu.matmul %203, %204, %cst_82 {dimension_numbers = #tpu.dot_dimension_numbers<[1], [0], [0], [1], [0, 0, 1, 1], [], []>} : vector<16x16xbf16>, vector<16x32xbf16>, vector<16x32xf32> -> vector<16x32xf32>
    %206 = arith.truncf %205 : vector<16x32xf32> to vector<16x32xbf16>
    %207 = vector.extract_strided_slice %168 {offsets = [32, 0], sizes = [32, 128], strides = [1, 1]} : vector<128x128xbf16> to vector<32x128xbf16>
    %cst_83 = arith.constant dense<0.000000e+00> : vector<16x128xf32>
    %208 = tpu.matmul %206, %207, %cst_83 {dimension_numbers = #tpu.dot_dimension_numbers<[1], [0], [0], [1], [0, 0, 1, 1], [], []>} : vector<16x32xbf16>, vector<32x128xbf16>, vector<16x128xf32> -> vector<16x128xf32>
    %209 = arith.addf %188, %208 : vector<16x128xf32>
    %210 = vector.extract_strided_slice %161 {offsets = [0, 64], sizes = [16, 32], strides = [1, 1]} : vector<16x128xbf16> to vector<16x32xbf16>
    %211 = vector.extract_strided_slice %164 {offsets = [0, 64], sizes = [16, 32], strides = [1, 1]} : vector<16x128xbf16> to vector<16x32xbf16>
    %cst_84 = arith.constant dense<0.000000e+00> : vector<16x16xf32>
    %212 = tpu.matmul %210, %211, %cst_84 {dimension_numbers = #tpu.dot_dimension_numbers<[1], [1], [0], [0], [0, 0, 1, 0], [], []>} : vector<16x32xbf16>, vector<16x32xbf16>, vector<16x16xf32> -> vector<16x16xf32>
    %213 = arith.addf %212, %1 : vector<16x16xf32>
    %cst_85 = arith.constant dense<0xFF800000> : vector<16xf32>
    %214 = vector.multi_reduction <maximumf>, %213, %cst_85 [1] : vector<16x16xf32> to vector<16xf32>
    %215 = vector.shape_cast %214 : vector<16xf32> to vector<16x1xf32>
    %216 = vector.broadcast %215 : vector<16x1xf32> to vector<16x16xf32>
    %217 = arith.subf %213, %216 : vector<16x16xf32>
    %218 = math.exp %217 : vector<16x16xf32>
    %cst_86 = arith.constant dense<0.000000e+00> : vector<16xf32>
    %219 = vector.multi_reduction <add>, %218, %cst_86 [1] : vector<16x16xf32> to vector<16xf32>
    %220 = vector.shape_cast %219 : vector<16xf32> to vector<16x1xf32>
    %221 = tpu.reciprocal %220 {approx = true} : vector<16x1xf32> -> vector<16x1xf32>
    %222 = vector.broadcast %221 : vector<16x1xf32> to vector<16x16xf32>
    %223 = arith.mulf %218, %222 : vector<16x16xf32>
    %224 = arith.truncf %223 : vector<16x16xf32> to vector<16x16xbf16>
    %225 = vector.extract_strided_slice %167 {offsets = [0, 64], sizes = [16, 32], strides = [1, 1]} : vector<16x128xbf16> to vector<16x32xbf16>
    %cst_87 = arith.constant dense<0.000000e+00> : vector<16x32xf32>
    %226 = tpu.matmul %224, %225, %cst_87 {dimension_numbers = #tpu.dot_dimension_numbers<[1], [0], [0], [1], [0, 0, 1, 1], [], []>} : vector<16x16xbf16>, vector<16x32xbf16>, vector<16x32xf32> -> vector<16x32xf32>
    %227 = arith.truncf %226 : vector<16x32xf32> to vector<16x32xbf16>
    %228 = vector.extract_strided_slice %168 {offsets = [64, 0], sizes = [32, 128], strides = [1, 1]} : vector<128x128xbf16> to vector<32x128xbf16>
    %cst_88 = arith.constant dense<0.000000e+00> : vector<16x128xf32>
    %229 = tpu.matmul %227, %228, %cst_88 {dimension_numbers = #tpu.dot_dimension_numbers<[1], [0], [0], [1], [0, 0, 1, 1], [], []>} : vector<16x32xbf16>, vector<32x128xbf16>, vector<16x128xf32> -> vector<16x128xf32>
    %230 = arith.addf %209, %229 : vector<16x128xf32>
    %231 = vector.extract_strided_slice %161 {offsets = [0, 96], sizes = [16, 32], strides = [1, 1]} : vector<16x128xbf16> to vector<16x32xbf16>
    %232 = vector.extract_strided_slice %164 {offsets = [0, 96], sizes = [16, 32], strides = [1, 1]} : vector<16x128xbf16> to vector<16x32xbf16>
    %cst_89 = arith.constant dense<0.000000e+00> : vector<16x16xf32>
    %233 = tpu.matmul %231, %232, %cst_89 {dimension_numbers = #tpu.dot_dimension_numbers<[1], [1], [0], [0], [0, 0, 1, 0], [], []>} : vector<16x32xbf16>, vector<16x32xbf16>, vector<16x16xf32> -> vector<16x16xf32>
    %234 = arith.addf %233, %1 : vector<16x16xf32>
    %cst_90 = arith.constant dense<0xFF800000> : vector<16xf32>
    %235 = vector.multi_reduction <maximumf>, %234, %cst_90 [1] : vector<16x16xf32> to vector<16xf32>
    %236 = vector.shape_cast %235 : vector<16xf32> to vector<16x1xf32>
    %237 = vector.broadcast %236 : vector<16x1xf32> to vector<16x16xf32>
    %238 = arith.subf %234, %237 : vector<16x16xf32>
    %239 = math.exp %238 : vector<16x16xf32>
    %cst_91 = arith.constant dense<0.000000e+00> : vector<16xf32>
    %240 = vector.multi_reduction <add>, %239, %cst_91 [1] : vector<16x16xf32> to vector<16xf32>
    %241 = vector.shape_cast %240 : vector<16xf32> to vector<16x1xf32>
    %242 = tpu.reciprocal %241 {approx = true} : vector<16x1xf32> -> vector<16x1xf32>
    %243 = vector.broadcast %242 : vector<16x1xf32> to vector<16x16xf32>
    %244 = arith.mulf %239, %243 : vector<16x16xf32>
    %245 = arith.truncf %244 : vector<16x16xf32> to vector<16x16xbf16>
    %246 = vector.extract_strided_slice %167 {offsets = [0, 96], sizes = [16, 32], strides = [1, 1]} : vector<16x128xbf16> to vector<16x32xbf16>
    %cst_92 = arith.constant dense<0.000000e+00> : vector<16x32xf32>
    %247 = tpu.matmul %245, %246, %cst_92 {dimension_numbers = #tpu.dot_dimension_numbers<[1], [0], [0], [1], [0, 0, 1, 1], [], []>} : vector<16x16xbf16>, vector<16x32xbf16>, vector<16x32xf32> -> vector<16x32xf32>
    %248 = arith.truncf %247 : vector<16x32xf32> to vector<16x32xbf16>
    %249 = vector.extract_strided_slice %168 {offsets = [96, 0], sizes = [32, 128], strides = [1, 1]} : vector<128x128xbf16> to vector<32x128xbf16>
    %cst_93 = arith.constant dense<0.000000e+00> : vector<16x128xf32>
    %250 = tpu.matmul %248, %249, %cst_93 {dimension_numbers = #tpu.dot_dimension_numbers<[1], [0], [0], [1], [0, 0, 1, 1], [], []>} : vector<16x32xbf16>, vector<32x128xbf16>, vector<16x128xf32> -> vector<16x128xf32>
    %251 = arith.addf %230, %250 : vector<16x128xf32>
    %252 = arith.addf %141, %251 : vector<16x128xf32>
    %c0_94 = arith.constant 0 : index
    %c0_95 = arith.constant 0 : index
    %253 = vector.load %arg20[%c0_94, %c0_95] : memref<1x128xf32, #tpu.memory_space<vmem>>, vector<1x128xf32>
    %254 = arith.mulf %252, %252 : vector<16x128xf32>
    %cst_96 = arith.constant dense<0.000000e+00> : vector<16xf32>
    %255 = vector.multi_reduction <add>, %254, %cst_96 [1] : vector<16x128xf32> to vector<16xf32>
    %256 = vector.shape_cast %255 : vector<16xf32> to vector<16x1xf32>
    %cst_97 = arith.constant 1.280000e+02 : f32
    %257 = vector.broadcast %cst_97 : f32 to vector<16x1xf32>
    %258 = arith.divf %256, %257 : vector<16x1xf32>
    %cst_98 = arith.constant 9.99999997E-7 : f32
    %259 = vector.broadcast %cst_98 : f32 to vector<16x1xf32>
    %260 = arith.addf %258, %259 : vector<16x1xf32>
    %261 = math.rsqrt %260 : vector<16x1xf32>
    %262 = vector.broadcast %261 : vector<16x1xf32> to vector<16x128xf32>
    %263 = arith.mulf %252, %262 : vector<16x128xf32>
    %264 = vector.broadcast %253 : vector<1x128xf32> to vector<16x128xf32>
    %265 = arith.mulf %263, %264 : vector<16x128xf32>
    %266 = arith.truncf %265 : vector<16x128xf32> to vector<16x128xbf16>
    %c0_99 = arith.constant 0 : index
    %c0_100 = arith.constant 0 : index
    %267 = vector.load %arg16[%c0_99, %c0_100] : memref<128x256xbf16, #tpu.memory_space<vmem>>, vector<128x256xbf16>
    %cst_101 = arith.constant dense<0.000000e+00> : vector<16x256xf32>
    %268 = tpu.matmul %266, %267, %cst_101 {dimension_numbers = #tpu.dot_dimension_numbers<[1], [0], [0], [1], [0, 0, 1, 1], [], []>} : vector<16x128xbf16>, vector<128x256xbf16>, vector<16x256xf32> -> vector<16x256xf32>
    %c0_102 = arith.constant 0 : index
    %c0_103 = arith.constant 0 : index
    %269 = vector.load %arg17[%c0_102, %c0_103] : memref<128x256xbf16, #tpu.memory_space<vmem>>, vector<128x256xbf16>
    %cst_104 = arith.constant dense<0.000000e+00> : vector<16x256xf32>
    %270 = tpu.matmul %266, %269, %cst_104 {dimension_numbers = #tpu.dot_dimension_numbers<[1], [0], [0], [1], [0, 0, 1, 1], [], []>} : vector<16x128xbf16>, vector<128x256xbf16>, vector<16x256xf32> -> vector<16x256xf32>
    %271 = arith.negf %268 : vector<16x256xf32>
    %272 = math.exp %271 : vector<16x256xf32>
    %cst_105 = arith.constant 1.000000e+00 : f32
    %273 = vector.broadcast %cst_105 : f32 to vector<16x256xf32>
    %274 = arith.addf %273, %272 : vector<16x256xf32>
    %275 = arith.divf %273, %274 : vector<16x256xf32>
    %276 = arith.mulf %268, %275 : vector<16x256xf32>
    %277 = arith.mulf %276, %270 : vector<16x256xf32>
    %278 = arith.truncf %277 : vector<16x256xf32> to vector<16x256xbf16>
    %c0_106 = arith.constant 0 : index
    %c0_107 = arith.constant 0 : index
    %279 = vector.load %arg18[%c0_106, %c0_107] : memref<256x128xbf16, #tpu.memory_space<vmem>>, vector<256x128xbf16>
    %cst_108 = arith.constant dense<0.000000e+00> : vector<16x128xf32>
    %280 = tpu.matmul %278, %279, %cst_108 {dimension_numbers = #tpu.dot_dimension_numbers<[1], [0], [0], [1], [0, 0, 1, 1], [], []>} : vector<16x256xbf16>, vector<256x128xbf16>, vector<16x128xf32> -> vector<16x128xf32>
    %281 = arith.addf %252, %280 : vector<16x128xf32>
    %c2 = arith.constant 2 : index
    %c0_109 = arith.constant 0 : index
    %c0_110 = arith.constant 0 : index
    %282 = vector.load %arg23[%c2, %c0_109, %c0_110] : memref<3x16x128xf32, #tpu.memory_space<vmem>>, vector<1x16x128xf32>
    %283 = vector.shape_cast %282 : vector<1x16x128xf32> to vector<16x128xf32>
    %284 = vector.shape_cast %281 : vector<16x128xf32> to vector<1x16x128xf32>
    tpu.vector_store %arg23[%c2, %c0_109, %c0_110], %284 {strides = array<i32>} : memref<3x16x128xf32, #tpu.memory_space<vmem>>, vector<1x16x128xf32>,
    %c0_111 = arith.constant 0 : index
    %c0_112 = arith.constant 0 : index
    %285 = vector.load %arg21[%c0_111, %c0_112] : memref<1x128xf32, #tpu.memory_space<vmem>>, vector<1x128xf32>
    %286 = arith.mulf %281, %281 : vector<16x128xf32>
    %cst_113 = arith.constant dense<0.000000e+00> : vector<16xf32>
    %287 = vector.multi_reduction <add>, %286, %cst_113 [1] : vector<16x128xf32> to vector<16xf32>
    %288 = vector.shape_cast %287 : vector<16xf32> to vector<16x1xf32>
    %cst_114 = arith.constant 1.280000e+02 : f32
    %289 = vector.broadcast %cst_114 : f32 to vector<16x1xf32>
    %290 = arith.divf %288, %289 : vector<16x1xf32>
    %cst_115 = arith.constant 9.99999997E-7 : f32
    %291 = vector.broadcast %cst_115 : f32 to vector<16x1xf32>
    %292 = arith.addf %290, %291 : vector<16x1xf32>
    %293 = math.rsqrt %292 : vector<16x1xf32>
    %294 = vector.broadcast %293 : vector<16x1xf32> to vector<16x128xf32>
    %295 = arith.mulf %281, %294 : vector<16x128xf32>
    %296 = vector.broadcast %285 : vector<1x128xf32> to vector<16x128xf32>
    %297 = arith.mulf %295, %296 : vector<16x128xf32>
    %298 = arith.truncf %297 : vector<16x128xf32> to vector<16x128xbf16>
    %c0_116 = arith.constant 0 : index
    %c0_117 = arith.constant 0 : index
    %299 = vector.load %arg22[%c0_116, %c0_117] : memref<128x256xbf16, #tpu.memory_space<vmem>>, vector<128x256xbf16>
    %cst_118 = arith.constant dense<0.000000e+00> : vector<16x256xf32>
    %300 = tpu.matmul %298, %299, %cst_118 {dimension_numbers = #tpu.dot_dimension_numbers<[1], [0], [0], [1], [0, 0, 1, 1], [], []>} : vector<16x128xbf16>, vector<128x256xbf16>, vector<16x256xf32> -> vector<16x256xf32>
    %c0_119 = arith.constant 0 : index
    %c0_120 = arith.constant 0 : index
    %301 = vector.load %arg24[%c0_119, %c0_120] : memref<16x256xf32, #tpu.memory_space<vmem>>, vector<16x256xf32>
    tpu.vector_store %arg24[%c0_119, %c0_120], %300 {strides = array<i32>} : memref<16x256xf32, #tpu.memory_space<vmem>>, vector<16x256xf32>,
    return
  }
  func.func @transform_0(%arg0: i32) -> (i32, i32) {
    %c0_i32 = arith.constant 0 : i32
    %c0_i32_0 = arith.constant 0 : i32
    %c0_i32_1 = arith.constant 0 : i32
    return %c0_i32, %c0_i32_0 : i32, i32
  }
  func.func @transform_1(%arg0: i32) -> (i32, i32) {
    %c0_i32 = arith.constant 0 : i32
    %c0_i32_0 = arith.constant 0 : i32
    %c0_i32_1 = arith.constant 0 : i32
    return %c0_i32, %c0_i32_0 : i32, i32
  }
  func.func @transform_2(%arg0: i32) -> (i32, i32) {
    %c0_i32 = arith.constant 0 : i32
    %c0_i32_0 = arith.constant 0 : i32
    %c0_i32_1 = arith.constant 0 : i32
    return %c0_i32, %c0_i32_0 : i32, i32
  }
  func.func @transform_3(%arg0: i32) -> (i32, i32) {
    %c0_i32 = arith.constant 0 : i32
    %c0_i32_0 = arith.constant 0 : i32
    %c0_i32_1 = arith.constant 0 : i32
    return %c0_i32, %c0_i32_0 : i32, i32
  }
  func.func @transform_4(%arg0: i32) -> (i32, i32) {
    %c0_i32 = arith.constant 0 : i32
    %c0_i32_0 = arith.constant 0 : i32
    %c0_i32_1 = arith.constant 0 : i32
    return %c0_i32, %c0_i32_0 : i32, i32
  }
  func.func @transform_5(%arg0: i32) -> (i32, i32) {
    %c0_i32 = arith.constant 0 : i32
    %c0_i32_0 = arith.constant 0 : i32
    %c0_i32_1 = arith.constant 0 : i32
    return %c0_i32, %c0_i32_0 : i32, i32
  }
  func.func @transform_6(%arg0: i32) -> (i32, i32) {
    %c0_i32 = arith.constant 0 : i32
    %c0_i32_0 = arith.constant 0 : i32
    %c0_i32_1 = arith.constant 0 : i32
    return %c0_i32, %c0_i32_0 : i32, i32
  }
  func.func @transform_7(%arg0: i32) -> (i32, i32) {
    %c0_i32 = arith.constant 0 : i32
    %c0_i32_0 = arith.constant 0 : i32
    %c0_i32_1 = arith.constant 0 : i32
    return %c0_i32, %c0_i32_0 : i32, i32
  }
  func.func @transform_8(%arg0: i32) -> (i32, i32) {
    %c0_i32 = arith.constant 0 : i32
    %c0_i32_0 = arith.constant 0 : i32
    %c0_i32_1 = arith.constant 0 : i32
    return %c0_i32, %c0_i32_0 : i32, i32
  }
  func.func @transform_9(%arg0: i32) -> (i32, i32) {
    %c0_i32 = arith.constant 0 : i32
    %c0_i32_0 = arith.constant 0 : i32
    %c0_i32_1 = arith.constant 0 : i32
    return %c0_i32, %c0_i32_0 : i32, i32
  }
  func.func @transform_10(%arg0: i32) -> (i32, i32) {
    %c0_i32 = arith.constant 0 : i32
    %c0_i32_0 = arith.constant 0 : i32
    %c0_i32_1 = arith.constant 0 : i32
    return %c0_i32, %c0_i32_0 : i32, i32
  }
  func.func @transform_11(%arg0: i32) -> (i32, i32) {
    %c0_i32 = arith.constant 0 : i32
    %c0_i32_0 = arith.constant 0 : i32
    %c0_i32_1 = arith.constant 0 : i32
    return %c0_i32, %c0_i32_0 : i32, i32
  }
  func.func @transform_12(%arg0: i32) -> (i32, i32) {
    %c0_i32 = arith.constant 0 : i32
    %c0_i32_0 = arith.constant 0 : i32
    %c0_i32_1 = arith.constant 0 : i32
    return %c0_i32, %c0_i32_0 : i32, i32
  }
  func.func @transform_13(%arg0: i32) -> (i32, i32) {
    %c0_i32 = arith.constant 0 : i32
    %c0_i32_0 = arith.constant 0 : i32
    %c0_i32_1 = arith.constant 0 : i32
    return %c0_i32, %c0_i32_0 : i32, i32
  }
  func.func @transform_14(%arg0: i32) -> (i32, i32) {
    %c0_i32 = arith.constant 0 : i32
    %c0_i32_0 = arith.constant 0 : i32
    %c0_i32_1 = arith.constant 0 : i32
    return %c0_i32, %c0_i32_0 : i32, i32
  }
  func.func @transform_15(%arg0: i32) -> (i32, i32) {
    %c0_i32 = arith.constant 0 : i32
    %c0_i32_0 = arith.constant 0 : i32
    %c0_i32_1 = arith.constant 0 : i32
    return %c0_i32, %c0_i32_0 : i32, i32
  }
  func.func @transform_16(%arg0: i32) -> (i32, i32) {
    %c0_i32 = arith.constant 0 : i32
    %c0_i32_0 = arith.constant 0 : i32
    %c0_i32_1 = arith.constant 0 : i32
    return %c0_i32, %c0_i32_0 : i32, i32
  }
  func.func @transform_17(%arg0: i32) -> (i32, i32) {
    %c0_i32 = arith.constant 0 : i32
    %c0_i32_0 = arith.constant 0 : i32
    %c0_i32_1 = arith.constant 0 : i32
    return %c0_i32, %c0_i32_0 : i32, i32
  }
  func.func @transform_18(%arg0: i32) -> (i32, i32) {
    %c0_i32 = arith.constant 0 : i32
    %c0_i32_0 = arith.constant 0 : i32
    %c0_i32_1 = arith.constant 0 : i32
    return %c0_i32, %c0_i32_0 : i32, i32
  }
  func.func @transform_19(%arg0: i32) -> (i32, i32) {
    %c0_i32 = arith.constant 0 : i32
    %c0_i32_0 = arith.constant 0 : i32
    %c0_i32_1 = arith.constant 0 : i32
    return %c0_i32, %c0_i32_0 : i32, i32
  }
  func.func @transform_20(%arg0: i32) -> (i32, i32) {
    %c0_i32 = arith.constant 0 : i32
    %c0_i32_0 = arith.constant 0 : i32
    %c0_i32_1 = arith.constant 0 : i32
    return %c0_i32, %c0_i32_0 : i32, i32
  }
  func.func @transform_21(%arg0: i32) -> (i32, i32) {
    %c0_i32 = arith.constant 0 : i32
    %c0_i32_0 = arith.constant 0 : i32
    %c0_i32_1 = arith.constant 0 : i32
    return %c0_i32, %c0_i32_0 : i32, i32
  }
  func.func @transform_22(%arg0: i32) -> (i32, i32, i32) {
    %c0_i32 = arith.constant 0 : i32
    %c0_i32_0 = arith.constant 0 : i32
    %c0_i32_1 = arith.constant 0 : i32
    %c0_i32_2 = arith.constant 0 : i32
    return %c0_i32, %c0_i32_0, %c0_i32_1 : i32, i32, i32
  }
  func.func @transform_23(%arg0: i32) -> (i32, i32) {
    %c0_i32 = arith.constant 0 : i32
    %c0_i32_0 = arith.constant 0 : i32
    %c0_i32_1 = arith.constant 0 : i32
    return %c0_i32, %c0_i32_0 : i32, i32
  }
}

</mosaic_0001>

<bundles_post_ra>
// kernel: tpu_custom_call.1
= control target key start
LH: loop header
LB: loop body
LE: loop exit
PB: predicated region body
PF: predicated region fallthrough
CT: control target
= control target key end

     0   :  { %s5936_s0 = inlined_call_operand.hbm [shape: f32[16,128], index: 0, kind: input, shape index: {}]   ;;  %s5937_s1 = inlined_call_operand.hbm [shape: f32[16,16], index: 1, kind: input, shape index: {}]   ;;  %s5938_s2 = inlined_call_operand.hbm [shape: bf16[128,128], index: 2, kind: input, shape index: {}]   ;;  %s5939_s3 = inlined_call_operand.hbm [shape: bf16[128,128], index: 3, kind: input, shape index: {}]   ;;  %s5940_s4 = inlined_call_operand.hbm [shape: bf16[128,128], index: 4, kind: input, shape index: {}]   ;;  %s5941_s5 = inlined_call_operand.hbm [shape: bf16[128,128], index: 5, kind: input, shape index: {}]   ;;  %s5942_s6 = inlined_call_operand.hbm [shape: bf16[128,256], index: 6, kind: input, shape index: {}]   ;;  %s5943_s7 = inlined_call_operand.hbm [shape: bf16[128,256], index: 7, kind: input, shape index: {}]   ;;  %s5944_s8 = inlined_call_operand.hbm [shape: bf16[256,128], index: 8, kind: input, shape index: {}]   ;;  %s5945_s9 = inlined_call_operand.vmem [shape: f32[1,128], index: 9, kind: input, shape index: {}]   ;;  %s5946_s10 = inlined_call_operand.vmem [shape: f32[1,128], index: 10, kind: input, shape index: {}]   ;;  %s5947_s11 = inlined_call_operand.hbm [shape: bf16[128,128], index: 11, kind: input, shape index: {}]   ;;  %s5948_s12 = inlined_call_operand.hbm [shape: bf16[128,128], index: 12, kind: input, shape index: {}]   ;;  %s5949_s13 = inlined_call_operand.hbm [shape: bf16[128,128], index: 13, kind: input, shape index: {}]   ;;  %s5950_s14 = inlined_call_operand.hbm [shape: bf16[128,128], index: 14, kind: input, shape index: {}]   ;;  %s5951_s15 = inlined_call_operand.hbm [shape: bf16[128,256], index: 15, kind: input, shape index: {}]   ;;  %s5952_s16 = inlined_call_operand.hbm [shape: bf16[128,256], index: 16, kind: input, shape index: {}]   ;;  %s5953_s17 = inlined_call_operand.hbm [shape: bf16[256,128], index: 17, kind: input, shape index: {}]   ;;  %s5954_s18 = inlined_call_operand.vmem [shape: f32[1,128], index: 18, kind: input, shape index: {}]   ;;  %s5955_s19 = inlined_call_operand.vmem [shape: f32[1,128], index: 19, kind: input, shape index: {}]   ;;  %s5956_s20 = inlined_call_operand.vmem [shape: f32[1,128], index: 20, kind: input, shape index: {}]   ;;  %s5957_s21 = inlined_call_operand.hbm [shape: bf16[128,256], index: 21, kind: input, shape index: {}]   ;;  %s5958_s22 = inlined_call_operand.hbm [shape: f32[3,16,128], index: 22, kind: output, shape index: {0}]   ;;  %s5959_s23 = inlined_call_operand.hbm [shape: f32[16,256], index: 23, kind: output, shape index: {1}]  }
   0x1   :  { %5974 = sst [smem:[#allocation43_spill]] %s5936_s0 }
   0x2   :  { %5975 = sst [smem:[#allocation44_spill]] %s5937_s1 }
   0x3   :  { %5976 = sst [smem:[#allocation45_spill]] %s5938_s2 }
   0x4   :  { %5977 = sst [smem:[#allocation46_spill]] %s5939_s3 }
   0x5   :  { %5978 = sst [smem:[#allocation47_spill]] %s5940_s4 }
   0x6   :  { %5979 = sst [smem:[#allocation48_spill]] %s5941_s5 }
   0x7   :  { %5980 = sst [smem:[#allocation49_spill]] %s5942_s6 }
   0x8   :  { %5981 = sst [smem:[#allocation50_spill]] %s5943_s7 }
   0x9   :  { %5982 = sst [smem:[#allocation51_spill]] %s5956_s20 }
   0xa   :  { %5983 = sst [smem:[#allocation52_spill]] %s5958_s22 }
   0xb   :  { %5984 = sst [smem:[#allocation53_spill]] %s5959_s23 }
   0xc   :  { %29 = vsyncpa [#allocation3], 0 }
   0xd   :  { %30 = vsyncpa [#allocation6], 0 }
   0xe   :  { %31 = vsyncpa [#allocation9], 0 }
   0xf   :  { %32 = vsyncpa [#allocation12], 0 }
  0x10   :  { %33 = vsyncpa [#allocation15], 0 }
  0x11   :  { %34 = vsyncpa [#allocation18], 0 }
  0x12   :  { %35 = vsyncpa [#allocation21], 0 }
  0x13   :  { %36 = vsyncpa [#allocation24], 0 }
  0x14   :  { %37 = vsyncpa [#allocation27], 0 }
  0x15   :  { %38 = vsyncpa [#allocation4], 0 }
  0x16   :  { %39 = vsyncpa [#allocation31], 0  ;;  %s5140_s4 = smov [#allocation5]   ;;  %s5985_s5 = sld [smem:[#allocation44_spill]] }
  0x17   :  { %s57_s30 = sshll.u32 %s5140_s4, 4  ;;  %s58_s30 = int_to_ptr.vmem [resolvable:$true] %s57_s30 }
  0x1c   :  { %s4700_s1 = scalar_lea.hbm %s5985_s5, 256 }
  0x1d   :  { %p4701_p0 = scmp.ne.s32.totalorder %s5985_s5, %s4700_s1  ;;  %p4704_p1 = scmp.lt.u32.totalorder %s4700_s1, %s5985_s5 }
  0x1f   :  { %p4706_p2 = pnand %p4704_p1, %p4701_p0 }
  0x21   :  { %4709 = shalt.err (!%p4706_p2)
}
  0x22   :  { %s4710_s7 = scalar_lea.vmem %s58_s30, 256  ;;  %p4715_p4 = scmp.lt.s32.totalorder %s58_s30, %s58_s30 }
  0x23   :  { %p4711_p3 = scmp.ne.s32.totalorder %s58_s30, %s4710_s7  ;;  %p4716_p5 = scmp.lt.s32.totalorder %s4710_s7, %s4710_s7 }
  0x25   :  { %p4717_p6 = por %p4716_p5, %p4715_p4 }
  0x27   :  { %p4718_p7 = pnand %p4717_p6, %p4711_p3 }
  0x29   :  { %4721 = shalt.err (!%p4718_p7)
}
  0x2a   :  { %s5970_s28 = smov 128   ;;  %s5972_s29 = smov 8  }
  0x2b   :  { %63 = dma.hbm_to_vmem [thread:$0]  %s5985_s5, 256, %s58_s30, [#allocation6], %s5970_s28, %s5970_s28, %s5972_s29  }
  0x2c   :  { %s5143_s4 = smov [#allocation8]   ;;  %s5144_s25 = smov [#allocation11]  }
  0x2d   :  { %s81_s24 = sshll.u32 %s5143_s4, 4  ;;  %s105_s1 = sshll.u32 %s5144_s25, 4  ;;  %s82_s24 = int_to_ptr.vmem [resolvable:$true] %s81_s24  ;;  %s106_s1 = int_to_ptr.vmem [resolvable:$true] %s105_s1 }
  0x2e   :  { %s5986_s6 = sld [smem:[#allocation46_spill]] }
  0x34   :  { %s4722_s27 = scalar_lea.hbm %s5986_s6, 1024 }
  0x35   :  { %p4723_p8 = scmp.ne.s32.totalorder %s5986_s6, %s4722_s27  ;;  %p4726_p9 = scmp.lt.u32.totalorder %s4722_s27, %s5986_s6 }
  0x37   :  { %p4728_p10 = pnand %p4726_p9, %p4723_p8 }
  0x39   :  { %4731 = shalt.err (!%p4728_p10)
}
  0x3a   :  { %s4732_s30 = scalar_lea.vmem %s82_s24, 1024  ;;  %p4737_p12 = scmp.lt.s32.totalorder %s82_s24, %s82_s24 }
  0x3b   :  { %p4733_p11 = scmp.ne.s32.totalorder %s82_s24, %s4732_s30  ;;  %p4738_p13 = scmp.lt.s32.totalorder %s4732_s30, %s4732_s30 }
  0x3d   :  { %p4739_p0 = por %p4738_p13, %p4737_p12 }
  0x3f   :  { %p4740_p1 = pnand %p4739_p0, %p4733_p11 }
  0x41   :  { %4743 = shalt.err (!%p4740_p1)
}
  0x42   :  { %s5145_s5 = smov 64   ;;  %s5146_s3 = smov 4  }
  0x43   :  { %87 = dma.hbm_to_vmem [thread:$0]  %s5986_s6, 1024, %s82_s24, [#allocation9], %s5145_s5, %s5145_s5, %s5146_s3  }
  0x44   :  { %s5987_s4 = sld [smem:[#allocation48_spill]] }
  0x4a   :  { %s4744_s25 = scalar_lea.hbm %s5987_s4, 1024 }
  0x4b   :  { %p4745_p2 = scmp.ne.s32.totalorder %s5987_s4, %s4744_s25  ;;  %p4748_p3 = scmp.lt.u32.totalorder %s4744_s25, %s5987_s4 }
  0x4d   :  { %p4750_p4 = pnand %p4748_p3, %p4745_p2 }
  0x4f   :  { %4753 = shalt.err (!%p4750_p4)
}
  0x50   :  { %s4754_s30 = scalar_lea.vmem %s106_s1, 1024  ;;  %p4759_p6 = scmp.lt.s32.totalorder %s106_s1, %s106_s1 }
  0x51   :  { %p4755_p5 = scmp.ne.s32.totalorder %s106_s1, %s4754_s30  ;;  %p4760_p7 = scmp.lt.s32.totalorder %s4754_s30, %s4754_s30 }
  0x53   :  { %p4761_p8 = por %p4760_p7, %p4759_p6 }
  0x55   :  { %p4762_p9 = pnand %p4761_p8, %p4755_p5 }
  0x57   :  { %4765 = shalt.err (!%p4762_p9)
}
  0x58   :  { %111 = dma.hbm_to_vmem [thread:$0]  %s5987_s4, 1024, %s106_s1, [#allocation12], %s5145_s5, %s5145_s5, %s5146_s3  }
  0x59   :  { %s5147_s23 = smov [#allocation14]   ;;  %s5148_s20 = smov [#allocation17]  }
  0x5a   :  { %s129_s0 = sshll.u32 %s5147_s23, 4  ;;  %s157_s22 = sshll.u32 %s5148_s20, 4  ;;  %s130_s0 = int_to_ptr.vmem [resolvable:$true] %s129_s0  ;;  %s158_s22 = int_to_ptr.vmem [resolvable:$true] %s157_s22 }
  0x5b   :  { %s5988_s2 = sld [smem:[#allocation50_spill]] }
  0x61   :  { %s4766_s27 = scalar_lea.hbm %s5988_s2, 2048 }
  0x62   :  { %p4767_p10 = scmp.ne.s32.totalorder %s5988_s2, %s4766_s27  ;;  %p4770_p11 = scmp.lt.u32.totalorder %s4766_s27, %s5988_s2 }
  0x64   :  { %p4772_p12 = pnand %p4770_p11, %p4767_p10 }
  0x66   :  { %4775 = shalt.err (!%p4772_p12)
}
  0x67   :  { %s4776_s1 = scalar_lea.vmem %s130_s0, 2048  ;;  %p4781_p0 = scmp.lt.s32.totalorder %s130_s0, %s130_s0 }
  0x68   :  { %p4777_p13 = scmp.ne.s32.totalorder %s130_s0, %s4776_s1  ;;  %p4782_p1 = scmp.lt.s32.totalorder %s4776_s1, %s4776_s1 }
  0x6a   :  { %p4783_p2 = por %p4782_p1, %p4781_p0 }
  0x6c   :  { %p4784_p3 = pnand %p4783_p2, %p4777_p13 }
  0x6e   :  { %4787 = shalt.err (!%p4784_p3)
}
  0x6f   :  { %s5989_s4 = smov 8   ;;  %s5990_s24 = smov 128  }
  0x70   :  { %135 = dma.hbm_to_vmem [thread:$0]  %s5988_s2, 2048, %s130_s0, [#allocation15], %s5990_s24, %s5990_s24, %s5989_s4  }
  0x71   :  { %s4788_s29 = scalar_lea.hbm %s5947_s11, 1024 }
  0x72   :  { %p4789_p4 = scmp.ne.s32.totalorder %s5947_s11, %s4788_s29  ;;  %p4792_p5 = scmp.lt.u32.totalorder %s4788_s29, %s5947_s11 }
  0x74   :  { %p4794_p6 = pnand %p4792_p5, %p4789_p4 }
  0x76   :  { %4797 = shalt.err (!%p4794_p6)
}
  0x77   :  { %s4798_s30 = scalar_lea.vmem %s158_s22, 1024  ;;  %p4803_p8 = scmp.lt.s32.totalorder %s158_s22, %s158_s22 }
  0x78   :  { %p4799_p7 = scmp.ne.s32.totalorder %s158_s22, %s4798_s30  ;;  %p4804_p9 = scmp.lt.s32.totalorder %s4798_s30, %s4798_s30 }
  0x7a   :  { %p4805_p10 = por %p4804_p9, %p4803_p8 }
  0x7c   :  { %p4806_p11 = pnand %p4805_p10, %p4799_p7 }
  0x7e   :  { %4809 = shalt.err (!%p4806_p11)
}
  0x7f   :  { %163 = dma.hbm_to_vmem [thread:$0]  %s5947_s11, 1024, %s158_s22, [#allocation18], %s5145_s5, %s5145_s5, %s5146_s3  }
  0x80   :  { %s5149_s1 = smov [#allocation20]   ;;  %s5150_s23 = smov [#allocation23]  }
  0x81   :  { %s181_s6 = sshll.u32 %s5149_s1, 4  ;;  %s205_s20 = sshll.u32 %s5150_s23, 4  ;;  %s182_s6 = int_to_ptr.vmem [resolvable:$true] %s181_s6  ;;  %s206_s20 = int_to_ptr.vmem [resolvable:$true] %s205_s20 }
  0x82   :  { %s4810_s25 = scalar_lea.hbm %s5949_s13, 1024 }
  0x83   :  { %p4811_p12 = scmp.ne.s32.totalorder %s5949_s13, %s4810_s25  ;;  %p4814_p13 = scmp.lt.u32.totalorder %s4810_s25, %s5949_s13 }
  0x85   :  { %p4816_p0 = pnand %p4814_p13, %p4811_p12 }
  0x87   :  { %4819 = shalt.err (!%p4816_p0)
}
  0x88   :  { %s4820_s11 = scalar_lea.vmem %s182_s6, 1024  ;;  %p4825_p2 = scmp.lt.s32.totalorder %s182_s6, %s182_s6 }
  0x89   :  { %p4821_p1 = scmp.ne.s32.totalorder %s182_s6, %s4820_s11  ;;  %p4826_p3 = scmp.lt.s32.totalorder %s4820_s11, %s4820_s11 }
  0x8b   :  { %p4827_p4 = por %p4826_p3, %p4825_p2 }
  0x8d   :  { %p4828_p5 = pnand %p4827_p4, %p4821_p1 }
  0x8f   :  { %4831 = shalt.err (!%p4828_p5)
}
  0x90   :  { %187 = dma.hbm_to_vmem [thread:$0]  %s5949_s13, 1024, %s182_s6, [#allocation21], %s5145_s5, %s5145_s5, %s5146_s3  }
  0x91   :  { %s4832_s23 = scalar_lea.hbm %s5951_s15, 2048 }
  0x92   :  { %p4833_p6 = scmp.ne.s32.totalorder %s5951_s15, %s4832_s23  ;;  %p4836_p7 = scmp.lt.u32.totalorder %s4832_s23, %s5951_s15 }
  0x94   :  { %p4838_p8 = pnand %p4836_p7, %p4833_p6 }
  0x96   :  { %4841 = shalt.err (!%p4838_p8)
}
  0x97   :  { %s4842_s27 = scalar_lea.vmem %s206_s20, 2048  ;;  %p4847_p10 = scmp.lt.s32.totalorder %s206_s20, %s206_s20 }
  0x98   :  { %p4843_p9 = scmp.ne.s32.totalorder %s206_s20, %s4842_s27  ;;  %p4848_p11 = scmp.lt.s32.totalorder %s4842_s27, %s4842_s27 }
  0x9a   :  { %p4849_p12 = por %p4848_p11, %p4847_p10 }
  0x9c   :  { %p4850_p13 = pnand %p4849_p12, %p4843_p9 }
  0x9e   :  { %4853 = shalt.err (!%p4850_p13)
}
  0x9f   :  { %211 = dma.hbm_to_vmem [thread:$0]  %s5951_s15, 2048, %s206_s20, [#allocation24], %s5990_s24, %s5990_s24, %s5989_s4  }
  0xa0   :  { %s5151_s7 = smov [#allocation26]   ;;  %s5152_s11 = smov [#allocation2]  }
  0xa1   :  { %s229_s30 = sshll.u32 %s5151_s7, 4  ;;  %s45_s22 = sshll.u32 %s5152_s11, 4  ;;  %s230_s30 = int_to_ptr.vmem [resolvable:$true] %s229_s30  ;;  %s46_s22 = int_to_ptr.vmem [resolvable:$true] %s45_s22 }
  0xa2   :  { %s4854_s1 = scalar_lea.hbm %s5953_s17, 2048 }
  0xa3   :  { %p4855_p0 = scmp.ne.s32.totalorder %s5953_s17, %s4854_s1  ;;  %p4858_p1 = scmp.lt.u32.totalorder %s4854_s1, %s5953_s17 }
  0xa5   :  { %p4860_p2 = pnand %p4858_p1, %p4855_p0 }
  0xa7   :  { %4863 = shalt.err (!%p4860_p2)
}
  0xa8   :  { %s4864_s15 = scalar_lea.vmem %s230_s30, 2048  ;;  %p4869_p4 = scmp.lt.s32.totalorder %s230_s30, %s230_s30 }
  0xa9   :  { %p4865_p3 = scmp.ne.s32.totalorder %s230_s30, %s4864_s15  ;;  %p4870_p5 = scmp.lt.s32.totalorder %s4864_s15, %s4864_s15 }
  0xab   :  { %p4871_p6 = por %p4870_p5, %p4869_p4 }
  0xad   :  { %p4872_p7 = pnand %p4871_p6, %p4865_p3 }
  0xaf   :  { %4875 = shalt.err (!%p4872_p7)
}
  0xb0   :  { %235 = dma.hbm_to_vmem [thread:$0]  %s5953_s17, 2048, %s230_s30, [#allocation27], %s5145_s5, %s5145_s5, %s5146_s3  }
  0xb1   :  { %s5991_s6 = sld [smem:[#allocation43_spill]] }
  0xb7   :  { %s4876_s7 = scalar_lea.hbm %s5991_s6, 256 }
  0xb8   :  { %p4877_p8 = scmp.ne.s32.totalorder %s5991_s6, %s4876_s7  ;;  %p4880_p9 = scmp.lt.u32.totalorder %s4876_s7, %s5991_s6 }
  0xba   :  { %p4882_p10 = pnand %p4880_p9, %p4877_p8 }
  0xbc   :  { %4885 = shalt.err (!%p4882_p10)
}
  0xbd   :  { %s4886_s23 = scalar_lea.vmem %s46_s22, 256  ;;  %p4891_p12 = scmp.lt.s32.totalorder %s46_s22, %s46_s22 }
  0xbe   :  { %p4887_p11 = scmp.ne.s32.totalorder %s46_s22, %s4886_s23  ;;  %p4892_p13 = scmp.lt.s32.totalorder %s4886_s23, %s4886_s23 }
  0xc0   :  { %p4893_p0 = por %p4892_p13, %p4891_p12 }
  0xc2   :  { %p4894_p1 = pnand %p4893_p0, %p4887_p11 }
  0xc4   :  { %4897 = shalt.err (!%p4894_p1)
}
  0xc5   :  { %51 = dma.hbm_to_vmem [thread:$0]  %s5991_s6, 256, %s46_s22, [#allocation3], %s5990_s24, %s5990_s24, %s5989_s4  }
  0xc6   :  { %s5153_s28 = smov [#allocation7]   ;;  %s5154_s25 = smov [#allocation10]  }
  0xc7   :  { %s69_s29 = sshll.u32 %s5153_s28, 4  ;;  %s93_s15 = sshll.u32 %s5154_s25, 4  ;;  %s70_s29 = int_to_ptr.vmem [resolvable:$true] %s69_s29  ;;  %s94_s15 = int_to_ptr.vmem [resolvable:$true] %s93_s15 }
  0xc8   :  { %s5992_s27 = sld [smem:[#allocation45_spill]] }
  0xce   :  { %s4898_s13 = scalar_lea.hbm %s5992_s27, 1024 }
  0xcf   :  { %p4899_p2 = scmp.ne.s32.totalorder %s5992_s27, %s4898_s13  ;;  %p4902_p3 = scmp.lt.u32.totalorder %s4898_s13, %s5992_s27 }
  0xd1   :  { %p4904_p4 = pnand %p4902_p3, %p4899_p2 }
  0xd3   :  { %4907 = shalt.err (!%p4904_p4)
}
  0xd4   :  { %s4908_s22 = scalar_lea.vmem %s70_s29, 1024  ;;  %p4913_p6 = scmp.lt.s32.totalorder %s70_s29, %s70_s29 }
  0xd5   :  { %p4909_p5 = scmp.ne.s32.totalorder %s70_s29, %s4908_s22  ;;  %p4914_p7 = scmp.lt.s32.totalorder %s4908_s22, %s4908_s22 }
  0xd7   :  { %p4915_p8 = por %p4914_p7, %p4913_p6 }
  0xd9   :  { %p4916_p9 = pnand %p4915_p8, %p4909_p5 }
  0xdb   :  { %4919 = shalt.err (!%p4916_p9)
}
  0xdc   :  { %75 = dma.hbm_to_vmem [thread:$0]  %s5992_s27, 1024, %s70_s29, [#allocation6], %s5145_s5, %s5145_s5, %s5146_s3  }
  0xdd   :  { %s5993_s30 = sld [smem:[#allocation47_spill]] }
  0xe3   :  { %s4920_s28 = scalar_lea.hbm %s5993_s30, 1024 }
  0xe4   :  { %p4921_p10 = scmp.ne.s32.totalorder %s5993_s30, %s4920_s28  ;;  %p4924_p11 = scmp.lt.u32.totalorder %s4920_s28, %s5993_s30 }
  0xe6   :  { %p4926_p12 = pnand %p4924_p11, %p4921_p10 }
  0xe8   :  { %4929 = shalt.err (!%p4926_p12)
}
  0xe9   :  { %s4930_s7 = scalar_lea.vmem %s94_s15, 1024  ;;  %p4935_p0 = scmp.lt.s32.totalorder %s94_s15, %s94_s15 }
  0xea   :  { %p4931_p13 = scmp.ne.s32.totalorder %s94_s15, %s4930_s7  ;;  %p4936_p1 = scmp.lt.s32.totalorder %s4930_s7, %s4930_s7 }
  0xec   :  { %p4937_p2 = por %p4936_p1, %p4935_p0 }
  0xee   :  { %p4938_p3 = pnand %p4937_p2, %p4931_p13 }
  0xf0   :  { %4941 = shalt.err (!%p4938_p3)
}
  0xf1   :  { %99 = dma.hbm_to_vmem [thread:$0]  %s5993_s30, 1024, %s94_s15, [#allocation9], %s5145_s5, %s5145_s5, %s5146_s3  }
  0xf2   :  { %s5155_s11 = smov [#allocation13]   ;;  %s5156_s2 = smov [#allocation16]  }
  0xf3   :  { %s117_s0 = sshll.u32 %s5155_s11, 4  ;;  %s141_s22 = sshll.u32 %s5156_s2, 4  ;;  %s118_s0 = int_to_ptr.vmem [resolvable:$true] %s117_s0  ;;  %s142_s22 = int_to_ptr.vmem [resolvable:$true] %s141_s22 }
  0xf4   :  { %s5994_s23 = sld [smem:[#allocation49_spill]] }
  0xfa   :  { %s4942_s17 = scalar_lea.hbm %s5994_s23, 2048 }
  0xfb   :  { %p4943_p4 = scmp.ne.s32.totalorder %s5994_s23, %s4942_s17  ;;  %p4946_p5 = scmp.lt.u32.totalorder %s4942_s17, %s5994_s23 }
  0xfd   :  { %p4948_p6 = pnand %p4946_p5, %p4943_p4 }
  0xff   :  { %4951 = shalt.err (!%p4948_p6)
}
 0x100   :  { %s4952_s15 = scalar_lea.vmem %s118_s0, 2048  ;;  %p4957_p8 = scmp.lt.s32.totalorder %s118_s0, %s118_s0 }
 0x101   :  { %p4953_p7 = scmp.ne.s32.totalorder %s118_s0, %s4952_s15  ;;  %p4958_p9 = scmp.lt.s32.totalorder %s4952_s15, %s4952_s15 }
 0x103   :  { %p4959_p10 = por %p4958_p9, %p4957_p8 }
 0x105   :  { %p4960_p11 = pnand %p4959_p10, %p4953_p7 }
 0x107   :  { %4963 = shalt.err (!%p4960_p11)
}
 0x108   :  { %123 = dma.hbm_to_vmem [thread:$0]  %s5994_s23, 2048, %s118_s0, [#allocation12], %s5990_s24, %s5990_s24, %s5989_s4  }
 0x109   :  { %s4964_s27 = scalar_lea.hbm %s5944_s8, 2048 }
 0x10a   :  { %p4965_p12 = scmp.ne.s32.totalorder %s5944_s8, %s4964_s27  ;;  %p4968_p13 = scmp.lt.u32.totalorder %s4964_s27, %s5944_s8 }
 0x10c   :  { %p4970_p0 = pnand %p4968_p13, %p4965_p12 }
 0x10e   :  { %4973 = shalt.err (!%p4970_p0)
}
 0x10f   :  { %s4974_s17 = scalar_lea.vmem %s142_s22, 2048  ;;  %p4979_p2 = scmp.lt.s32.totalorder %s142_s22, %s142_s22 }
 0x110   :  { %p4975_p1 = scmp.ne.s32.totalorder %s142_s22, %s4974_s17  ;;  %p4980_p3 = scmp.lt.s32.totalorder %s4974_s17, %s4974_s17 }
 0x112   :  { %p4981_p4 = por %p4980_p3, %p4979_p2 }
 0x114   :  { %p4982_p5 = pnand %p4981_p4, %p4975_p1 }
 0x116   :  { %4985 = shalt.err (!%p4982_p5)
}
 0x117   :  { %147 = dma.hbm_to_vmem [thread:$0]  %s5944_s8, 2048, %s142_s22, [#allocation15], %s5145_s5, %s5145_s5, %s5146_s3  }
 0x118   :  { %s5157_s28 = smov [#allocation19]   ;;  %s5158_s20 = smov [#allocation22]  }
 0x119   :  { %s169_s25 = sshll.u32 %s5157_s28, 4  ;;  %s193_s26 = sshll.u32 %s5158_s20, 4  ;;  %s170_s25 = int_to_ptr.vmem [resolvable:$true] %s169_s25  ;;  %s194_s26 = int_to_ptr.vmem [resolvable:$true] %s193_s26 }
 0x11a   :  { %s4986_s13 = scalar_lea.hbm %s5948_s12, 1024 }
 0x11b   :  { %p4987_p6 = scmp.ne.s32.totalorder %s5948_s12, %s4986_s13  ;;  %p4990_p7 = scmp.lt.u32.totalorder %s4986_s13, %s5948_s12 }
 0x11d   :  { %p4992_p8 = pnand %p4990_p7, %p4987_p6 }
 0x11f   :  { %4995 = shalt.err (!%p4992_p8)
}
 0x120   :  { %s4996_s8 = scalar_lea.vmem %s170_s25, 1024  ;;  %p5001_p10 = scmp.lt.s32.totalorder %s170_s25, %s170_s25 }
 0x121   :  { %p4997_p9 = scmp.ne.s32.totalorder %s170_s25, %s4996_s8  ;;  %p5002_p11 = scmp.lt.s32.totalorder %s4996_s8, %s4996_s8 }
 0x123   :  { %p5003_p12 = por %p5002_p11, %p5001_p10 }
 0x125   :  { %p5004_p13 = pnand %p5003_p12, %p4997_p9 }
 0x127   :  { %5007 = shalt.err (!%p5004_p13)
}
 0x128   :  { %175 = dma.hbm_to_vmem [thread:$0]  %s5948_s12, 1024, %s170_s25, [#allocation18], %s5145_s5, %s5145_s5, %s5146_s3  }
 0x129   :  { %s5008_s17 = scalar_lea.hbm %s5950_s14, 1024 }
 0x12a   :  { %p5009_p0 = scmp.ne.s32.totalorder %s5950_s14, %s5008_s17  ;;  %p5012_p1 = scmp.lt.u32.totalorder %s5008_s17, %s5950_s14 }
 0x12c   :  { %p5014_p2 = pnand %p5012_p1, %p5009_p0 }
 0x12e   :  { %5017 = shalt.err (!%p5014_p2)
}
 0x12f   :  { %s5018_s15 = scalar_lea.vmem %s194_s26, 1024  ;;  %p5023_p4 = scmp.lt.s32.totalorder %s194_s26, %s194_s26 }
 0x130   :  { %p5019_p3 = scmp.ne.s32.totalorder %s194_s26, %s5018_s15  ;;  %p5024_p5 = scmp.lt.s32.totalorder %s5018_s15, %s5018_s15 }
 0x132   :  { %p5025_p6 = por %p5024_p5, %p5023_p4 }
 0x134   :  { %p5026_p7 = pnand %p5025_p6, %p5019_p3 }
 0x136   :  { %5029 = shalt.err (!%p5026_p7)
}
 0x137   :  { %199 = dma.hbm_to_vmem [thread:$0]  %s5950_s14, 1024, %s194_s26, [#allocation21], %s5145_s5, %s5145_s5, %s5146_s3  }
 0x138   :  { %s5159_s30 = smov [#allocation25]   ;;  %s5160_s7 = smov [#allocation28]  }
 0x139   :  { %s217_s13 = sshll.u32 %s5159_s30, 4  ;;  %s247_s29 = sshll.u32 %s5160_s7, 4  ;;  %s218_s13 = int_to_ptr.vmem [resolvable:$true] %s217_s13  ;;  %s248_s29 = int_to_ptr.vmem [resolvable:$true] %s247_s29 }
 0x13a   :  { %s5030_s8 = scalar_lea.hbm %s5952_s16, 2048 }
 0x13b   :  { %p5031_p8 = scmp.ne.s32.totalorder %s5952_s16, %s5030_s8  ;;  %p5034_p9 = scmp.lt.u32.totalorder %s5030_s8, %s5952_s16 }
 0x13d   :  { %p5036_p10 = pnand %p5034_p9, %p5031_p8 }
 0x13f   :  { %5039 = shalt.err (!%p5036_p10)
}
 0x140   :  { %s5040_s14 = scalar_lea.vmem %s218_s13, 2048  ;;  %p5045_p12 = scmp.lt.s32.totalorder %s218_s13, %s218_s13 }
 0x141   :  { %p5041_p11 = scmp.ne.s32.totalorder %s218_s13, %s5040_s14  ;;  %p5046_p13 = scmp.lt.s32.totalorder %s5040_s14, %s5040_s14 }
 0x143   :  { %p5047_p0 = por %p5046_p13, %p5045_p12 }
 0x145   :  { %p5048_p1 = pnand %p5047_p0, %p5041_p11 }
 0x147   :  { %5051 = shalt.err (!%p5048_p1)
}
 0x148   :  { %223 = dma.hbm_to_vmem [thread:$0]  %s5952_s16, 2048, %s218_s13, [#allocation24], %s5990_s24, %s5990_s24, %s5989_s4  }
 0x149   :  { %s5052_s23 = scalar_lea.hbm %s5957_s21, 2048 }
 0x14a   :  { %p5053_p2 = scmp.ne.s32.totalorder %s5957_s21, %s5052_s23  ;;  %p5056_p3 = scmp.lt.u32.totalorder %s5052_s23, %s5957_s21 }
 0x14c   :  { %p5058_p4 = pnand %p5056_p3, %p5053_p2 }
 0x14e   :  { %5061 = shalt.err (!%p5058_p4)
}
 0x14f   :  { %s5062_s25 = scalar_lea.vmem %s248_s29, 2048  ;;  %p5067_p6 = scmp.lt.s32.totalorder %s248_s29, %s248_s29 }
 0x150   :  { %p5063_p5 = scmp.ne.s32.totalorder %s248_s29, %s5062_s25  ;;  %p5068_p7 = scmp.lt.s32.totalorder %s5062_s25, %s5062_s25 }
 0x152   :  { %p5069_p8 = por %p5068_p7, %p5067_p6 }
 0x154   :  { %p5070_p9 = pnand %p5069_p8, %p5063_p5 }
 0x156   :  { %5073 = shalt.err (!%p5070_p9)
}
 0x157   :  { %253 = dma.hbm_to_vmem [thread:$0]  %s5957_s21, 2048, %s248_s29, [#allocation27], %s5990_s24, %s5990_s24, %s5989_s4  }
 0x158   :  { %5118 = dma.done.wait [#allocation3], 256  }
 0x159   :  { %5119 = vsyncadd [#allocation3], 4294967040 }
 0x15a   :  { %5120 = dma.done.wait [#allocation6], 1280  }
 0x15b   :  { %5121 = vsyncadd [#allocation6], 4294966016 }
 0x15c   :  { %5122 = dma.done.wait [#allocation9], 2048  }
 0x15d   :  { %5123 = vsyncadd [#allocation9], 4294965248 }
 0x15e   :  { %5124 = dma.done.wait [#allocation12], 3072  }
 0x15f   :  { %5125 = vsyncadd [#allocation12], 4294964224 }
 0x160   :  { %5126 = dma.done.wait [#allocation15], 4096  }
 0x161   :  { %5127 = vsyncadd [#allocation15], 4294963200 }
 0x162   :  { %5128 = dma.done.wait [#allocation18], 2048  }
 0x163   :  { %5129 = vsyncadd [#allocation18], 4294965248 }
 0x164   :  { %5130 = dma.done.wait [#allocation21], 2048  }
 0x165   :  { %5131 = vsyncadd [#allocation21], 4294965248 }
 0x166   :  { %5132 = dma.done.wait [#allocation24], 4096  }
 0x167   :  { %5133 = vsyncadd [#allocation24], 4294963200 }
 0x168   :  { %5134 = dma.done.wait [#allocation27], 4096  }
 0x169   :  { %5135 = vsyncadd [#allocation27], 4294963200  ;;  %v5161_v0 = vmov 0.0   ;;  %v5547_v1 = vld [vmem:[#allocation2] sm:$0xff]  ;;  %v5549_v2 = vld [vmem:[#allocation2 + $0x8] sm:$0xff]  ;;  %vm5162_vm0 = vmmov 0  }
 0x16a   :  { %4054 = vmatprep.subr.bf16.mxu0 %v5161_v0  ;;  %4074 = vmatprep.subr.bf16.mxu1 %v5161_v0  ;;  %v313_v3 = vmul.f32 %v5547_v1, %v5547_v1  ;;  %310 = vst [vmem:[#allocation29] sm:$0xff] %v5547_v1  ;;  %311 = vst [vmem:[#allocation29 + $0x8] sm:$0xff] %v5549_v2  ;;  %v4364_v4 = vld [vmem:[#allocation7] sm:$0xff]   ;;  %v314_v6 = vmul.f32 %v5549_v2, %v5549_v2  ;;  %v4366_v7 = vld [vmem:[#allocation7 + $0x8] sm:$0xff]   ;;  %vm671_vm1 = vcmask 261120   ;;  %vm719_vm2 = vcmask 130048  }
 0x16b   :  { %v4365_v5 = vld [vmem:[#allocation8] sm:$0xff]   ;;  %4055 = vmatpush3.bf16.msra.mxu0 %v4364_v4  ;;  %v4367_v8 = vld [vmem:[#allocation8 + $0x8] sm:$0xff]   ;;  %v4368_v9 = vld [vmem:[#allocation7 + $0x10] sm:$0xff]   ;;  %4070 = vmatprep.mubr.msk.bf16.mxu0 %vm5162_vm0, %v5161_v0  ;;  %s5164_s7 = smov 32   ;;  %s5995_s22 = sld [smem:[#allocation51_spill]] }
 0x16c   :  { %315 = vadd.xlane.f32.xlu0 %v313_v3  ;;  %4075 = vmatpush3.bf16.msra.mxu1 %v4365_v5  ;;  %v4369_v10 = vld [vmem:[#allocation8 + $0x10] sm:$0xff]   ;;  %v4370_v11 = vld [vmem:[#allocation7 + $0x18] sm:$0xff]   ;;  %v4372_v13 = vld [vmem:[#allocation7 + $0x20] sm:$0xff]   ;;  %s5166_s2 = smov [#allocation29]  }
 0x16d   :  { %4056 = vmatprep.subr.bf16.mxu0 %v5161_v0  ;;  %4076 = vmatprep.subr.bf16.mxu1 %v5161_v0  ;;  %v4371_v12 = vld [vmem:[#allocation8 + $0x18] sm:$0xff]   ;;  %v4373_v14 = vld [vmem:[#allocation8 + $0x20] sm:$0xff]   ;;  %v4374_v15 = vld [vmem:[#allocation7 + $0x28] sm:$0xff]   ;;  %s3651_s6 = sshll.u32 %s5166_s2, 4  ;;  %s3652_s6 = int_to_ptr.vmem [resolvable:$true] %s3651_s6 }
 0x16e   :  { %v4375_v16 = vld [vmem:[#allocation8 + $0x28] sm:$0xff]   ;;  %v4376_v17 = vld [vmem:[#allocation7 + $0x30] sm:$0xff]   ;;  %4090 = vmatprep.mubr.msk.bf16.mxu1 %vm5162_vm0, %v5161_v0  ;;  %v4378_v19 = vld [vmem:[#allocation7 + $0x38] sm:$0xff]   ;;  %s5074_s1 = scalar_lea.vmem %s3652_s6, 768  ;;  %p5079_p11 = scmp.lt.s32.totalorder %s3652_s6, %s3652_s6 }
 0x16f   :  { %4057 = vmatpush3.bf16.msra.mxu0 %v4366_v7  ;;  %v4377_v18 = vld [vmem:[#allocation8 + $0x30] sm:$0xff]   ;;  %v4379_v20 = vld [vmem:[#allocation8 + $0x38] sm:$0xff]   ;;  %v3687_v30 = vld [vmem:[%s5945_s9] ss:$0 sm:$0xff]  ;;  %s5163_s9 = smov 96   ;;  %p5075_p10 = scmp.ne.s32.totalorder %s3652_s6, %s5074_s1 }
 0x170   :  { %317 = vadd.xlane.f32.xlu0 %v314_v6  ;;  %4077 = vmatpush3.bf16.msra.mxu1 %v4367_v8  ;;  %v4380_v34 = vld [vmem:[#allocation10] sm:$0xff]   ;;  %v4381_v36 = vld [vmem:[#allocation10 + $0x8] sm:$0xff]   ;;  %v4382_v37 = vld [vmem:[#allocation10 + $0x10] sm:$0xff]   ;;  %p5080_p12 = scmp.lt.s32.totalorder %s5074_s1, %s5074_s1 }
 0x171   :  { %4058 = vmatprep.subr.bf16.mxu0 %v5161_v0  ;;  %4078 = vmatprep.subr.bf16.mxu1 %v5161_v0  ;;  %v4383_v38 = vld [vmem:[#allocation10 + $0x18] sm:$0xff]   ;;  %v4384_v39 = vld [vmem:[#allocation10 + $0x20] sm:$0xff]   ;;  %v4385_v40 = vld [vmem:[#allocation10 + $0x28] sm:$0xff]  }
 0x172   :  { %v4386_v41 = vld [vmem:[#allocation10 + $0x30] sm:$0xff]   ;;  %v4387_v42 = vld [vmem:[#allocation10 + $0x38] sm:$0xff]   ;;  %p5081_p13 = por %p5080_p12, %p5079_p11 }
 0x173   :  { %4059 = vmatpush3.bf16.msra.mxu0 %v4368_v9  ;;  %v5611_v59 = vld [vmem:[#allocation5] sm:$0xff]  ;;  %v5613_v61 = vld [vmem:[#allocation5 + $0x8] sm:$0xff] }
 0x174   :  { %4079 = vmatpush3.bf16.msra.mxu1 %v4369_v10  ;;  %4060 = vmatprep.subr.bf16.mxu0 %v5161_v0  ;;  %p5082_p0 = pnand %p5081_p13, %p5075_p10 }
 0x175   :  { %4080 = vmatprep.subr.bf16.mxu1 %v5161_v0 }
 0x177   :  { %4061 = vmatpush3.bf16.msra.mxu0 %v4370_v11 }
 0x178   :  { %4081 = vmatpush3.bf16.msra.mxu1 %v4371_v12  ;;  %4062 = vmatprep.subr.bf16.mxu0 %v5161_v0 }
 0x179   :  { %4082 = vmatprep.subr.bf16.mxu1 %v5161_v0 }
 0x17b   :  { %4063 = vmatpush3.bf16.msra.mxu0 %v4372_v13 }
 0x17c   :  { %4083 = vmatpush3.bf16.msra.mxu1 %v4373_v14  ;;  %4064 = vmatprep.subr.bf16.mxu0 %v5161_v0 }
 0x17d   :  { %4084 = vmatprep.subr.bf16.mxu1 %v5161_v0 }
 0x17f   :  { %4065 = vmatpush3.bf16.msra.mxu0 %v4374_v15 }
 0x180   :  { %4085 = vmatpush3.bf16.msra.mxu1 %v4375_v16  ;;  %4066 = vmatprep.subr.bf16.mxu0 %v5161_v0 }
 0x181   :  { %4086 = vmatprep.subr.bf16.mxu1 %v5161_v0 }
 0x183   :  { %4067 = vmatpush3.bf16.msra.mxu0 %v4376_v17 }
 0x184   :  { %4087 = vmatpush3.bf16.msra.mxu1 %v4377_v18  ;;  %4068 = vmatprep.subr.bf16.mxu0 %v5161_v0 }
 0x185   :  { %4088 = vmatprep.subr.bf16.mxu1 %v5161_v0 }
 0x187   :  { %4069 = vmatpush3.bf16.msra.mxu0 %v4378_v19 }
 0x188   :  { %4089 = vmatpush3.bf16.msra.mxu1 %v4379_v20  ;;  %4094 = vmatprep.subr.bf16.mxu0 %v5161_v0 }
 0x189   :  { %4114 = vmatprep.subr.bf16.mxu1 %v5161_v0 }
 0x1f9   :  { %v316_v21 = vpop.xlane.xlu0 %315 }
 0x1fa   :  { %v320_v22 = vmul.f32 0.0078125, %v316_v21 }
 0x1fc   :  { %v322_v23 = vadd.f32 1e-06, %v320_v22 }
 0x1fd   :  { %v318_v24 = vpop.xlane.xlu0 %317 }
 0x1fe   :  { %4580 = vrsqrt.f32 %v322_v23  ;;  %v321_v25 = vmul.f32 0.0078125, %v318_v24 }
 0x200   :  { %v323_v26 = vadd.f32 1e-06, %v321_v25 }
 0x202   :  { %4582 = vrsqrt.f32 %v323_v26 }
 0x208   :  { %v4581_v27 = vpop.eup %4580 }
 0x209   :  { %v326_v28 = vmul.f32 %v4581_v27, %v5547_v1 }
 0x20b   :  { %v334_v32 = vmul.f32 %v3687_v30, %v326_v28 }
 0x20c   :  { %v4583_v29 = vpop.eup %4582 }
 0x20d   :  { %v327_v31 = vmul.f32 %v4583_v29, %v5549_v2 }
 0x20f   :  { %v335_v33 = vmul.f32 %v3687_v30, %v327_v31 }
 0x211   :  { %v336_v35 = vpack.c.bf16 %v335_v33, %v334_v32 }
 0x213   :  { %4071 = vmatmul.mubr.bf16.vlgmr.msra.gmra.mrb[0].mxu0 %v336_v35  ;;  %4091 = vmatmul.mubr.bf16.vlgmr.msra.gmra.mrb[0].mxu1 %v336_v35 }
 0x214   :  { %4095 = vmatpush3.bf16.msra.mxu0 %v4380_v34  ;;  %4110 = vmatprep.mubr.msk.bf16.mxu0 %vm5162_vm0, %v5161_v0 }
 0x215   :  { %4096 = vmatprep.subr.bf16.mxu0 %v5161_v0  ;;  %4116 = vmatprep.mubr.msk.bf16.mxu1 %vm5162_vm0, %v5161_v0 }
 0x218   :  { %4097 = vmatpush3.bf16.msra.mxu0 %v4381_v36 }
 0x219   :  { %4098 = vmatprep.subr.bf16.mxu0 %v5161_v0 }
 0x21c   :  { %4099 = vmatpush3.bf16.msra.mxu0 %v4382_v37 }
 0x21d   :  { %4100 = vmatprep.subr.bf16.mxu0 %v5161_v0 }
 0x220   :  { %4101 = vmatpush3.bf16.msra.mxu0 %v4383_v38 }
 0x221   :  { %4102 = vmatprep.subr.bf16.mxu0 %v5161_v0 }
 0x224   :  { %4103 = vmatpush3.bf16.msra.mxu0 %v4384_v39 }
 0x225   :  { %4104 = vmatprep.subr.bf16.mxu0 %v5161_v0 }
 0x228   :  { %4105 = vmatpush3.bf16.msra.mxu0 %v4385_v40 }
 0x229   :  { %4106 = vmatprep.subr.bf16.mxu0 %v5161_v0 }
 0x22c   :  { %4107 = vmatpush3.bf16.msra.mxu0 %v4386_v41 }
 0x22d   :  { %4108 = vmatprep.subr.bf16.mxu0 %v5161_v0 }
 0x230   :  { %4109 = vmatpush3.bf16.msra.mxu0 %v4387_v42 }
 0x231   :  { %4138 = vmatprep.subr.bf16.mxu0 %v5161_v0 }
 0x233   :  { %4111 = vmatmul.mubr.bf16.vlgmr.msra.gmra.mrb[4].mxu0 %v336_v35 }
 0x234   :  { %4142 = vmatprep.mubr.msk.bf16.mxu0 %vm5162_vm0, %v5161_v0 }
 0x2e6   :  { %v435_v43 = vpop.f32.mrb[0].mxu0  ;;  %v541_v44 = vpop.f32.mrb[0].mxu1 }
 0x2e7   :  { %v4072_v45 = vpop.f32.mrb[1].mxu0  ;;  %v4092_v46 = vpop.f32.mrb[1].mxu1 }
 0x2e8   :  { %v438_v47 = vpop.f32.mrb[2].mxu0  ;;  %v544_v48 = vpop.f32.mrb[2].mxu1 }
 0x2e9   :  { %v5596_v49 = vpack.c.bf16 %v438_v47, %v435_v43  ;;  %v5598_v50 = vpack.c.bf16 %v544_v48, %v541_v44  ;;  %v4073_v51 = vpop.f32.mrb[3].mxu0  ;;  %v4093_v52 = vpop.f32.mrb[3].mxu1 }
 0x2ea   :  { %v4390_v51 = vld [vmem:[#allocation11 + $0x10] sm:$0xff]   ;;  %v4391_v52 = vld [vmem:[#allocation11 + $0x18] sm:$0xff]  }
 0x2eb   :  { %v676_v53 = vsel %vm671_vm1, %v5598_v50, 0  ;;  %4139 = vmatpush3.bf16.msra.mxu0 %v4390_v51  ;;  %v4393_v51 = vld [vmem:[#allocation11 + $0x28] sm:$0xff]  }
 0x2ec   :  { %4115 = vmatpush3.bf16.xpose.msra.mxu1 %v676_v53  ;;  %4140 = vmatprep.subr.bf16.mxu0 %v5161_v0 }
 0x2ed   :  { %4120 = vmatprep.subr.bf16.mxu1 %v5161_v0 }
 0x2ef   :  { %4141 = vmatpush3.bf16.msra.mxu0 %v4391_v52 }
 0x2f0   :  { %4154 = vmatprep.subr.bf16.mxu0 %v5161_v0 }
 0x2f3   :  { %4117 = vmatmul.mubr.msk.bf16.vlgmr.msra.gmra.mrb[4].mxu1 %vm671_vm1, %v5596_v49 }
 0x2f4   :  { %4122 = vmatprep.mubr.msk.bf16.mxu1 %vm5162_vm0, %v5161_v0 }
 0x306   :  { %v647_v54 = vpop.f32.mrb[4].mxu0 }
 0x307   :  { %v4112_v55 = vpop.f32.mrb[5].mxu0 }
 0x308   :  { %v650_v56 = vpop.f32.mrb[6].mxu0 }
 0x309   :  { %v5607_v57 = vpack.c.bf16 %v650_v56, %v647_v54  ;;  %v4113_v58 = vpop.f32.mrb[7].mxu0 }
 0x30b   :  { %4121 = vmatpush3.bf16.msra.mxu1 %v5607_v57 }
 0x30c   :  { %4126 = vmatprep.subr.bf16.mxu1 %v5161_v0 }
 0x3c6   :  { %v712_v60 = vpop.f32.mrb[4].mxu1 }
 0x3c7   :  { %v713_v62 = vadd.f32 %v712_v60, %v5611_v59  ;;  %v4118_v63 = vpop.f32.mrb[5].mxu1 }
 0x3c8   :  { %v715_v1 = vpop.f32.mrb[6].mxu1  ;;  %v4388_v63 = vld [vmem:[#allocation11] sm:$0xff]  }
 0x3c9   :  { %v716_v2 = vadd.f32 %v715_v1, %v5613_v61  ;;  %v4119_v3 = vpop.f32.mrb[7].mxu1  ;;  %v720_v4 = vsel %vm719_vm2, %v713_v62, -inf }
 0x3ca   :  { %721 = vmax.xlane.f32.xlu1 %v720_v4 }
 0x3cb   :  { %v723_v5 = vsel %vm719_vm2, %v716_v2, -inf }
 0x3ce   :  { %724 = vmax.xlane.f32.xlu1 %v723_v5 }
 0x457   :  { %v722_v6 = vpop.xlane.xlu1 %721 }
 0x458   :  { %v726_v7 = vsub.f32 %v713_v62, %v722_v6 }
 0x45a   :  { %v728_v8 = vmul.f32 1.442695, %v726_v7 }
 0x45b   :  { %v725_v9 = vpop.xlane.xlu1 %724 }
 0x45c   :  { %4584 = vpow2.f32 %v728_v8  ;;  %v727_v10 = vsub.f32 %v716_v2, %v725_v9  ;;  %v4389_v2 = vld [vmem:[#allocation11 + $0x8] sm:$0xff]  }
 0x45e   :  { %v730_v11 = vmul.f32 1.442695, %v727_v10 }
 0x460   :  { %4586 = vpow2.f32 %v730_v11 }
 0x466   :  { %v4585_v12 = vpop.eup %4584 }
 0x467   :  { %v732_v13 = vsel %vm719_vm2, %v4585_v12, 0.0 }
 0x468   :  { %733 = vadd.xlane.f32.xlu0 %v732_v13 }
 0x46a   :  { %v4587_v14 = vpop.eup %4586 }
 0x46b   :  { %v735_v15 = vsel %vm719_vm2, %v4587_v14, 0.0 }
 0x46c   :  { %736 = vadd.xlane.f32.xlu1 %v735_v15 }
 0x47d   :  { %789 = vrot.lane.b32.xlu1 %v5596_v49, %s5163_s9 }
 0x47e   :  { %792 = vrot.lane.b32.xlu0 %v5598_v50, %s5163_s9 }
 0x4f5   :  { %v734_v16 = vpop.xlane.xlu0 %733 }
 0x4f6   :  { %4588 = vrcp.f32 %v734_v16 }
 0x4f9   :  { %v737_v17 = vpop.xlane.xlu1 %736  ;;  %v793_v22 = vpop.permute.xlu0 %792 }
 0x4fa   :  { %4590 = vrcp.f32 %v737_v17  ;;  %v798_v24 = vsel %vm671_vm1, %v793_v22, 0 }
 0x4fd   :  { %v790_v25 = vpop.permute.xlu1 %789 }
 0x500   :  { %v4589_v18 = vpop.eup %4588 }
 0x501   :  { %v740_v20 = vmul.f32 %v4589_v18, %v4585_v12 }
 0x504   :  { %v4591_v19 = vpop.eup %4590 }
 0x505   :  { %v741_v21 = vmul.f32 %v4591_v19, %v4587_v14 }
 0x507   :  { %v742_v23 = vpack.c.bf16 %v741_v21, %v740_v20 }
 0x509   :  { %4123 = vmatmul.mubr.msk.bf16.vlgmr.msra.gmra.mrb[8].mxu1 %vm719_vm2, %v742_v23 }
 0x50a   :  { %4127 = vmatpush3.bf16.xpose.msra.mxu1 %v798_v24  ;;  %4128 = vmatprep.mubr.msk.bf16.mxu1 %vm5162_vm0, %v5161_v0 }
 0x50b   :  { %4132 = vmatprep.subr.bf16.mxu1 %v5161_v0 }
 0x511   :  { %4129 = vmatmul.mubr.msk.bf16.vlgmr.msra.gmra.mrb[12].mxu1 %vm671_vm1, %v790_v25 }
 0x512   :  { %4134 = vmatprep.mubr.msk.bf16.mxu1 %vm5162_vm0, %v5161_v0 }
 0x5dc   :  { %v780_v26 = vpop.f32.mrb[8].mxu1 }
 0x5dd   :  { %v4124_v27 = vpop.f32.mrb[9].mxu1 }
 0x5de   :  { %v783_v28 = vpop.f32.mrb[10].mxu1 }
 0x5df   :  { %v787_v29 = vpack.c.bf16 %v783_v28, %v780_v26  ;;  %v4125_v30 = vpop.f32.mrb[11].mxu1 }
 0x5e4   :  { %v834_v31 = vpop.f32.mrb[12].mxu1 }
 0x5e5   :  { %v835_v32 = vadd.f32 %v834_v31, %v5611_v59  ;;  %v4130_v33 = vpop.f32.mrb[13].mxu1 }
 0x5e6   :  { %v837_v34 = vpop.f32.mrb[14].mxu1 }
 0x5e7   :  { %v838_v35 = vadd.f32 %v837_v34, %v5613_v61  ;;  %v4131_v36 = vpop.f32.mrb[15].mxu1  ;;  %v841_v37 = vsel %vm719_vm2, %v835_v32, -inf }
 0x5e8   :  { %842 = vmax.xlane.f32.xlu1 %v841_v37 }
 0x5e9   :  { %v844_v38 = vsel %vm719_vm2, %v838_v35, -inf }
 0x5ea   :  { %845 = vmax.xlane.f32.xlu0 %v844_v38 }
 0x675   :  { %v843_v39 = vpop.xlane.xlu1 %842 }
 0x676   :  { %v847_v40 = vsub.f32 %v835_v32, %v843_v39 }
 0x677   :  { %v846_v41 = vpop.xlane.xlu0 %845 }
 0x678   :  { %v849_v42 = vmul.f32 1.442695, %v847_v40  ;;  %v848_v43 = vsub.f32 %v838_v35, %v846_v41 }
 0x67a   :  { %4592 = vpow2.f32 %v849_v42  ;;  %v851_v44 = vmul.f32 1.442695, %v848_v43 }
 0x67c   :  { %4594 = vpow2.f32 %v851_v44 }
 0x684   :  { %v4593_v45 = vpop.eup %4592 }
 0x685   :  { %v853_v46 = vsel %vm719_vm2, %v4593_v45, 0.0 }
 0x686   :  { %v4595_v47 = vpop.eup %4594  ;;  %854 = vadd.xlane.f32.xlu0 %v853_v46 }
 0x687   :  { %v856_v48 = vsel %vm719_vm2, %v4595_v47, 0.0 }
 0x688   :  { %857 = vadd.xlane.f32.xlu1 %v856_v48 }
 0x699   :  { %1027 = vrot.lane.b32.xlu1 %v5598_v50, %s5145_s5 }
 0x69c   :  { %865 = vrot.lane.b32.xlu0 %v5607_v57, %s5163_s9 }
 0x69d   :  { %1025 = vrot.lane.b32.xlu1 %v5596_v49, %s5145_s5 }
 0x713   :  { %v855_v53 = vpop.xlane.xlu0 %854 }
 0x714   :  { %4596 = vrcp.f32 %v855_v53 }
 0x715   :  { %v858_v54 = vpop.xlane.xlu1 %857 }
 0x716   :  { %4598 = vrcp.f32 %v858_v54 }
 0x717   :  { %v866_v55 = vpop.permute.xlu0 %865 }
 0x718   :  { %4133 = vmatpush3.bf16.msra.mxu1 %v866_v55 }
 0x719   :  { %4146 = vmatprep.subr.bf16.mxu1 %v5161_v0  ;;  %v1028_v5 = vpop.permute.xlu1 %1027 }
 0x71a   :  { %v1033_v9 = vsel %vm671_vm1, %v1028_v5, 0 }
 0x71d   :  { %v1026_v14 = vpop.permute.xlu1 %1025 }
 0x71e   :  { %v4597_v56 = vpop.eup %4596 }
 0x71f   :  { %v861_v60 = vmul.f32 %v4597_v56, %v4593_v45 }
 0x720   :  { %v4599_v58 = vpop.eup %4598 }
 0x721   :  { %v862_v62 = vmul.f32 %v4599_v58, %v4595_v47 }
 0x723   :  { %v863_v1 = vpack.c.bf16 %v862_v62, %v861_v60 }
 0x725   :  { %4135 = vmatmul.mubr.msk.bf16.vlgmr.msra.gmra.mrb[16].mxu1 %vm719_vm2, %v863_v1 }
 0x726   :  { %4147 = vmatpush3.bf16.msra.mxu1 %v4388_v63  ;;  %4150 = vmatprep.mubr.msk.bf16.mxu1 %vm5162_vm0, %v5161_v0 }
 0x727   :  { %4148 = vmatprep.subr.bf16.mxu1 %v5161_v0 }
 0x72a   :  { %4149 = vmatpush3.bf16.msra.mxu1 %v4389_v2 }
 0x72b   :  { %4160 = vmatprep.subr.bf16.mxu1 %v5161_v0 }
 0x72d   :  { %4151 = vmatmul.mubr.msk.bf16.vlgmr.msra.gmra.mrb[20].mxu1 %vm671_vm1, %v787_v29 }
 0x72e   :  { %4162 = vmatprep.mubr.msk.bf16.mxu1 %vm5162_vm0, %v5161_v0 }
 0x7f8   :  { %v905_v3 = vpop.f32.mrb[16].mxu1 }
 0x7f9   :  { %v4136_v4 = vpop.f32.mrb[17].mxu1 }
 0x7fa   :  { %v908_v6 = vpop.f32.mrb[18].mxu1 }
 0x7fb   :  { %v912_v7 = vpack.c.bf16 %v908_v6, %v905_v3  ;;  %v4137_v8 = vpop.f32.mrb[19].mxu1 }
 0x7fd   :  { %4143 = vmatmul.mubr.msk.bf16.vlgmr.msra.gmra.mrb[8].mxu0 %vm671_vm1, %v912_v7 }
 0x7fe   :  { %4155 = vmatpush3.bf16.xpose.msra.mxu0 %v1033_v9  ;;  %4156 = vmatprep.mubr.msk.bf16.mxu0 %vm5162_vm0, %v5161_v0 }
 0x7ff   :  { %4166 = vmatprep.subr.bf16.mxu0 %v5161_v0 }
 0x800   :  { %v1018_v10 = vpop.f32.mrb[20].mxu1 }
 0x801   :  { %v4152_v11 = vpop.f32.mrb[21].mxu1 }
 0x802   :  { %v1021_v12 = vpop.f32.mrb[22].mxu1 }
 0x803   :  { %v4153_v13 = vpop.f32.mrb[23].mxu1 }
 0x804   :  { %v4394_v13 = vld [vmem:[#allocation11 + $0x30] sm:$0xff]  }
 0x805   :  { %4157 = vmatmul.mubr.msk.bf16.vlgmr.msra.gmra.mrb[12].mxu0 %vm671_vm1, %v1026_v14 }
 0x806   :  { %4170 = vmatprep.mubr.msk.bf16.mxu0 %vm5162_vm0, %v5161_v0 }
 0x8d0   :  { %v962_v15 = vpop.f32.mrb[8].mxu0 }
 0x8d1   :  { %v5664_v16 = vadd.f32 %v1018_v10, %v962_v15  ;;  %v4144_v17 = vpop.f32.mrb[9].mxu0 }
 0x8d2   :  { %v965_v18 = vpop.f32.mrb[10].mxu0 }
 0x8d3   :  { %v5666_v19 = vadd.f32 %v1021_v12, %v965_v18  ;;  %v4145_v20 = vpop.f32.mrb[11].mxu0 }
 0x8d8   :  { %v1069_v21 = vpop.f32.mrb[12].mxu0 }
 0x8d9   :  { %v1070_v22 = vadd.f32 %v1069_v21, %v5611_v59  ;;  %v4158_v23 = vpop.f32.mrb[13].mxu0 }
 0x8da   :  { %v1072_v24 = vpop.f32.mrb[14].mxu0 }
 0x8db   :  { %v1073_v25 = vadd.f32 %v1072_v24, %v5613_v61  ;;  %v4159_v26 = vpop.f32.mrb[15].mxu0  ;;  %v1076_v27 = vsel %vm719_vm2, %v1070_v22, -inf }
 0x8dc   :  { %1077 = vmax.xlane.f32.xlu1 %v1076_v27 }
 0x8dd   :  { %v1079_v28 = vsel %vm719_vm2, %v1073_v25, -inf }
 0x8de   :  { %1080 = vmax.xlane.f32.xlu0 %v1079_v28 }
 0x8ed   :  { %1099 = vrot.lane.b32.xlu1 %v5607_v57, %s5145_s5 }
 0x8f1   :  { %1205 = vrot.lane.b32.xlu1 %v5596_v49, %s5164_s7  ;;  %v4392_v49 = vld [vmem:[#allocation11 + $0x20] sm:$0xff]  }
 0x8f2   :  { %4167 = vmatpush3.bf16.msra.mxu0 %v4392_v49  ;;  %v4405_v49 = vld [vmem:[#allocation14 + $0x10] ss:$8 sps:$4 sm:$0xff]  }
 0x8f3   :  { %4168 = vmatprep.subr.bf16.mxu0 %v5161_v0 }
 0x8f6   :  { %4169 = vmatpush3.bf16.msra.mxu0 %v4393_v51 }
 0x8f7   :  { %4180 = vmatprep.subr.bf16.mxu0 %v5161_v0 }
 0x969   :  { %v1078_v29 = vpop.xlane.xlu1 %1077 }
 0x96a   :  { %v1082_v30 = vsub.f32 %v1070_v22, %v1078_v29  ;;  %v4395_v29 = vld [vmem:[#allocation11 + $0x38] sm:$0xff]  }
 0x96b   :  { %v1081_v31 = vpop.xlane.xlu0 %1080 }
 0x96c   :  { %v1084_v32 = vmul.f32 1.442695, %v1082_v30  ;;  %v1083_v33 = vsub.f32 %v1073_v25, %v1081_v31 }
 0x96d   :  { %v1100_v34 = vpop.permute.xlu1 %1099 }
 0x96e   :  { %4600 = vpow2.f32 %v1084_v32  ;;  %v1086_v35 = vmul.f32 1.442695, %v1083_v33  ;;  %4161 = vmatpush3.bf16.msra.mxu1 %v1100_v34  ;;  %v4396_v33 = vld [vmem:[#allocation13] ss:$8 sps:$4 sm:$0xff]   ;;  %v4398_v34 = vld [vmem:[#allocation13 + $0x4] ss:$8 sps:$4 sm:$0xff]  }
 0x96f   :  { %4174 = vmatprep.subr.bf16.mxu1 %v5161_v0 }
 0x970   :  { %4602 = vpow2.f32 %v1086_v35  ;;  %v4399_v35 = vld [vmem:[#allocation14] ss:$8 sps:$4 sm:$0xff]  }
 0x978   :  { %v4601_v36 = vpop.eup %4600 }
 0x979   :  { %v1088_v37 = vsel %vm719_vm2, %v4601_v36, 0.0 }
 0x97a   :  { %v4603_v38 = vpop.eup %4602  ;;  %1089 = vadd.xlane.f32.xlu0 %v1088_v37  ;;  %v4404_v37 = vld [vmem:[#allocation13 + $0x14] ss:$8 sps:$4 sm:$0xff]  }
 0x97b   :  { %v1091_v39 = vsel %vm719_vm2, %v4603_v38, 0.0 }
 0x97e   :  { %1092 = vadd.xlane.f32.xlu0 %v1091_v39  ;;  %v4402_v39 = vld [vmem:[#allocation13 + $0x10] ss:$8 sps:$4 sm:$0xff]  }
 0x994   :  { %1207 = vrot.lane.b32.xlu0 %v5598_v50, %s5164_s7  ;;  %v1206_v50 = vpop.permute.xlu1 %1205 }
 0xa07   :  { %v1090_v40 = vpop.xlane.xlu0 %1089 }
 0xa08   :  { %4604 = vrcp.f32 %v1090_v40 }
 0xa0b   :  { %v1093_v41 = vpop.xlane.xlu0 %1092 }
 0xa0c   :  { %4606 = vrcp.f32 %v1093_v41 }
 0xa0f   :  { %v1208_v46 = vpop.permute.xlu0 %1207 }
 0xa10   :  { %v1213_v48 = vsel %vm671_vm1, %v1208_v46, 0 }
 0xa12   :  { %v4605_v42 = vpop.eup %4604 }
 0xa13   :  { %v1096_v44 = vmul.f32 %v4605_v42, %v4601_v36  ;;  %v4401_v36 = vld [vmem:[#allocation14 + $0x4] ss:$8 sps:$4 sm:$0xff]  }
 0xa16   :  { %v4607_v43 = vpop.eup %4606 }
 0xa17   :  { %v1097_v45 = vmul.f32 %v4607_v43, %v4603_v38  ;;  %v4407_v38 = vld [vmem:[#allocation14 + $0x14] ss:$8 sps:$4 sm:$0xff]  }
 0xa19   :  { %v1098_v47 = vpack.c.bf16 %v1097_v45, %v1096_v44  ;;  %v4696_v44 = vld [vmem:[#allocation29] sm:$0xff] }
 0xa1b   :  { %4163 = vmatmul.mubr.msk.bf16.vlgmr.msra.gmra.mrb[24].mxu1 %vm719_vm2, %v1098_v47 }
 0xa1c   :  { %4175 = vmatpush3.bf16.xpose.msra.mxu1 %v1213_v48  ;;  %4176 = vmatprep.mubr.msk.bf16.mxu1 %vm5162_vm0, %v5161_v0  ;;  %v4697_v48 = vld [vmem:[#allocation29 + $0x8] sm:$0xff] }
 0xa1d   :  { %4186 = vmatprep.subr.bf16.mxu1 %v5161_v0 }
 0xa23   :  { %4177 = vmatmul.mubr.msk.bf16.vlgmr.msra.gmra.mrb[28].mxu1 %vm671_vm1, %v1206_v50 }
 0xa24   :  { %4190 = vmatprep.mubr.msk.bf16.mxu1 %vm5162_vm0, %v5161_v0  ;;  %4187 = vmatpush3.bf16.msra.mxu1 %v4394_v13  ;;  %v4443_v13 = vld [vmem:[#allocation14 + $0x74] ss:$8 sps:$4 sm:$0xff]  }
 0xa25   :  { %4188 = vmatprep.subr.bf16.mxu1 %v5161_v0 }
 0xa28   :  { %4189 = vmatpush3.bf16.msra.mxu1 %v4395_v29 }
 0xa29   :  { %1646 = vmatprep.subr.bf16.mxu1 %v4401_v36  ;;  %v4451_v36 = vld [vmem:[#allocation16 + $0x18] sm:$0xff]  }
 0xaee   :  { %v1139_v52 = vpop.f32.mrb[24].mxu1 }
 0xaef   :  { %v4164_v53 = vpop.f32.mrb[25].mxu1 }
 0xaf0   :  { %v1142_v54 = vpop.f32.mrb[26].mxu1  ;;  %v4410_v53 = vld [vmem:[#allocation13 + $0x24] ss:$8 sps:$4 sm:$0xff]  }
 0xaf1   :  { %v1146_v55 = vpack.c.bf16 %v1142_v54, %v1139_v52  ;;  %v4165_v56 = vpop.f32.mrb[27].mxu1  ;;  %v4413_v54 = vld [vmem:[#allocation14 + $0x24] ss:$8 sps:$4 sm:$0xff]  }
 0xaf2   :  { %v4411_v56 = vld [vmem:[#allocation14 + $0x20] ss:$8 sps:$4 sm:$0xff]  }
 0xaf3   :  { %4171 = vmatmul.mubr.msk.bf16.vlgmr.msra.gmra.mrb[16].mxu0 %vm671_vm1, %v1146_v55  ;;  %v4408_v55 = vld [vmem:[#allocation13 + $0x20] ss:$8 sps:$4 sm:$0xff]  }
 0xaf4   :  { %4182 = vmatprep.mubr.msk.bf16.mxu0 %vm5162_vm0, %v5161_v0 }
 0xaf6   :  { %v1249_v58 = vpop.f32.mrb[28].mxu1 }
 0xaf7   :  { %v1250_v60 = vadd.f32 %v1249_v58, %v5611_v59  ;;  %v4178_v62 = vpop.f32.mrb[29].mxu1  ;;  %v4416_v58 = vld [vmem:[#allocation13 + $0x34] ss:$8 sps:$4 sm:$0xff]  }
 0xaf8   :  { %v1252_v63 = vpop.f32.mrb[30].mxu1  ;;  %v4414_v62 = vld [vmem:[#allocation13 + $0x30] ss:$8 sps:$4 sm:$0xff]  }
 0xaf9   :  { %v1253_v1 = vadd.f32 %v1252_v63, %v5613_v61  ;;  %v4179_v2 = vpop.f32.mrb[31].mxu1  ;;  %v1256_v3 = vsel %vm719_vm2, %v1250_v60, -inf  ;;  %v4417_v63 = vld [vmem:[#allocation14 + $0x30] ss:$8 sps:$4 sm:$0xff]  }
 0xafa   :  { %1257 = vmax.xlane.f32.xlu1 %v1256_v3  ;;  %v4422_v2 = vld [vmem:[#allocation13 + $0x44] ss:$8 sps:$4 sm:$0xff]   ;;  %v4423_v3 = vld [vmem:[#allocation14 + $0x40] ss:$8 sps:$4 sm:$0xff]  }
 0xafb   :  { %v1259_v4 = vsel %vm719_vm2, %v1253_v1, -inf }
 0xafc   :  { %1260 = vmax.xlane.f32.xlu0 %v1259_v4  ;;  %v4425_v4 = vld [vmem:[#allocation14 + $0x44] ss:$8 sps:$4 sm:$0xff]  }
 0xb87   :  { %v1258_v5 = vpop.xlane.xlu1 %1257 }
 0xb88   :  { %v1262_v6 = vsub.f32 %v1250_v60, %v1258_v5  ;;  %v4419_v60 = vld [vmem:[#allocation14 + $0x34] ss:$8 sps:$4 sm:$0xff]  }
 0xb89   :  { %v1261_v7 = vpop.xlane.xlu0 %1260  ;;  %v4428_v5 = vld [vmem:[#allocation13 + $0x54] ss:$8 sps:$4 sm:$0xff]  }
 0xb8a   :  { %v1264_v8 = vmul.f32 1.442695, %v1262_v6  ;;  %v1263_v9 = vsub.f32 %v1253_v1, %v1261_v7  ;;  %v4420_v1 = vld [vmem:[#allocation13 + $0x40] ss:$8 sps:$4 sm:$0xff]   ;;  %v4431_v6 = vld [vmem:[#allocation14 + $0x54] ss:$8 sps:$4 sm:$0xff]  }
 0xb8b   :  { %v4426_v7 = vld [vmem:[#allocation13 + $0x50] ss:$8 sps:$4 sm:$0xff]  }
 0xb8c   :  { %4608 = vpow2.f32 %v1264_v8  ;;  %v1266_v10 = vmul.f32 1.442695, %v1263_v9  ;;  %v4429_v8 = vld [vmem:[#allocation14 + $0x50] ss:$8 sps:$4 sm:$0xff]   ;;  %v4434_v9 = vld [vmem:[#allocation13 + $0x64] ss:$8 sps:$4 sm:$0xff]  }
 0xb8e   :  { %4610 = vpow2.f32 %v1266_v10  ;;  %v4437_v10 = vld [vmem:[#allocation14 + $0x64] ss:$8 sps:$4 sm:$0xff]  }
 0xb96   :  { %v4609_v59 = vpop.eup %4608 }
 0xb97   :  { %v1268_v11 = vsel %vm719_vm2, %v4609_v59, 0.0 }
 0xb98   :  { %v4611_v12 = vpop.eup %4610  ;;  %1269 = vadd.xlane.f32.xlu0 %v1268_v11  ;;  %v4432_v11 = vld [vmem:[#allocation13 + $0x60] ss:$8 sps:$4 sm:$0xff]  }
 0xb99   :  { %v1271_v61 = vsel %vm719_vm2, %v4611_v12, 0.0 }
 0xb9a   :  { %1272 = vadd.xlane.f32.xlu1 %v1271_v61  ;;  %v4440_v61 = vld [vmem:[#allocation13 + $0x74] ss:$8 sps:$4 sm:$0xff]  }
 0xbae   :  { %1279 = vrot.lane.b32.xlu0 %v5607_v57, %s5164_s7 }
 0xbc6   :  { %v1196_v14 = vpop.f32.mrb[16].mxu0 }
 0xbc7   :  { %v1203_v15 = vadd.f32 %v1196_v14, %v5664_v16  ;;  %v4172_v17 = vpop.f32.mrb[17].mxu0  ;;  %v4438_v14 = vld [vmem:[#allocation13 + $0x70] ss:$8 sps:$4 sm:$0xff]  }
 0xbc8   :  { %v1199_v18 = vpop.f32.mrb[18].mxu0 }
 0xbc9   :  { %v1204_v20 = vadd.f32 %v1199_v18, %v5666_v19  ;;  %v4173_v21 = vpop.f32.mrb[19].mxu0 }
 0xc25   :  { %v1270_v22 = vpop.xlane.xlu0 %1269 }
 0xc26   :  { %4612 = vrcp.f32 %v1270_v22 }
 0xc27   :  { %v1273_v23 = vpop.xlane.xlu1 %1272 }
 0xc28   :  { %4614 = vrcp.f32 %v1273_v23 }
 0xc29   :  { %v1280_v24 = vpop.permute.xlu0 %1279 }
 0xc2a   :  { %4181 = vmatpush3.bf16.msra.mxu0 %v1280_v24 }
 0xc2b   :  { %1507 = vmatprep.subr.bf16.mxu0 %v4398_v34  ;;  %v4449_v34 = vld [vmem:[#allocation16 + $0x10] sm:$0xff]  }
 0xc30   :  { %v4613_v25 = vpop.eup %4612 }
 0xc31   :  { %v1276_v26 = vmul.f32 %v4613_v25, %v4609_v59  ;;  %v5165_v59 = vmov 0  }
 0xc32   :  { %v4615_v57 = vpop.eup %4614 }
 0xc33   :  { %v1277_v27 = vmul.f32 %v4615_v57, %v4611_v12  ;;  %v4435_v12 = vld [vmem:[#allocation14 + $0x60] ss:$8 sps:$4 sm:$0xff]  }
 0xc35   :  { %v1278_v28 = vpack.c.bf16 %v1277_v27, %v1276_v26  ;;  %v3732_v26 = vld [vmem:[%s5946_s10] ss:$0 sm:$0xff] }
 0xc37   :  { %4183 = vmatmul.mubr.msk.bf16.vlgmr.msra.gmra.mrb[20].mxu0 %vm719_vm2, %v1278_v28 }
 0xc38   :  { %1508 = vmatpush1.bf16.msra.mxu0 %v4396_v33  ;;  %1539 = vmatprep.mubr.bf16.mxu0 %v5165_v59  ;;  %v4448_v33 = vld [vmem:[#allocation16 + $0x50] sm:$0xff]  }
 0xc39   :  { %1509 = vmatprep.subr.bf16.mxu0 %v4404_v37  ;;  %v4452_v37 = vld [vmem:[#allocation16 + $0x60] sm:$0xff]  }
 0xc3c   :  { %1510 = vmatpush1.bf16.msra.mxu0 %v4402_v39  ;;  %v4454_v39 = vld [vmem:[#allocation16 + $0x68] sm:$0xff]  }
 0xc3d   :  { %1511 = vmatprep.subr.bf16.mxu0 %v4410_v53 }
 0xc40   :  { %1512 = vmatpush1.bf16.msra.mxu0 %v4408_v55 }
 0xc41   :  { %1513 = vmatprep.subr.bf16.mxu0 %v4416_v58 }
 0xc44   :  { %1514 = vmatpush1.bf16.msra.mxu0 %v4414_v62 }
 0xc45   :  { %1515 = vmatprep.subr.bf16.mxu0 %v4422_v2 }
 0xc48   :  { %1516 = vmatpush1.bf16.msra.mxu0 %v4420_v1 }
 0xc49   :  { %1517 = vmatprep.subr.bf16.mxu0 %v4428_v5 }
 0xc4c   :  { %1518 = vmatpush1.bf16.msra.mxu0 %v4426_v7 }
 0xc4d   :  { %1519 = vmatprep.subr.bf16.mxu0 %v4434_v9 }
 0xc50   :  { %1520 = vmatpush1.bf16.msra.mxu0 %v4432_v11 }
 0xc51   :  { %1521 = vmatprep.subr.bf16.mxu0 %v4440_v61 }
 0xc54   :  { %1522 = vmatpush1.bf16.msra.mxu0 %v4438_v14 }
 0xd0a   :  { %v1319_v16 = vpop.f32.mrb[20].mxu0 }
 0xd0b   :  { %v4184_v30 = vpop.f32.mrb[21].mxu0 }
 0xd0c   :  { %v1322_v31 = vpop.f32.mrb[22].mxu0  ;;  %v4444_v30 = vld [vmem:[#allocation16 + $0x40] sm:$0xff]  }
 0xd0d   :  { %v1326_v19 = vpack.c.bf16 %v1322_v31, %v1319_v16  ;;  %v4185_v32 = vpop.f32.mrb[23].mxu0  ;;  %v4445_v31 = vld [vmem:[#allocation16] sm:$0xff]   ;;  %3955 = vmatprep.subr.bf16.mxu0 %v4444_v30 }
 0xd0e   :  { %v4447_v32 = vld [vmem:[#allocation16 + $0x8] sm:$0xff]  }
 0xd0f   :  { %4191 = vmatmul.mubr.msk.bf16.vlgmr.msra.gmra.mrb[32].mxu1 %vm671_vm1, %v1326_v19  ;;  %v4446_v19 = vld [vmem:[#allocation16 + $0x48] sm:$0xff]  }
 0xd10   :  { %1647 = vmatpush1.bf16.msra.mxu1 %v4399_v35  ;;  %1678 = vmatprep.mubr.bf16.mxu1 %v5165_v59  ;;  %v4450_v35 = vld [vmem:[#allocation16 + $0x58] sm:$0xff]  }
 0xd11   :  { %1648 = vmatprep.subr.bf16.mxu1 %v4407_v38  ;;  %v4453_v38 = vld [vmem:[#allocation16 + $0x20] sm:$0xff]  }
 0xd14   :  { %1649 = vmatpush1.bf16.msra.mxu1 %v4405_v49  ;;  %v4455_v49 = vld [vmem:[#allocation16 + $0x28] sm:$0xff]  }
 0xd15   :  { %1650 = vmatprep.subr.bf16.mxu1 %v4413_v54 }
 0xd18   :  { %1651 = vmatpush1.bf16.msra.mxu1 %v4411_v56 }
 0xd19   :  { %1652 = vmatprep.subr.bf16.mxu1 %v4419_v60 }
 0xd1c   :  { %1653 = vmatpush1.bf16.msra.mxu1 %v4417_v63 }
 0xd1d   :  { %1654 = vmatprep.subr.bf16.mxu1 %v4425_v4 }
 0xd20   :  { %1655 = vmatpush1.bf16.msra.mxu1 %v4423_v3 }
 0xd21   :  { %1656 = vmatprep.subr.bf16.mxu1 %v4431_v6 }
 0xd24   :  { %1657 = vmatpush1.bf16.msra.mxu1 %v4429_v8 }
 0xd25   :  { %1658 = vmatprep.subr.bf16.mxu1 %v4437_v10 }
 0xd28   :  { %1659 = vmatpush1.bf16.msra.mxu1 %v4435_v12 }
 0xd29   :  { %1660 = vmatprep.subr.bf16.mxu1 %v4443_v13 }
 0xde2   :  { %v1376_v40 = vpop.f32.mrb[32].mxu1 }
 0xde3   :  { %v1383_v41 = vadd.f32 %v1376_v40, %v1203_v15  ;;  %v4192_v42 = vpop.f32.mrb[33].mxu1  ;;  %v4441_v15 = vld [vmem:[#allocation14 + $0x70] ss:$8 sps:$4 sm:$0xff]  }
 0xde4   :  { %v1379_v43 = vpop.f32.mrb[34].mxu1  ;;  %1661 = vmatpush1.bf16.msra.mxu1 %v4441_v15  ;;  %v4456_v40 = vld [vmem:[#allocation16 + $0x70] sm:$0xff]   ;;  %v4458_v42 = vld [vmem:[#allocation16 + $0x78] sm:$0xff]  }
 0xde5   :  { %v5707_v45 = vadd.f32 %v4696_v44, %v1383_v41  ;;  %v1384_v46 = vadd.f32 %v1379_v43, %v1204_v20  ;;  %v4193_v47 = vpop.f32.mrb[35].mxu1  ;;  %4194 = vmatprep.subr.bf16.mxu1 %v5161_v0  ;;  %v4457_v41 = vld [vmem:[#allocation16 + $0x30] sm:$0xff]   ;;  %v4459_v43 = vld [vmem:[#allocation16 + $0x38] sm:$0xff]  }
 0xde7   :  { %v5709_v50 = vadd.f32 %v4697_v48, %v1384_v46  ;;  %v1388_v51 = vmul.f32 %v5707_v45, %v5707_v45 }
 0xde9   :  { %1390 = vadd.xlane.f32.xlu1 %v1388_v51  ;;  %v1389_v52 = vmul.f32 %v5709_v50, %v5709_v50 }
 0xded   :  { %1392 = vadd.xlane.f32.xlu1 %v1389_v52 }
 0xe76   :  { %v1391_v17 = vpop.xlane.xlu1 %1390 }
 0xe77   :  { %v1394_v18 = vmul.f32 0.0078125, %v1391_v17 }
 0xe79   :  { %v1396_v20 = vadd.f32 1e-06, %v1394_v18 }
 0xe7a   :  { %v1393_v21 = vpop.xlane.xlu1 %1392 }
 0xe7b   :  { %4616 = vrsqrt.f32 %v1396_v20  ;;  %v1395_v22 = vmul.f32 0.0078125, %v1393_v21 }
 0xe7d   :  { %v1397_v23 = vadd.f32 1e-06, %v1395_v22  ;;  %v4460_v22 = vld [vmem:[#allocation17] sm:$0xff]  }
 0xe7f   :  { %4618 = vrsqrt.f32 %v1397_v23  ;;  %v4461_v23 = vld [vmem:[#allocation19] sm:$0xff]  }
 0xe85   :  { %v4617_v24 = vpop.eup %4616 }
 0xe86   :  { %v1400_v25 = vmul.f32 %v4617_v24, %v5707_v45  ;;  %v4462_v24 = vld [vmem:[#allocation17 + $0x8] sm:$0xff]  }
 0xe88   :  { %v1408_v28 = vmul.f32 %v3732_v26, %v1400_v25  ;;  %v4463_v25 = vld [vmem:[#allocation19 + $0x8] sm:$0xff]  }
 0xe89   :  { %v4619_v57 = vpop.eup %4618 }
 0xe8a   :  { %v1401_v27 = vmul.f32 %v4619_v57, %v5709_v50 }
 0xe8c   :  { %v1409_v29 = vmul.f32 %v3732_v26, %v1401_v27 }
 0xe8e   :  { %v1410_v16 = vpack.c.bf16 %v1409_v29, %v1408_v28 }
 0xe90   :  { %1540 = vmatmul.mubr.bf16.vlgmr.msra.gmra.mrb[24].mxu0 %v1410_v16  ;;  %1679 = vmatmul.mubr.bf16.vlgmr.msra.gmra.mrb[36].mxu1 %v1410_v16 }
 0xe91   :  { %4210 = vmatprep.mubr.msk.bf16.mxu1 %vm5162_vm0, %v5161_v0  ;;  %3956 = vmatpush3.bf16.msra.mxu0 %v4445_v31 }
 0xe92   :  { %3957 = vmatprep.subr.bf16.mxu0 %v4446_v19  ;;  %4195 = vmatpush3.bf16.msra.mxu1 %v4460_v22 }
 0xe93   :  { %4196 = vmatprep.subr.bf16.mxu1 %v5161_v0 }
 0xe95   :  { %3958 = vmatpush3.bf16.msra.mxu0 %v4447_v32 }
 0xe96   :  { %3959 = vmatprep.subr.bf16.mxu0 %v4448_v33  ;;  %4197 = vmatpush3.bf16.msra.mxu1 %v4462_v24  ;;  %v4464_v33 = vld [vmem:[#allocation17 + $0x10] sm:$0xff]  }
 0xe97   :  { %4198 = vmatprep.subr.bf16.mxu1 %v5161_v0 }
 0xe99   :  { %3960 = vmatpush3.bf16.msra.mxu0 %v4449_v34  ;;  %v4465_v34 = vld [vmem:[#allocation19 + $0x10] sm:$0xff]  }
 0xe9a   :  { %3961 = vmatprep.subr.bf16.mxu0 %v4450_v35  ;;  %4199 = vmatpush3.bf16.msra.mxu1 %v4464_v33  ;;  %v4468_v35 = vld [vmem:[#allocation17 + $0x20] sm:$0xff]  }
 0xe9b   :  { %4200 = vmatprep.subr.bf16.mxu1 %v5161_v0 }
 0xe9d   :  { %3962 = vmatpush3.bf16.msra.mxu0 %v4451_v36  ;;  %v4469_v36 = vld [vmem:[#allocation19 + $0x20] sm:$0xff]  }
 0xe9e   :  { %3963 = vmatprep.subr.bf16.mxu0 %v4452_v37  ;;  %v4470_v37 = vld [vmem:[#allocation17 + $0x28] sm:$0xff]  }
 0xea1   :  { %3964 = vmatpush3.bf16.msra.mxu0 %v4453_v38  ;;  %v4471_v38 = vld [vmem:[#allocation19 + $0x28] sm:$0xff]  }
 0xea2   :  { %3965 = vmatprep.subr.bf16.mxu0 %v4454_v39  ;;  %v4472_v39 = vld [vmem:[#allocation17 + $0x30] sm:$0xff]  }
 0xea5   :  { %3966 = vmatpush3.bf16.msra.mxu0 %v4455_v49  ;;  %v4473_v49 = vld [vmem:[#allocation19 + $0x30] sm:$0xff]  }
 0xea6   :  { %3967 = vmatprep.subr.bf16.mxu0 %v4456_v40  ;;  %v4474_v40 = vld [vmem:[#allocation17 + $0x38] sm:$0xff]  }
 0xea9   :  { %3968 = vmatpush3.bf16.msra.mxu0 %v4457_v41  ;;  %v4475_v41 = vld [vmem:[#allocation19 + $0x38] sm:$0xff]  }
 0xeaa   :  { %3969 = vmatprep.subr.bf16.mxu0 %v4458_v42 }
 0xead   :  { %3970 = vmatpush3.bf16.msra.mxu0 %v4459_v43 }
 0xeae   :  { %4214 = vmatprep.subr.bf16.mxu0 %v5161_v0 }
 0xf63   :  { %v1541_v44 = vpop.f32.mrb[24].mxu0  ;;  %v1680_v46 = vpop.f32.mrb[36].mxu1 }
 0xf64   :  { %v3765_v47 = vmul.f32 -1.442695, %v1541_v44  ;;  %v1543_v48 = vpop.f32.mrb[25].mxu0  ;;  %v1682_v51 = vpop.f32.mrb[37].mxu1 }
 0xf65   :  { %v3766_v52 = vmul.f32 -1.442695, %v1543_v48  ;;  %v1545_v53 = vpop.f32.mrb[26].mxu0  ;;  %v1684_v54 = vpop.f32.mrb[38].mxu1 }
 0xf66   :  { %4620 = vpow2.f32 %v3765_v47  ;;  %v3767_v55 = vmul.f32 -1.442695, %v1545_v53  ;;  %v1547_v56 = vpop.f32.mrb[27].mxu0  ;;  %v1686_v58 = vpop.f32.mrb[39].mxu1 }
 0xf67   :  { %4622 = vpow2.f32 %v3766_v52  ;;  %v3768_v60 = vmul.f32 -1.442695, %v1547_v56 }
 0xf68   :  { %4624 = vpow2.f32 %v3767_v55 }
 0xf69   :  { %4626 = vpow2.f32 %v3768_v60  ;;  %v4476_v60 = vld [vmem:[#allocation20] sm:$0xff]  }
 0xf70   :  { %v4621_v62 = vpop.eup %4620 }
 0xf71   :  { %v4623_v63 = vpop.eup %4622  ;;  %v1701_v1 = vadd.f32 1.0, %v4621_v62 }
 0xf72   :  { %v4625_v2 = vpop.eup %4624  ;;  %v1702_v3 = vadd.f32 1.0, %v4623_v63  ;;  %v4477_v63 = vld [vmem:[#allocation20 + $0x8] sm:$0xff]  }
 0xf73   :  { %v4627_v4 = vpop.eup %4626  ;;  %4628 = vrcp.f32 %v1701_v1  ;;  %v1703_v5 = vadd.f32 1.0, %v4625_v2  ;;  %v4478_v1 = vld [vmem:[#allocation20 + $0x10] sm:$0xff]   ;;  %v4479_v2 = vld [vmem:[#allocation20 + $0x18] sm:$0xff]  }
 0xf74   :  { %4630 = vrcp.f32 %v1702_v3  ;;  %v1704_v6 = vadd.f32 1.0, %v4627_v4  ;;  %v4480_v3 = vld [vmem:[#allocation20 + $0x20] sm:$0xff]   ;;  %v4481_v4 = vld [vmem:[#allocation20 + $0x28] sm:$0xff]  }
 0xf75   :  { %4632 = vrcp.f32 %v1703_v5  ;;  %v4482_v5 = vld [vmem:[#allocation20 + $0x30] sm:$0xff]  }
 0xf76   :  { %4634 = vrcp.f32 %v1704_v6  ;;  %v4483_v6 = vld [vmem:[#allocation20 + $0x38] sm:$0xff]  }
 0xf7d   :  { %v4629_v7 = vpop.eup %4628 }
 0xf7e   :  { %v4631_v8 = vpop.eup %4630  ;;  %v1713_v9 = vmul.f32 %v4629_v7, %v1541_v44 }
 0xf7f   :  { %v4633_v10 = vpop.eup %4632  ;;  %v1714_v11 = vmul.f32 %v4631_v8, %v1543_v48 }
 0xf80   :  { %v4635_v12 = vpop.eup %4634  ;;  %v1717_v61 = vmul.f32 %v1713_v9, %v1680_v46  ;;  %v1715_v13 = vmul.f32 %v4633_v10, %v1545_v53 }
 0xf81   :  { %v1718_v14 = vmul.f32 %v1714_v11, %v1682_v51  ;;  %v1716_v15 = vmul.f32 %v4635_v12, %v1547_v56 }
 0xf82   :  { %v1719_v17 = vmul.f32 %v1715_v13, %v1684_v54  ;;  %v3785_v54 = vld [vmem:[%s5954_s18] ss:$0 sm:$0xff] }
 0xf83   :  { %v1720_v18 = vmul.f32 %v1716_v15, %v1686_v58 }
 0xf84   :  { %v1721_v20 = vpack.c.bf16 %v1719_v17, %v1717_v61 }
 0xf85   :  { %v1722_v21 = vpack.c.bf16 %v1720_v18, %v1718_v14 }
 0xf87   :  { %1883 = vmatprep.mubr.bf16.mxu0 %v1722_v21 }
 0xf88   :  { %1884 = vmatmul.mubr.bf16.vlgmr.msra.gmra.mrb[28].mxu0 %v1721_v20 }
 0xf89   :  { %4230 = vmatprep.mubr.msk.bf16.mxu0 %vm5162_vm0, %v5161_v0  ;;  %4215 = vmatpush3.bf16.msra.mxu0 %v4461_v23 }
 0xf8a   :  { %4216 = vmatprep.subr.bf16.mxu0 %v5161_v0 }
 0xf8d   :  { %4217 = vmatpush3.bf16.msra.mxu0 %v4463_v25 }
 0xf8e   :  { %4218 = vmatprep.subr.bf16.mxu0 %v5161_v0 }
 0xf91   :  { %4219 = vmatpush3.bf16.msra.mxu0 %v4465_v34 }
 0xf92   :  { %4220 = vmatprep.subr.bf16.mxu0 %v5161_v0 }
0x105b   :  { %v3971_v57 = vpop.f32.mrb[28].mxu0 }
0x105c   :  { %v3972_v26 = vpop.f32.mrb[29].mxu0 }
0x105d   :  { %v3973_v27 = vadd.f32 %v3972_v26, %v3971_v57  ;;  %v3974_v28 = vpop.f32.mrb[30].mxu0 }
0x105e   :  { %v3975_v29 = vpop.f32.mrb[31].mxu0 }
0x105f   :  { %v5733_v16 = vadd.f32 %v3973_v27, %v5707_v45  ;;  %v3976_v30 = vadd.f32 %v3975_v29, %v3974_v28  ;;  %v4466_v45 = vld [vmem:[#allocation17 + $0x18] sm:$0xff]   ;;  %v5799_v27 = vld [vmem:[#allocation5] sm:$0xff] }
0x1060   :  { %4201 = vmatpush3.bf16.msra.mxu1 %v4466_v45 }
0x1061   :  { %1895 = vst [vmem:[#allocation29 + $0x10] sm:$0xff] %v5733_v16  ;;  %v5737_v31 = vadd.f32 %v3976_v30, %v5709_v50  ;;  %v1898_v19 = vmul.f32 %v5733_v16, %v5733_v16  ;;  %v4467_v50 = vld [vmem:[#allocation19 + $0x18] sm:$0xff]   ;;  %4202 = vmatprep.subr.bf16.mxu1 %v5161_v0 }
0x1062   :  { %4221 = vmatpush3.bf16.msra.mxu0 %v4467_v50 }
0x1063   :  { %1896 = vst [vmem:[#allocation29 + $0x18] sm:$0xff] %v5737_v31  ;;  %1900 = vadd.xlane.f32.xlu1 %v1898_v19  ;;  %v1899_v32 = vmul.f32 %v5737_v31, %v5737_v31  ;;  %4222 = vmatprep.subr.bf16.mxu0 %v5161_v0  ;;  %v5802_v19 = vld [vmem:[#allocation5 + $0x8] sm:$0xff] }
0x1064   :  { %4203 = vmatpush3.bf16.msra.mxu1 %v4468_v35 }
0x1065   :  { %4204 = vmatprep.subr.bf16.mxu1 %v5161_v0 }
0x1066   :  { %4223 = vmatpush3.bf16.msra.mxu0 %v4469_v36 }
0x1067   :  { %1902 = vadd.xlane.f32.xlu1 %v1899_v32  ;;  %4224 = vmatprep.subr.bf16.mxu0 %v5161_v0 }
0x1068   :  { %4205 = vmatpush3.bf16.msra.mxu1 %v4470_v37 }
0x1069   :  { %4206 = vmatprep.subr.bf16.mxu1 %v5161_v0 }
0x106a   :  { %4225 = vmatpush3.bf16.msra.mxu0 %v4471_v38 }
0x106b   :  { %4226 = vmatprep.subr.bf16.mxu0 %v5161_v0 }
0x106c   :  { %4207 = vmatpush3.bf16.msra.mxu1 %v4472_v39 }
0x106d   :  { %4208 = vmatprep.subr.bf16.mxu1 %v5161_v0 }
0x106e   :  { %4227 = vmatpush3.bf16.msra.mxu0 %v4473_v49 }
0x106f   :  { %4228 = vmatprep.subr.bf16.mxu0 %v5161_v0 }
0x1070   :  { %4209 = vmatpush3.bf16.msra.mxu1 %v4474_v40 }
0x1071   :  { %4234 = vmatprep.subr.bf16.mxu1 %v5161_v0 }
0x1072   :  { %4229 = vmatpush3.bf16.msra.mxu0 %v4475_v41 }
0x1073   :  { %4254 = vmatprep.subr.bf16.mxu0 %v5161_v0 }
0x10f0   :  { %v1901_v42 = vpop.xlane.xlu1 %1900 }
0x10f1   :  { %v1904_v43 = vmul.f32 0.0078125, %v1901_v42 }
0x10f3   :  { %v1906_v44 = vadd.f32 1e-06, %v1904_v43 }
0x10f4   :  { %v1903_v46 = vpop.xlane.xlu1 %1902 }
0x10f5   :  { %4636 = vrsqrt.f32 %v1906_v44  ;;  %v1905_v47 = vmul.f32 0.0078125, %v1903_v46 }
0x10f7   :  { %v1907_v48 = vadd.f32 1e-06, %v1905_v47 }
0x10f9   :  { %4638 = vrsqrt.f32 %v1907_v48 }
0x10ff   :  { %v4637_v51 = vpop.eup %4636 }
0x1100   :  { %v1910_v52 = vmul.f32 %v4637_v51, %v5733_v16 }
0x1102   :  { %v1918_v56 = vmul.f32 %v3785_v54, %v1910_v52 }
0x1103   :  { %v4639_v53 = vpop.eup %4638 }
0x1104   :  { %v1911_v55 = vmul.f32 %v4639_v53, %v5737_v31 }
0x1106   :  { %v1919_v58 = vmul.f32 %v3785_v54, %v1911_v55 }
0x1108   :  { %v1920_v62 = vpack.c.bf16 %v1919_v58, %v1918_v56 }
0x110a   :  { %4211 = vmatmul.mubr.bf16.vlgmr.msra.gmra.mrb[40].mxu1 %v1920_v62  ;;  %4231 = vmatmul.mubr.bf16.vlgmr.msra.gmra.mrb[32].mxu0 %v1920_v62 }
0x110b   :  { %4235 = vmatpush3.bf16.msra.mxu1 %v4476_v60  ;;  %4250 = vmatprep.mubr.msk.bf16.mxu1 %vm5162_vm0, %v5161_v0 }
0x110c   :  { %4236 = vmatprep.subr.bf16.mxu1 %v5161_v0  ;;  %4256 = vmatprep.mubr.msk.bf16.mxu0 %vm5162_vm0, %v5161_v0 }
0x110f   :  { %4237 = vmatpush3.bf16.msra.mxu1 %v4477_v63 }
0x1110   :  { %4238 = vmatprep.subr.bf16.mxu1 %v5161_v0 }
0x1113   :  { %4239 = vmatpush3.bf16.msra.mxu1 %v4478_v1 }
0x1114   :  { %4240 = vmatprep.subr.bf16.mxu1 %v5161_v0 }
0x1117   :  { %4241 = vmatpush3.bf16.msra.mxu1 %v4479_v2 }
0x1118   :  { %4242 = vmatprep.subr.bf16.mxu1 %v5161_v0 }
0x111b   :  { %4243 = vmatpush3.bf16.msra.mxu1 %v4480_v3 }
0x111c   :  { %4244 = vmatprep.subr.bf16.mxu1 %v5161_v0 }
0x111f   :  { %4245 = vmatpush3.bf16.msra.mxu1 %v4481_v4 }
0x1120   :  { %4246 = vmatprep.subr.bf16.mxu1 %v5161_v0 }
0x1123   :  { %4247 = vmatpush3.bf16.msra.mxu1 %v4482_v5 }
0x1124   :  { %4248 = vmatprep.subr.bf16.mxu1 %v5161_v0 }
0x1127   :  { %4249 = vmatpush3.bf16.msra.mxu1 %v4483_v6 }
0x1128   :  { %4260 = vmatprep.subr.bf16.mxu1 %v5161_v0 }
0x112a   :  { %4251 = vmatmul.mubr.bf16.vlgmr.msra.gmra.mrb[44].mxu1 %v1920_v62 }
0x112b   :  { %4262 = vmatprep.mubr.msk.bf16.mxu1 %vm5162_vm0, %v5161_v0 }
0x11dd   :  { %v2019_v7 = vpop.f32.mrb[40].mxu1  ;;  %v2125_v8 = vpop.f32.mrb[32].mxu0 }
0x11de   :  { %v4212_v9 = vpop.f32.mrb[41].mxu1  ;;  %v4232_v10 = vpop.f32.mrb[33].mxu0 }
0x11df   :  { %v2022_v11 = vpop.f32.mrb[42].mxu1  ;;  %v2128_v12 = vpop.f32.mrb[34].mxu0 }
0x11e0   :  { %v5775_v61 = vpack.c.bf16 %v2022_v11, %v2019_v7  ;;  %v5777_v13 = vpack.c.bf16 %v2128_v12, %v2125_v8  ;;  %v4213_v14 = vpop.f32.mrb[43].mxu1  ;;  %v4233_v15 = vpop.f32.mrb[35].mxu0  ;;  %v4486_v11 = vld [vmem:[#allocation22 + $0x10] sm:$0xff]   ;;  %v4487_v12 = vld [vmem:[#allocation22 + $0x18] sm:$0xff]  }
0x11e2   :  { %2374 = vrot.lane.b32.xlu1 %v5777_v13, %s5163_s9  ;;  %2371 = vrot.lane.b32.xlu0 %v5775_v61, %s5163_s9  ;;  %v2259_v17 = vsel %vm671_vm1, %v5777_v13, 0 }
0x11e3   :  { %4255 = vmatpush3.bf16.xpose.msra.mxu0 %v2259_v17 }
0x11e4   :  { %4266 = vmatprep.subr.bf16.mxu0 %v5161_v0 }
0x11ea   :  { %4257 = vmatmul.mubr.msk.bf16.vlgmr.msra.gmra.mrb[36].mxu0 %vm671_vm1, %v5775_v61 }
0x11eb   :  { %4268 = vmatprep.mubr.msk.bf16.mxu0 %vm5162_vm0, %v5161_v0 }
0x11fd   :  { %v2231_v18 = vpop.f32.mrb[44].mxu1 }
0x11fe   :  { %v4252_v20 = vpop.f32.mrb[45].mxu1 }
0x11ff   :  { %v2234_v21 = vpop.f32.mrb[46].mxu1 }
0x1200   :  { %v5790_v22 = vpack.c.bf16 %v2234_v21, %v2231_v18  ;;  %v4253_v23 = vpop.f32.mrb[47].mxu1 }
0x1202   :  { %4261 = vmatpush3.bf16.msra.mxu1 %v5790_v22 }
0x1203   :  { %4272 = vmatprep.subr.bf16.mxu1 %v5161_v0 }
0x1254   :  { %v2375_v24 = vpop.permute.xlu1 %2374  ;;  %v2372_v57 = vpop.permute.xlu0 %2371 }
0x1255   :  { %v2380_v25 = vsel %vm671_vm1, %v2375_v24, 0  ;;  %v4484_v24 = vld [vmem:[#allocation22] sm:$0xff]  }
0x1256   :  { %4267 = vmatpush3.bf16.xpose.msra.mxu0 %v2380_v25 }
0x1257   :  { %4278 = vmatprep.subr.bf16.mxu0 %v5161_v0 }
0x125d   :  { %4269 = vmatmul.mubr.msk.bf16.vlgmr.msra.gmra.mrb[40].mxu0 %vm671_vm1, %v2372_v57  ;;  %v4485_v57 = vld [vmem:[#allocation22 + $0x8] sm:$0xff]  }
0x125e   :  { %4282 = vmatprep.mubr.msk.bf16.mxu0 %vm5162_vm0, %v5161_v0  ;;  %4279 = vmatpush3.bf16.msra.mxu0 %v4486_v11 }
0x125f   :  { %4280 = vmatprep.subr.bf16.mxu0 %v5161_v0 }
0x1262   :  { %4281 = vmatpush3.bf16.msra.mxu0 %v4487_v12 }
0x1263   :  { %4294 = vmatprep.subr.bf16.mxu0 %v5161_v0 }
0x12bd   :  { %v2295_v26 = vpop.f32.mrb[36].mxu0 }
0x12be   :  { %v2296_v28 = vadd.f32 %v5799_v27, %v2295_v26  ;;  %v4258_v29 = vpop.f32.mrb[37].mxu0 }
0x12bf   :  { %v2298_v30 = vpop.f32.mrb[38].mxu0 }
0x12c0   :  { %v2299_v32 = vadd.f32 %v5802_v19, %v2298_v30  ;;  %v4259_v33 = vpop.f32.mrb[39].mxu0  ;;  %v2302_v34 = vsel %vm719_vm2, %v2296_v28, -inf }
0x12c1   :  { %2303 = vmax.xlane.f32.xlu0 %v2302_v34 }
0x12c2   :  { %v2305_v45 = vsel %vm719_vm2, %v2299_v32, -inf }
0x12c3   :  { %2306 = vmax.xlane.f32.xlu1 %v2305_v45 }
0x1330   :  { %v2416_v50 = vpop.f32.mrb[40].mxu0 }
0x1331   :  { %v2417_v35 = vadd.f32 %v5799_v27, %v2416_v50  ;;  %v4270_v36 = vpop.f32.mrb[41].mxu0 }
0x1332   :  { %v2419_v37 = vpop.f32.mrb[42].mxu0 }
0x1333   :  { %v2420_v38 = vadd.f32 %v5802_v19, %v2419_v37  ;;  %v4271_v39 = vpop.f32.mrb[43].mxu0  ;;  %v2423_v49 = vsel %vm719_vm2, %v2417_v35, -inf }
0x1334   :  { %2424 = vmax.xlane.f32.xlu0 %v2423_v49 }
0x1335   :  { %v2426_v40 = vsel %vm719_vm2, %v2420_v38, -inf }
0x1338   :  { %2427 = vmax.xlane.f32.xlu0 %v2426_v40 }
0x134e   :  { %v2304_v41 = vpop.xlane.xlu0 %2303 }
0x134f   :  { %v2308_v42 = vsub.f32 %v2296_v28, %v2304_v41 }
0x1350   :  { %v2307_v43 = vpop.xlane.xlu1 %2306 }
0x1351   :  { %v2310_v44 = vmul.f32 1.442695, %v2308_v42  ;;  %v2309_v46 = vsub.f32 %v2299_v32, %v2307_v43 }
0x1353   :  { %4640 = vpow2.f32 %v2310_v44  ;;  %v2312_v47 = vmul.f32 1.442695, %v2309_v46 }
0x1355   :  { %4642 = vpow2.f32 %v2312_v47 }
0x135d   :  { %v4641_v48 = vpop.eup %4640 }
0x135e   :  { %v2314_v51 = vsel %vm719_vm2, %v4641_v48, 0.0 }
0x135f   :  { %v4643_v52 = vpop.eup %4642  ;;  %2315 = vadd.xlane.f32.xlu0 %v2314_v51 }
0x1360   :  { %v2317_v53 = vsel %vm719_vm2, %v4643_v52, 0.0 }
0x1363   :  { %2318 = vadd.xlane.f32.xlu0 %v2317_v53 }
0x13c1   :  { %v2425_v54 = vpop.xlane.xlu0 %2424 }
0x13c2   :  { %v2429_v55 = vsub.f32 %v2417_v35, %v2425_v54 }
0x13c4   :  { %v2431_v56 = vmul.f32 1.442695, %v2429_v55 }
0x13c5   :  { %v2428_v58 = vpop.xlane.xlu0 %2427 }
0x13c6   :  { %4644 = vpow2.f32 %v2431_v56  ;;  %v2430_v60 = vsub.f32 %v2420_v38, %v2428_v58 }
0x13c8   :  { %v2433_v62 = vmul.f32 1.442695, %v2430_v60 }
0x13ca   :  { %4646 = vpow2.f32 %v2433_v62 }
0x13d0   :  { %v4645_v63 = vpop.eup %4644 }
0x13d1   :  { %v2435_v1 = vsel %vm719_vm2, %v4645_v63, 0.0 }
0x13d2   :  { %2436 = vadd.xlane.f32.xlu1 %v2435_v1 }
0x13d4   :  { %v4647_v2 = vpop.eup %4646 }
0x13d5   :  { %v2438_v3 = vsel %vm719_vm2, %v4647_v2, 0.0 }
0x13d6   :  { %2439 = vadd.xlane.f32.xlu0 %v2438_v3 }
0x13e3   :  { %2447 = vrot.lane.b32.xlu1 %v5790_v22, %s5163_s9 }
0x13e7   :  { %2607 = vrot.lane.b32.xlu1 %v5775_v61, %s5145_s5 }
0x13ec   :  { %2609 = vrot.lane.b32.xlu0 %v5777_v13, %s5145_s5  ;;  %v2316_v4 = vpop.xlane.xlu0 %2315 }
0x13ed   :  { %4648 = vrcp.f32 %v2316_v4 }
0x13f0   :  { %v2319_v5 = vpop.xlane.xlu0 %2318 }
0x13f1   :  { %4650 = vrcp.f32 %v2319_v5 }
0x13f7   :  { %v4649_v6 = vpop.eup %4648 }
0x13f8   :  { %v2322_v8 = vmul.f32 %v4649_v6, %v4641_v48 }
0x13fb   :  { %v4651_v7 = vpop.eup %4650 }
0x13fc   :  { %v2323_v9 = vmul.f32 %v4651_v7, %v4643_v52 }
0x13fe   :  { %v2324_v10 = vpack.c.bf16 %v2323_v9, %v2322_v8  ;;  %v4488_v9 = vld [vmem:[#allocation22 + $0x20] sm:$0xff]  }
0x1400   :  { %4263 = vmatmul.mubr.msk.bf16.vlgmr.msra.gmra.mrb[48].mxu1 %vm719_vm2, %v2324_v10 }
0x1401   :  { %4274 = vmatprep.mubr.msk.bf16.mxu1 %vm5162_vm0, %v5161_v0 }
0x145f   :  { %v2437_v14 = vpop.xlane.xlu1 %2436 }
0x1460   :  { %4652 = vrcp.f32 %v2437_v14 }
0x1463   :  { %v2440_v15 = vpop.xlane.xlu0 %2439  ;;  %v2448_v17 = vpop.permute.xlu1 %2447 }
0x1464   :  { %4654 = vrcp.f32 %v2440_v15  ;;  %4273 = vmatpush3.bf16.msra.mxu1 %v2448_v17 }
0x1465   :  { %4286 = vmatprep.subr.bf16.mxu1 %v5161_v0 }
0x1467   :  { %v2610_v45 = vpop.permute.xlu0 %2609  ;;  %v2608_v38 = vpop.permute.xlu1 %2607 }
0x1468   :  { %v2615_v37 = vsel %vm671_vm1, %v2610_v45, 0 }
0x146a   :  { %v4653_v18 = vpop.eup %4652 }
0x146b   :  { %v2443_v21 = vmul.f32 %v4653_v18, %v4645_v63 }
0x146e   :  { %v4655_v20 = vpop.eup %4654 }
0x146f   :  { %v2444_v23 = vmul.f32 %v4655_v20, %v4647_v2 }
0x1471   :  { %v2445_v25 = vpack.c.bf16 %v2444_v23, %v2443_v21  ;;  %v4489_v23 = vld [vmem:[#allocation22 + $0x28] sm:$0xff]  }
0x1473   :  { %4275 = vmatmul.mubr.msk.bf16.vlgmr.msra.gmra.mrb[52].mxu1 %vm719_vm2, %v2445_v25 }
0x1474   :  { %4287 = vmatpush3.bf16.msra.mxu1 %v4484_v24  ;;  %4290 = vmatprep.mubr.msk.bf16.mxu1 %vm5162_vm0, %v5161_v0 }
0x1475   :  { %4288 = vmatprep.subr.bf16.mxu1 %v5161_v0 }
0x1478   :  { %4289 = vmatpush3.bf16.msra.mxu1 %v4485_v57 }
0x1479   :  { %4300 = vmatprep.subr.bf16.mxu1 %v5161_v0 }
0x14d3   :  { %v2362_v26 = vpop.f32.mrb[48].mxu1 }
0x14d4   :  { %v4264_v28 = vpop.f32.mrb[49].mxu1 }
0x14d5   :  { %v2365_v29 = vpop.f32.mrb[50].mxu1 }
0x14d6   :  { %v2369_v30 = vpack.c.bf16 %v2365_v29, %v2362_v26  ;;  %v4265_v32 = vpop.f32.mrb[51].mxu1 }
0x14d8   :  { %4291 = vmatmul.mubr.msk.bf16.vlgmr.msra.gmra.mrb[56].mxu1 %vm671_vm1, %v2369_v30 }
0x14d9   :  { %4302 = vmatprep.mubr.msk.bf16.mxu1 %vm5162_vm0, %v5161_v0 }
0x1546   :  { %v2487_v33 = vpop.f32.mrb[52].mxu1 }
0x1547   :  { %v4276_v34 = vpop.f32.mrb[53].mxu1 }
0x1548   :  { %v2490_v50 = vpop.f32.mrb[54].mxu1 }
0x1549   :  { %v2494_v35 = vpack.c.bf16 %v2490_v50, %v2487_v33  ;;  %v4277_v36 = vpop.f32.mrb[55].mxu1 }
0x154b   :  { %4283 = vmatmul.mubr.msk.bf16.vlgmr.msra.gmra.mrb[44].mxu0 %vm671_vm1, %v2494_v35 }
0x154c   :  { %4295 = vmatpush3.bf16.xpose.msra.mxu0 %v2615_v37  ;;  %4296 = vmatprep.mubr.msk.bf16.mxu0 %vm5162_vm0, %v5161_v0 }
0x154d   :  { %4306 = vmatprep.subr.bf16.mxu0 %v5161_v0 }
0x1553   :  { %4297 = vmatmul.mubr.msk.bf16.vlgmr.msra.gmra.mrb[48].mxu0 %vm671_vm1, %v2608_v38 }
0x1554   :  { %4310 = vmatprep.mubr.msk.bf16.mxu0 %vm5162_vm0, %v5161_v0  ;;  %4307 = vmatpush3.bf16.msra.mxu0 %v4488_v9  ;;  %v4500_v9 = vld [vmem:[#allocation23 + $0x14] ss:$8 sps:$4 sm:$0xff]  }
0x1555   :  { %4308 = vmatprep.subr.bf16.mxu0 %v5161_v0 }
0x1558   :  { %4309 = vmatpush3.bf16.msra.mxu0 %v4489_v23 }
0x1559   :  { %4320 = vmatprep.subr.bf16.mxu0 %v5161_v0 }
0x15ab   :  { %v2600_v39 = vpop.f32.mrb[56].mxu1 }
0x15ac   :  { %v4292_v49 = vpop.f32.mrb[57].mxu1 }
0x15ad   :  { %v2603_v40 = vpop.f32.mrb[58].mxu1 }
0x15ae   :  { %v4293_v41 = vpop.f32.mrb[59].mxu1 }
0x161e   :  { %v2544_v42 = vpop.f32.mrb[44].mxu0 }
0x161f   :  { %v5843_v43 = vadd.f32 %v2600_v39, %v2544_v42  ;;  %v4284_v44 = vpop.f32.mrb[45].mxu0 }
0x1620   :  { %v2547_v46 = vpop.f32.mrb[46].mxu0 }
0x1621   :  { %v5845_v47 = vadd.f32 %v2603_v40, %v2547_v46  ;;  %v4285_v48 = vpop.f32.mrb[47].mxu0  ;;  %v4490_v46 = vld [vmem:[#allocation22 + $0x30] sm:$0xff]  }
0x1626   :  { %v2651_v51 = vpop.f32.mrb[48].mxu0 }
0x1627   :  { %v2652_v52 = vadd.f32 %v5799_v27, %v2651_v51  ;;  %v4298_v53 = vpop.f32.mrb[49].mxu0 }
0x1628   :  { %v2654_v54 = vpop.f32.mrb[50].mxu0 }
0x1629   :  { %v2655_v55 = vadd.f32 %v5802_v19, %v2654_v54  ;;  %v4299_v56 = vpop.f32.mrb[51].mxu0  ;;  %v2658_v58 = vsel %vm719_vm2, %v2652_v52, -inf }
0x162a   :  { %2659 = vmax.xlane.f32.xlu1 %v2658_v58 }
0x162b   :  { %v2661_v60 = vsel %vm719_vm2, %v2655_v55, -inf }
0x162c   :  { %2662 = vmax.xlane.f32.xlu0 %v2661_v60 }
0x16b7   :  { %v2660_v62 = vpop.xlane.xlu1 %2659 }
0x16b8   :  { %v2664_v63 = vsub.f32 %v2652_v52, %v2660_v62 }
0x16b9   :  { %v2663_v1 = vpop.xlane.xlu0 %2662 }
0x16ba   :  { %v2666_v2 = vmul.f32 1.442695, %v2664_v63  ;;  %v2665_v3 = vsub.f32 %v2655_v55, %v2663_v1 }
0x16bc   :  { %4656 = vpow2.f32 %v2666_v2  ;;  %v2668_v4 = vmul.f32 1.442695, %v2665_v3 }
0x16be   :  { %4658 = vpow2.f32 %v2668_v4 }
0x16c6   :  { %v4657_v5 = vpop.eup %4656 }
0x16c7   :  { %v2670_v6 = vsel %vm719_vm2, %v4657_v5, 0.0 }
0x16c8   :  { %v4659_v7 = vpop.eup %4658  ;;  %2671 = vadd.xlane.f32.xlu0 %v2670_v6  ;;  %v4494_v6 = vld [vmem:[#allocation23 + $0x4] ss:$8 sps:$4 sm:$0xff]  }
0x16c9   :  { %v2673_v8 = vsel %vm719_vm2, %v4659_v7, 0.0 }
0x16ca   :  { %2674 = vadd.xlane.f32.xlu1 %v2673_v8  ;;  %v4497_v8 = vld [vmem:[#allocation25 + $0x4] ss:$8 sps:$4 sm:$0xff]  }
0x16db   :  { %2789 = vrot.lane.b32.xlu1 %v5777_v13, %s5164_s7 }
0x16de   :  { %2681 = vrot.lane.b32.xlu0 %v5790_v22, %s5145_s5 }
0x16df   :  { %2787 = vrot.lane.b32.xlu1 %v5775_v61, %s5164_s7 }
0x1755   :  { %v2672_v10 = vpop.xlane.xlu0 %2671 }
0x1756   :  { %4660 = vrcp.f32 %v2672_v10  ;;  %v4503_v10 = vld [vmem:[#allocation25 + $0x14] ss:$8 sps:$4 sm:$0xff]  }
0x1757   :  { %v2675_v11 = vpop.xlane.xlu1 %2674 }
0x1758   :  { %4662 = vrcp.f32 %v2675_v11  ;;  %v4498_v11 = vld [vmem:[#allocation23 + $0x10] ss:$8 sps:$4 sm:$0xff]  }
0x1759   :  { %v2682_v12 = vpop.permute.xlu0 %2681 }
0x175a   :  { %4301 = vmatpush3.bf16.msra.mxu1 %v2682_v12  ;;  %v4501_v12 = vld [vmem:[#allocation25 + $0x10] ss:$8 sps:$4 sm:$0xff]  }
0x175b   :  { %4314 = vmatprep.subr.bf16.mxu1 %v5161_v0  ;;  %v2790_v18 = vpop.permute.xlu1 %2789 }
0x175c   :  { %v2795_v61 = vsel %vm671_vm1, %v2790_v18, 0 }
0x175f   :  { %v2788_v21 = vpop.permute.xlu1 %2787 }
0x1760   :  { %v4661_v14 = vpop.eup %4660 }
0x1761   :  { %v2678_v15 = vmul.f32 %v4661_v14, %v4657_v5  ;;  %v4492_v5 = vld [vmem:[#allocation23] ss:$8 sps:$4 sm:$0xff]  }
0x1762   :  { %v4663_v13 = vpop.eup %4662 }
0x1763   :  { %v2679_v17 = vmul.f32 %v4663_v13, %v4659_v7  ;;  %v4495_v7 = vld [vmem:[#allocation25] ss:$8 sps:$4 sm:$0xff]  }
0x1765   :  { %v2680_v20 = vpack.c.bf16 %v2679_v17, %v2678_v15 }
0x1767   :  { %4303 = vmatmul.mubr.msk.bf16.vlgmr.msra.gmra.mrb[60].mxu1 %vm719_vm2, %v2680_v20 }
0x1768   :  { %4315 = vmatpush3.bf16.xpose.msra.mxu1 %v2795_v61  ;;  %4316 = vmatprep.mubr.msk.bf16.mxu1 %vm5162_vm0, %v5161_v0 }
0x1769   :  { %4326 = vmatprep.subr.bf16.mxu1 %v5161_v0 }
0x176f   :  { %4317 = vmatmul.mubr.msk.bf16.vlgmr.msra.gmra.mrb[64].mxu1 %vm671_vm1, %v2788_v21 }
0x1770   :  { %4330 = vmatprep.mubr.msk.bf16.mxu1 %vm5162_vm0, %v5161_v0  ;;  %4327 = vmatpush3.bf16.msra.mxu1 %v4490_v46 }
0x1771   :  { %4328 = vmatprep.subr.bf16.mxu1 %v5161_v0 }
0x183a   :  { %v2721_v24 = vpop.f32.mrb[60].mxu1 }
0x183b   :  { %v4304_v25 = vpop.f32.mrb[61].mxu1 }
0x183c   :  { %v2724_v57 = vpop.f32.mrb[62].mxu1  ;;  %v4506_v25 = vld [vmem:[#allocation23 + $0x24] ss:$8 sps:$4 sm:$0xff]  }
0x183d   :  { %v2728_v26 = vpack.c.bf16 %v2724_v57, %v2721_v24  ;;  %v4305_v28 = vpop.f32.mrb[63].mxu1  ;;  %v4509_v57 = vld [vmem:[#allocation25 + $0x24] ss:$8 sps:$4 sm:$0xff]  }
0x183e   :  { %v4507_v28 = vld [vmem:[#allocation25 + $0x20] ss:$8 sps:$4 sm:$0xff]  }
0x183f   :  { %4311 = vmatmul.mubr.msk.bf16.vlgmr.msra.gmra.mrb[52].mxu0 %vm671_vm1, %v2728_v26  ;;  %v4504_v26 = vld [vmem:[#allocation23 + $0x20] ss:$8 sps:$4 sm:$0xff]  }
0x1840   :  { %4322 = vmatprep.mubr.msk.bf16.mxu0 %vm5162_vm0, %v5161_v0  ;;  %v4491_v0 = vld [vmem:[#allocation22 + $0x38] sm:$0xff]  }
0x1841   :  { %4329 = vmatpush3.bf16.msra.mxu1 %v4491_v0  ;;  %v4541_v0 = vld [vmem:[#allocation26] sm:$0xff]  }
0x1842   :  { %v2831_v29 = vpop.f32.mrb[64].mxu1  ;;  %3228 = vmatprep.subr.bf16.mxu1 %v4497_v8  ;;  %v4551_v8 = vld [vmem:[#allocation26 + $0x28] sm:$0xff]  }
0x1843   :  { %v2832_v30 = vadd.f32 %v5799_v27, %v2831_v29  ;;  %v4318_v32 = vpop.f32.mrb[65].mxu1  ;;  %v4515_v29 = vld [vmem:[#allocation25 + $0x34] ss:$8 sps:$4 sm:$0xff]  }
0x1844   :  { %v2834_v33 = vpop.f32.mrb[66].mxu1  ;;  %v4516_v32 = vld [vmem:[#allocation23 + $0x40] ss:$8 sps:$4 sm:$0xff]  }
0x1845   :  { %v2835_v34 = vadd.f32 %v5802_v19, %v2834_v33  ;;  %v4319_v45 = vpop.f32.mrb[67].mxu1  ;;  %v2838_v50 = vsel %vm719_vm2, %v2832_v30, -inf  ;;  %v4518_v33 = vld [vmem:[#allocation23 + $0x44] ss:$8 sps:$4 sm:$0xff]  }
0x1846   :  { %2839 = vmax.xlane.f32.xlu1 %v2838_v50  ;;  %v4521_v45 = vld [vmem:[#allocation25 + $0x44] ss:$8 sps:$4 sm:$0xff]   ;;  %v4524_v50 = vld [vmem:[#allocation23 + $0x54] ss:$8 sps:$4 sm:$0xff]  }
0x1847   :  { %v2841_v35 = vsel %vm719_vm2, %v2835_v34, -inf }
0x1848   :  { %2842 = vmax.xlane.f32.xlu0 %v2841_v35  ;;  %v4527_v35 = vld [vmem:[#allocation25 + $0x54] ss:$8 sps:$4 sm:$0xff]  }
0x1857   :  { %2861 = vrot.lane.b32.xlu1 %v5790_v22, %s5164_s7 }
0x18d3   :  { %v2840_v36 = vpop.xlane.xlu1 %2839 }
0x18d4   :  { %v2844_v37 = vsub.f32 %v2832_v30, %v2840_v36  ;;  %v4513_v30 = vld [vmem:[#allocation25 + $0x30] ss:$8 sps:$4 sm:$0xff]  }
0x18d5   :  { %v2843_v38 = vpop.xlane.xlu0 %2842  ;;  %v4522_v36 = vld [vmem:[#allocation23 + $0x50] ss:$8 sps:$4 sm:$0xff]  }
0x18d6   :  { %v2846_v39 = vmul.f32 1.442695, %v2844_v37  ;;  %v2845_v49 = vsub.f32 %v2835_v34, %v2843_v38  ;;  %v4519_v34 = vld [vmem:[#allocation25 + $0x40] ss:$8 sps:$4 sm:$0xff]   ;;  %v4525_v37 = vld [vmem:[#allocation25 + $0x50] ss:$8 sps:$4 sm:$0xff]  }
0x18d7   :  { %v2862_v27 = vpop.permute.xlu1 %2861  ;;  %v4530_v38 = vld [vmem:[#allocation23 + $0x64] ss:$8 sps:$4 sm:$0xff]  }
0x18d8   :  { %4664 = vpow2.f32 %v2846_v39  ;;  %v2848_v40 = vmul.f32 1.442695, %v2845_v49  ;;  %4321 = vmatpush3.bf16.msra.mxu0 %v2862_v27  ;;  %v4533_v39 = vld [vmem:[#allocation25 + $0x64] ss:$8 sps:$4 sm:$0xff]   ;;  %v4528_v49 = vld [vmem:[#allocation23 + $0x60] ss:$8 sps:$4 sm:$0xff]  }
0x18d9   :  { %3089 = vmatprep.subr.bf16.mxu0 %v4494_v6  ;;  %v4531_v27 = vld [vmem:[#allocation25 + $0x60] ss:$8 sps:$4 sm:$0xff]  }
0x18da   :  { %4666 = vpow2.f32 %v2848_v40  ;;  %v4536_v40 = vld [vmem:[#allocation23 + $0x74] ss:$8 sps:$4 sm:$0xff]   ;;  %v4548_v6 = vld [vmem:[#allocation26 + $0x60] sm:$0xff]  }
0x18e2   :  { %v4665_v19 = vpop.eup %4664 }
0x18e3   :  { %v2850_v41 = vsel %vm719_vm2, %v4665_v19, 0.0 }
0x18e4   :  { %v4667_v42 = vpop.eup %4666  ;;  %2851 = vadd.xlane.f32.xlu0 %v2850_v41  ;;  %v4534_v41 = vld [vmem:[#allocation23 + $0x70] ss:$8 sps:$4 sm:$0xff]  }
0x18e5   :  { %v2853_v44 = vsel %vm719_vm2, %v4667_v42, 0.0 }
0x18e8   :  { %2854 = vadd.xlane.f32.xlu0 %v2853_v44 }
0x1912   :  { %v2778_v22 = vpop.f32.mrb[52].mxu0 }
0x1913   :  { %v2785_v48 = vadd.f32 %v2778_v22, %v5843_v43  ;;  %v4312_v51 = vpop.f32.mrb[53].mxu0 }
0x1914   :  { %v2781_v52 = vpop.f32.mrb[54].mxu0 }
0x1915   :  { %v2786_v53 = vadd.f32 %v2781_v52, %v5845_v47  ;;  %v4313_v54 = vpop.f32.mrb[55].mxu0 }
0x1971   :  { %v2852_v55 = vpop.xlane.xlu0 %2851 }
0x1972   :  { %4668 = vrcp.f32 %v2852_v55 }
0x1975   :  { %v2855_v56 = vpop.xlane.xlu0 %2854 }
0x1976   :  { %4670 = vrcp.f32 %v2855_v56  ;;  %v3830_v56 = vld [vmem:[%s5955_s19] ss:$0 sm:$0xff] }
0x197c   :  { %v4669_v58 = vpop.eup %4668 }
0x197d   :  { %v2858_v62 = vmul.f32 %v4669_v58, %v4665_v19  ;;  %v4539_v19 = vld [vmem:[#allocation25 + $0x74] ss:$8 sps:$4 sm:$0xff]  }
0x1980   :  { %v4671_v60 = vpop.eup %4670 }
0x1981   :  { %v2859_v63 = vmul.f32 %v4671_v60, %v4667_v42  ;;  %v4537_v42 = vld [vmem:[#allocation25 + $0x70] ss:$8 sps:$4 sm:$0xff]  }
0x1983   :  { %v2860_v1 = vpack.c.bf16 %v2859_v63, %v2858_v62 }
0x1985   :  { %4323 = vmatmul.mubr.msk.bf16.vlgmr.msra.gmra.mrb[56].mxu0 %vm719_vm2, %v2860_v1  ;;  %v4540_v1 = vld [vmem:[#allocation26 + $0x40] sm:$0xff]  }
0x1986   :  { %3121 = vmatprep.mubr.bf16.mxu0 %v5165_v59  ;;  %3090 = vmatpush1.bf16.msra.mxu0 %v4492_v5  ;;  %v4547_v5 = vld [vmem:[#allocation26 + $0x18] sm:$0xff]  }
0x1987   :  { %3091 = vmatprep.subr.bf16.mxu0 %v4500_v9  ;;  %v4552_v9 = vld [vmem:[#allocation26 + $0x70] sm:$0xff]  }
0x198a   :  { %3092 = vmatpush1.bf16.msra.mxu0 %v4498_v11  ;;  %v4554_v11 = vld [vmem:[#allocation26 + $0x78] sm:$0xff]  }
0x198b   :  { %3093 = vmatprep.subr.bf16.mxu0 %v4506_v25 }
0x198e   :  { %3094 = vmatpush1.bf16.msra.mxu0 %v4504_v26 }
0x1a58   :  { %v2901_v43 = vpop.f32.mrb[56].mxu0 }
0x1a59   :  { %v4324_v2 = vpop.f32.mrb[57].mxu0 }
0x1a5a   :  { %v2904_v3 = vpop.f32.mrb[58].mxu0  ;;  %v4543_v2 = vld [vmem:[#allocation26 + $0x8] sm:$0xff]  }
0x1a5b   :  { %v2908_v47 = vpack.c.bf16 %v2904_v3, %v2901_v43  ;;  %v4325_v4 = vpop.f32.mrb[59].mxu0  ;;  %v4542_v43 = vld [vmem:[#allocation26 + $0x48] sm:$0xff]   ;;  %v4544_v3 = vld [vmem:[#allocation26 + $0x50] sm:$0xff]  }
0x1a5c   :  { %v4546_v4 = vld [vmem:[#allocation26 + $0x58] sm:$0xff]  }
0x1a5d   :  { %4331 = vmatmul.mubr.msk.bf16.vlgmr.msra.gmra.mrb[68].mxu1 %vm671_vm1, %v2908_v47  ;;  %v4545_v47 = vld [vmem:[#allocation26 + $0x10] sm:$0xff]  }
0x1a5e   :  { %3260 = vmatprep.mubr.bf16.mxu1 %v5165_v59  ;;  %3229 = vmatpush1.bf16.msra.mxu1 %v4495_v7  ;;  %v4549_v7 = vld [vmem:[#allocation26 + $0x20] sm:$0xff]  }
0x1a5f   :  { %3230 = vmatprep.subr.bf16.mxu1 %v4503_v10  ;;  %v4553_v10 = vld [vmem:[#allocation26 + $0x30] sm:$0xff]  }
0x1a62   :  { %3231 = vmatpush1.bf16.msra.mxu1 %v4501_v12  ;;  %v4555_v12 = vld [vmem:[#allocation26 + $0x38] sm:$0xff]  }
0x1a63   :  { %3232 = vmatprep.subr.bf16.mxu1 %v4509_v57 }
0x1a66   :  { %3233 = vmatpush1.bf16.msra.mxu1 %v4507_v28 }
0x1a67   :  { %3234 = vmatprep.subr.bf16.mxu1 %v4515_v29 }
0x1a6a   :  { %3235 = vmatpush1.bf16.msra.mxu1 %v4513_v30 }
0x1a6b   :  { %3236 = vmatprep.subr.bf16.mxu1 %v4521_v45 }
0x1a6e   :  { %3237 = vmatpush1.bf16.msra.mxu1 %v4519_v34 }
0x1a6f   :  { %3238 = vmatprep.subr.bf16.mxu1 %v4527_v35 }
0x1a72   :  { %3239 = vmatpush1.bf16.msra.mxu1 %v4525_v37 }
0x1a73   :  { %3240 = vmatprep.subr.bf16.mxu1 %v4533_v39 }
0x1a76   :  { %3241 = vmatpush1.bf16.msra.mxu1 %v4531_v27 }
0x1a77   :  { %3242 = vmatprep.subr.bf16.mxu1 %v4539_v19 }
0x1a7a   :  { %3243 = vmatpush1.bf16.msra.mxu1 %v4537_v42 }
0x1b30   :  { %v2958_v14 = vpop.f32.mrb[68].mxu1 }
0x1b31   :  { %v2965_v13 = vadd.f32 %v2958_v14, %v2785_v48  ;;  %v4332_v15 = vpop.f32.mrb[69].mxu1 }
0x1b32   :  { %v2961_v17 = vpop.f32.mrb[70].mxu1 }
0x1b33   :  { %v5889_v18 = vadd.f32 %v2965_v13, %v5733_v16  ;;  %v2966_v20 = vadd.f32 %v2961_v17, %v2786_v53  ;;  %v4333_v61 = vpop.f32.mrb[71].mxu1  ;;  %v4512_v16 = vld [vmem:[#allocation23 + $0x34] ss:$8 sps:$4 sm:$0xff]  }
0x1b34   :  { %3095 = vmatprep.subr.bf16.mxu0 %v4512_v16 }
0x1b35   :  { %v5892_v21 = vadd.f32 %v2966_v20, %v5737_v31  ;;  %v2970_v23 = vmul.f32 %v5889_v18, %v5889_v18  ;;  %v4510_v31 = vld [vmem:[#allocation23 + $0x30] ss:$8 sps:$4 sm:$0xff]  }
0x1b36   :  { %3096 = vmatpush1.bf16.msra.mxu0 %v4510_v31 }
0x1b37   :  { %2972 = vadd.xlane.f32.xlu0 %v2970_v23  ;;  %v2971_v24 = vmul.f32 %v5892_v21, %v5892_v21  ;;  %3097 = vmatprep.subr.bf16.mxu0 %v4518_v33 }
0x1b3a   :  { %3098 = vmatpush1.bf16.msra.mxu0 %v4516_v32 }
0x1b3b   :  { %2974 = vadd.xlane.f32.xlu0 %v2971_v24  ;;  %3099 = vmatprep.subr.bf16.mxu0 %v4524_v50 }
0x1b3e   :  { %3100 = vmatpush1.bf16.msra.mxu0 %v4522_v36 }
0x1b3f   :  { %3101 = vmatprep.subr.bf16.mxu0 %v4530_v38 }
0x1b42   :  { %3102 = vmatpush1.bf16.msra.mxu0 %v4528_v49 }
0x1b43   :  { %3103 = vmatprep.subr.bf16.mxu0 %v4536_v40 }
0x1b46   :  { %3104 = vmatpush1.bf16.msra.mxu0 %v4534_v41 }
0x1b47   :  { %4032 = vmatprep.subr.bf16.mxu0 %v4540_v1 }
0x1bc4   :  { %v2973_v44 = vpop.xlane.xlu0 %2972 }
0x1bc5   :  { %v2976_v46 = vmul.f32 0.0078125, %v2973_v44 }
0x1bc7   :  { %v2978_v22 = vadd.f32 1e-06, %v2976_v46 }
0x1bc8   :  { %v2975_v48 = vpop.xlane.xlu0 %2974 }
0x1bc9   :  { %4672 = vrsqrt.f32 %v2978_v22  ;;  %v2977_v51 = vmul.f32 0.0078125, %v2975_v48  ;;  %v4556_v22 = vld [vmem:[#allocation28] ss:$8 sps:$4 sm:$0xff]   ;;  %v4558_v48 = vld [vmem:[#allocation28 + $0x4] ss:$8 sps:$4 sm:$0xff]  }
0x1bca   :  { %3599 = vmatprep.subr.bf16.mxu1 %v4558_v48 }
0x1bcb   :  { %v2979_v52 = vadd.f32 1e-06, %v2977_v51  ;;  %v4561_v51 = vld [vmem:[#allocation28 + $0x14] ss:$8 sps:$4 sm:$0xff]  }
0x1bcd   :  { %4674 = vrsqrt.f32 %v2979_v52  ;;  %v4559_v52 = vld [vmem:[#allocation28 + $0x10] ss:$8 sps:$4 sm:$0xff]  }
0x1bd3   :  { %v4673_v53 = vpop.eup %4672 }
0x1bd4   :  { %v2982_v54 = vmul.f32 %v4673_v53, %v5889_v18 }
0x1bd6   :  { %v2990_v60 = vmul.f32 %v3830_v56, %v2982_v54 }
0x1bd7   :  { %v4675_v55 = vpop.eup %4674 }
0x1bd8   :  { %v2983_v58 = vmul.f32 %v4675_v55, %v5892_v21 }
0x1bda   :  { %v2991_v62 = vmul.f32 %v3830_v56, %v2983_v58 }
0x1bdc   :  { %v2992_v63 = vpack.c.bf16 %v2991_v62, %v2990_v60 }
0x1bde   :  { %3122 = vmatmul.mubr.bf16.vlgmr.msra.gmra.mrb[60].mxu0 %v2992_v63  ;;  %3261 = vmatmul.mubr.bf16.vlgmr.msra.gmra.mrb[72].mxu1 %v2992_v63 }
0x1bdf   :  { %3631 = vmatprep.mubr.bf16.mxu1 %v5165_v59  ;;  %4033 = vmatpush3.bf16.msra.mxu0 %v4541_v0  ;;  %v4550_v59 = vld [vmem:[#allocation26 + $0x68] sm:$0xff]  }
0x1be0   :  { %4034 = vmatprep.subr.bf16.mxu0 %v4542_v43  ;;  %3600 = vmatpush1.bf16.msra.mxu1 %v4556_v22  ;;  %v4564_v43 = vld [vmem:[#allocation28 + $0x24] ss:$8 sps:$4 sm:$0xff]  }
0x1be1   :  { %3601 = vmatprep.subr.bf16.mxu1 %v4561_v51 }
0x1be3   :  { %4035 = vmatpush3.bf16.msra.mxu0 %v4543_v2  ;;  %v4562_v2 = vld [vmem:[#allocation28 + $0x20] ss:$8 sps:$4 sm:$0xff]  }
0x1be4   :  { %4036 = vmatprep.subr.bf16.mxu0 %v4544_v3  ;;  %3602 = vmatpush1.bf16.msra.mxu1 %v4559_v52  ;;  %v4567_v3 = vld [vmem:[#allocation28 + $0x34] ss:$8 sps:$4 sm:$0xff]  }
0x1be5   :  { %3603 = vmatprep.subr.bf16.mxu1 %v4564_v43 }
0x1be7   :  { %4037 = vmatpush3.bf16.msra.mxu0 %v4545_v47  ;;  %v4565_v47 = vld [vmem:[#allocation28 + $0x30] ss:$8 sps:$4 sm:$0xff]  }
0x1be8   :  { %4038 = vmatprep.subr.bf16.mxu0 %v4546_v4  ;;  %3604 = vmatpush1.bf16.msra.mxu1 %v4562_v2  ;;  %v4568_v4 = vld [vmem:[#allocation28 + $0x40] ss:$8 sps:$4 sm:$0xff]  }
0x1be9   :  { %3605 = vmatprep.subr.bf16.mxu1 %v4567_v3 }
0x1beb   :  { %4039 = vmatpush3.bf16.msra.mxu0 %v4547_v5  ;;  %v4570_v5 = vld [vmem:[#allocation28 + $0x44] ss:$8 sps:$4 sm:$0xff]  }
0x1bec   :  { %4040 = vmatprep.subr.bf16.mxu0 %v4548_v6  ;;  %3606 = vmatpush1.bf16.msra.mxu1 %v4565_v47  ;;  %v4571_v6 = vld [vmem:[#allocation28 + $0x50] ss:$8 sps:$4 sm:$0xff]  }
0x1bed   :  { %3607 = vmatprep.subr.bf16.mxu1 %v4570_v5 }
0x1bef   :  { %4041 = vmatpush3.bf16.msra.mxu0 %v4549_v7  ;;  %v4574_v7 = vld [vmem:[#allocation28 + $0x60] ss:$8 sps:$4 sm:$0xff]  }
0x1bf0   :  { %4042 = vmatprep.subr.bf16.mxu0 %v4550_v59  ;;  %3608 = vmatpush1.bf16.msra.mxu1 %v4568_v4  ;;  %v4579_v59 = vld [vmem:[#allocation28 + $0x74] ss:$8 sps:$4 sm:$0xff]  }
0x1bf3   :  { %4043 = vmatpush3.bf16.msra.mxu0 %v4551_v8  ;;  %v4577_v8 = vld [vmem:[#allocation28 + $0x70] ss:$8 sps:$4 sm:$0xff]  }
0x1bf4   :  { %4044 = vmatprep.subr.bf16.mxu0 %v4552_v9 }
0x1bf7   :  { %4045 = vmatpush3.bf16.msra.mxu0 %v4553_v10 }
0x1bf8   :  { %4046 = vmatprep.subr.bf16.mxu0 %v4554_v11 }
0x1bfb   :  { %4047 = vmatpush3.bf16.msra.mxu0 %v4555_v12 }
0x1cb1   :  { %v3123_v14 = vpop.f32.mrb[60].mxu0  ;;  %v3262_v13 = vpop.f32.mrb[72].mxu1 }
0x1cb2   :  { %v3863_v15 = vmul.f32 -1.442695, %v3123_v14  ;;  %v3125_v17 = vpop.f32.mrb[61].mxu0  ;;  %v3264_v20 = vpop.f32.mrb[73].mxu1 }
0x1cb3   :  { %v3864_v61 = vmul.f32 -1.442695, %v3125_v17  ;;  %v3127_v23 = vpop.f32.mrb[62].mxu0  ;;  %v3266_v24 = vpop.f32.mrb[74].mxu1 }
0x1cb4   :  { %4676 = vpow2.f32 %v3863_v15  ;;  %v3865_v25 = vmul.f32 -1.442695, %v3127_v23  ;;  %v3129_v57 = vpop.f32.mrb[63].mxu0  ;;  %v3268_v26 = vpop.f32.mrb[75].mxu1 }
0x1cb5   :  { %4678 = vpow2.f32 %v3864_v61  ;;  %v3866_v28 = vmul.f32 -1.442695, %v3129_v57  ;;  %v3883_v61 = vld [vmem:[%s5995_s22] ss:$0 sm:$0xff] }
0x1cb6   :  { %4680 = vpow2.f32 %v3865_v25 }
0x1cb7   :  { %4682 = vpow2.f32 %v3866_v28 }
0x1cbe   :  { %v4677_v16 = vpop.eup %4676 }
0x1cbf   :  { %v4679_v29 = vpop.eup %4678  ;;  %v3283_v31 = vadd.f32 1.0, %v4677_v16 }
0x1cc0   :  { %v4681_v30 = vpop.eup %4680  ;;  %v3284_v32 = vadd.f32 1.0, %v4679_v29 }
0x1cc1   :  { %v4683_v33 = vpop.eup %4682  ;;  %4684 = vrcp.f32 %v3283_v31  ;;  %v3285_v34 = vadd.f32 1.0, %v4681_v30 }
0x1cc2   :  { %4686 = vrcp.f32 %v3284_v32  ;;  %v3286_v45 = vadd.f32 1.0, %v4683_v33 }
0x1cc3   :  { %4688 = vrcp.f32 %v3285_v34 }
0x1cc4   :  { %4690 = vrcp.f32 %v3286_v45 }
0x1ccb   :  { %v4685_v50 = vpop.eup %4684 }
0x1ccc   :  { %v4687_v35 = vpop.eup %4686  ;;  %v3295_v36 = vmul.f32 %v4685_v50, %v3123_v14 }
0x1ccd   :  { %v4689_v37 = vpop.eup %4688  ;;  %v3296_v38 = vmul.f32 %v4687_v35, %v3125_v17 }
0x1cce   :  { %v4691_v39 = vpop.eup %4690  ;;  %v3299_v49 = vmul.f32 %v3295_v36, %v3262_v13  ;;  %v3297_v27 = vmul.f32 %v4689_v37, %v3127_v23 }
0x1ccf   :  { %v3300_v40 = vmul.f32 %v3296_v38, %v3264_v20  ;;  %v3298_v19 = vmul.f32 %v4691_v39, %v3129_v57 }
0x1cd0   :  { %v3301_v41 = vmul.f32 %v3297_v27, %v3266_v24 }
0x1cd1   :  { %v3302_v42 = vmul.f32 %v3298_v19, %v3268_v26 }
0x1cd2   :  { %v3303_v44 = vpack.c.bf16 %v3301_v41, %v3299_v49 }
0x1cd3   :  { %v3304_v46 = vpack.c.bf16 %v3302_v42, %v3300_v40 }
0x1cd5   :  { %3465 = vmatprep.mubr.bf16.mxu0 %v3304_v46 }
0x1cd6   :  { %3466 = vmatmul.mubr.bf16.vlgmr.msra.gmra.mrb[64].mxu0 %v3303_v44 }
0x1da9   :  { %v4048_v53 = vpop.f32.mrb[64].mxu0 }
0x1daa   :  { %v4049_v54 = vpop.f32.mrb[65].mxu0 }
0x1dab   :  { %v4050_v55 = vadd.f32 %v4049_v54, %v4048_v53  ;;  %v4051_v56 = vpop.f32.mrb[66].mxu0 }
0x1dac   :  { %v4052_v58 = vpop.f32.mrb[67].mxu0 }
0x1dad   :  { %v3474_v60 = vadd.f32 %v4050_v55, %v5889_v18  ;;  %v4053_v62 = vadd.f32 %v4052_v58, %v4051_v56  ;;  %v4573_v18 = vld [vmem:[#allocation28 + $0x54] ss:$8 sps:$4 sm:$0xff]  }
0x1dae   :  { %3609 = vmatprep.subr.bf16.mxu1 %v4573_v18 }
0x1daf   :  { %3477 = vst [vmem:[#allocation29 + $0x20] sm:$0xff] %v3474_v60  ;;  %v3475_v63 = vadd.f32 %v4053_v62, %v5892_v21  ;;  %v3480_v1 = vmul.f32 %v3474_v60, %v3474_v60  ;;  %v4576_v21 = vld [vmem:[#allocation28 + $0x64] ss:$8 sps:$4 sm:$0xff]   ;;  %3610 = vmatpush1.bf16.msra.mxu1 %v4571_v6 }
0x1db0   :  { %3611 = vmatprep.subr.bf16.mxu1 %v4576_v21 }
0x1db1   :  { %3478 = vst [vmem:[#allocation29 + $0x28] sm:$0xff] %v3475_v63  ;;  %3482 = vadd.xlane.f32.xlu0 %v3480_v1  ;;  %v3481_v0 = vmul.f32 %v3475_v63, %v3475_v63 }
0x1db3   :  { %3612 = vmatpush1.bf16.msra.mxu1 %v4574_v7 }
0x1db4   :  { %3613 = vmatprep.subr.bf16.mxu1 %v4579_v59 }
0x1db5   :  { %3484 = vadd.xlane.f32.xlu0 %v3481_v0 }
0x1db7   :  { %3614 = vmatpush1.bf16.msra.mxu1 %v4577_v8 }
0x1e3e   :  { %v3483_v9 = vpop.xlane.xlu0 %3482 }
0x1e3f   :  { %v3486_v10 = vmul.f32 0.0078125, %v3483_v9 }
0x1e41   :  { %v3488_v11 = vadd.f32 1e-06, %v3486_v10 }
0x1e42   :  { %v3485_v12 = vpop.xlane.xlu0 %3484 }
0x1e43   :  { %4692 = vrsqrt.f32 %v3488_v11  ;;  %v3487_v14 = vmul.f32 0.0078125, %v3485_v12 }
0x1e45   :  { %v3489_v13 = vadd.f32 1e-06, %v3487_v14 }
0x1e47   :  { %4694 = vrsqrt.f32 %v3489_v13 }
0x1e4d   :  { %v4693_v15 = vpop.eup %4692 }
0x1e4e   :  { %v3492_v17 = vmul.f32 %v4693_v15, %v3474_v60 }
0x1e50   :  { %v3500_v24 = vmul.f32 %v3883_v61, %v3492_v17 }
0x1e51   :  { %v4695_v20 = vpop.eup %4694 }
0x1e52   :  { %v3493_v23 = vmul.f32 %v4695_v20, %v3475_v63 }
0x1e54   :  { %v3501_v25 = vmul.f32 %v3883_v61, %v3493_v23 }
0x1e56   :  { %v3502_v57 = vpack.c.bf16 %v3501_v25, %v3500_v24 }
0x1e58   :  { %3632 = vmatmul.mubr.bf16.vlgmr.msra.gmra.mrb[76].mxu1 %v3502_v57 }
0x1e59   :  { %5085 = shalt.err (!%p5082_p0)
}
0x1e5a   :  { %s5996_s26 = sld [smem:[#allocation52_spill]] }
0x1e60   :  { %s5086_s17 = scalar_lea.hbm %s5996_s26, 768 }
0x1e61   :  { %p5087_p1 = scmp.ne.s32.totalorder %s5996_s26, %s5086_s17  ;;  %p5090_p2 = scmp.lt.u32.totalorder %s5086_s17, %s5996_s26 }
0x1e63   :  { %p5092_p3 = pnand %p5090_p2, %p5087_p1 }
0x1e65   :  { %5095 = shalt.err (!%p5092_p3)
}
0x1e66   :  { %3657 = dma.vmem_to_hbm [thread:$0]  %s3652_s6, 768, %s5996_s26, [#allocation4], %s5990_s24, %s5990_s24, %s5989_s4  }
0x1e67   :  { %s5167_s25 = smov [#allocation30]  }
0x1e68   :  { %s3663_s16 = sshll.u32 %s5167_s25, 4  ;;  %s3664_s16 = int_to_ptr.vmem [resolvable:$true] %s3663_s16 }
0x1e69   :  { %s5096_s30 = scalar_lea.vmem %s3664_s16, 512  ;;  %p5101_p5 = scmp.lt.s32.totalorder %s3664_s16, %s3664_s16 }
0x1e6a   :  { %p5097_p4 = scmp.ne.s32.totalorder %s3664_s16, %s5096_s30  ;;  %p5102_p6 = scmp.lt.s32.totalorder %s5096_s30, %s5096_s30 }
0x1e6c   :  { %p5103_p7 = por %p5102_p6, %p5101_p5 }
0x1e6e   :  { %p5104_p8 = pnand %p5103_p7, %p5097_p4 }
0x1f2b   :  { %v3633_v26 = vpop.f32.mrb[76].mxu1 }
0x1f2c   :  { %3642 = vst [vmem:[#allocation30] sm:$0xff] %v3633_v26  ;;  %v3635_v28 = vpop.f32.mrb[77].mxu1 }
0x1f2d   :  { %3643 = vst [vmem:[#allocation30 + $0x8] sm:$0xff] %v3635_v28  ;;  %v3637_v16 = vpop.f32.mrb[78].mxu1 }
0x1f2e   :  { %3644 = vst [vmem:[#allocation30 + $0x10] sm:$0xff] %v3637_v16  ;;  %v3639_v29 = vpop.f32.mrb[79].mxu1 }
0x1f2f   :  { %3645 = vst [vmem:[#allocation30 + $0x18] sm:$0xff] %v3639_v29 }
0x1f30   :  { %5107 = shalt.err (!%p5104_p8)
}
0x1f31   :  { %s5997_s24 = sld [smem:[#allocation53_spill]] }
0x1f37   :  { %s5108_s13 = scalar_lea.hbm %s5997_s24, 512 }
0x1f38   :  { %p5109_p9 = scmp.ne.s32.totalorder %s5997_s24, %s5108_s13  ;;  %p5112_p10 = scmp.lt.u32.totalorder %s5108_s13, %s5997_s24 }
0x1f3a   :  { %p5114_p11 = pnand %p5112_p10, %p5109_p9 }
0x1f3c   :  { %5117 = shalt.err (!%p5114_p11)
}
0x1f3d   :  { %s5168_s10 = smov 256   ;;  %s5169_s11 = smov 16  }
0x1f3e   :  { %3669 = dma.vmem_to_hbm [thread:$0]  %s3664_s16, 512, %s5997_s24, [#allocation31], %s5168_s10, %s5168_s10, %s5169_s11  }
0x1f3f   :  { %5136 = dma.done.wait [#allocation4], 768  }
0x1f40   :  { %5137 = vsyncadd [#allocation4], 4294966528 }
0x1f41   :  { %5138 = dma.done.wait [#allocation31], 512  }
0x1f42   :  { %5139 = vsyncadd [#allocation31], 4294966784 }
0x1f43   :  { %3676 = vsyncpa [#allocation3], 1 }
0x1f44   :  { %3677 = vsyncpa [#allocation6], 1 }
0x1f45   :  { %3678 = vsyncpa [#allocation9], 1 }
0x1f46   :  { %3679 = vsyncpa [#allocation12], 1 }
0x1f47   :  { %3680 = vsyncpa [#allocation15], 1 }
0x1f48   :  { %3681 = vsyncpa [#allocation18], 1 }
0x1f49   :  { %3682 = vsyncpa [#allocation21], 1 }
0x1f4a   :  { %3683 = vsyncpa [#allocation24], 1 }
0x1f4b   :  { %3684 = vsyncpa [#allocation27], 1 }
0x1f4c   :  { %3685 = vsyncpa [#allocation4], 1 }
0x1f4d   :  { %3686 = vsyncpa [#allocation31], 1 }

</bundles_post_ra>
